<compile_context>
chip_gen: v5e
topology: v5e:2x2
jax: 0.10.0
libtpu: 0.0.40
codegen_flags: <defaults>
</compile_context>

<pallas_src>
import math
import functools

import jax
import jax.numpy as jnp
from jax.experimental import pallas as pl
from jax.experimental.pallas import tpu as pltpu


def _round_up(n, m):
    return ((n + m - 1) // m) * m


def _sigmoid_via_tanh(v):
    # sigmoid(x) == 0.5*tanh(0.5*x) + 0.5  -> one EUP op + cheap VPU ops.
    # TODO(synk): on v6e/v7x, if profiling shows the EUP saturating, compute the
    # tanh calls in bf16 and cast back to f32 for the c/h update math.
    return 0.5 * jnp.tanh(0.5 * v) + 0.5


def lstm_chunk_kernel(x_ref, wih_hbm, whh_hbm, bias_ref, h0_ref, c0_ref,
                      out_ref, wih_sc, whh_sc, dma_sem, h_sc, c_sc):
    """Grid = (batch_tiles, time_chunks).  One step = one (Bt, TC) chunk.

    (h, c) are carried across the time axis in per-core VMEM scratch; the
    weights live in a SINGLE VMEM scratch copy, DMA'd from HBM once per batch
    tile (no double-buffered weight allocation).
    """
    Bt, TC, Dp = x_ref.shape
    Hp = h_sc.shape[1]

    # ---- new batch tile: load resident weights + reset carried state ----
    @pl.when(pl.program_id(1) == 0)
    def _():
        cp_ih = pltpu.make_async_copy(wih_hbm, wih_sc, dma_sem.at[0])
        cp_hh = pltpu.make_async_copy(whh_hbm, whh_sc, dma_sem.at[1])
        cp_ih.start()
        cp_hh.start()
        cp_ih.wait()
        cp_hh.wait()
        # broadcast learned initial state (1, Hp) over the batch tile
        h_sc[...] = jnp.broadcast_to(h0_ref[...], (Bt, Hp))
        c_sc[...] = jnp.broadcast_to(c0_ref[...], (Bt, Hp))

    # ---- hoisted input projection: one big (Bt*TC, Dp) x (Dp, 4Hp) MXU matmul ----
    # TODO(synk): software-pipeline this against the previous chunk's recurrence
    # (second x in_spec at c+1 + a gx VMEM scratch) to hide it when D is large.
    x_c = x_ref[...]                                            # (Bt, TC, Dp) mxu dtype
    gx = jnp.dot(x_c.reshape(Bt * TC, Dp), wih_sc[...],
                 preferred_element_type=jnp.float32)            # (Bt*TC, 4Hp) f32 acc
    gx = (gx + bias_ref[...]).reshape(Bt, TC, 4 * Hp)           # bias added once

    h = h_sc[...]                                               # f32 carries
    c = c_sc[...]
    whh = whh_sc[...]

    # ---- recurrence over the chunk (TC compile-time constant: static unroll,
    #      grouped in 8-step blocks so every output store is a sublane-dense
    #      (Bt, 8, Hp) slab instead of a masked width-1 vst.msk) ----
    # TODO(synk): hold W_hh^T in the MXU weight registers across the chunk via
    # pltpu.matmul_push_rhs / matmul_acc_lhs / matmul_pop to avoid re-pushing the
    # RHS every step; and for very large TC switch the group loop to
    # lax.fori_loop(..., unroll=8) to bound code size.
    hs = []
    for k in range(TC):
        gates = gx[:, k, :] + jnp.dot(h.astype(whh.dtype), whh,
                                      preferred_element_type=jnp.float32)  # (Bt, 4Hp)
        # PyTorch gate order i, f, g, o.  Hp is a multiple of 128 -> lane-aligned.
        i_g = _sigmoid_via_tanh(gates[:, 0 * Hp:1 * Hp])
        f_g = _sigmoid_via_tanh(gates[:, 1 * Hp:2 * Hp])
        g_g = jnp.tanh(gates[:, 2 * Hp:3 * Hp])
        o_g = _sigmoid_via_tanh(gates[:, 3 * Hp:4 * Hp])

        c = f_g * c + i_g * g_g
        h = o_g * jnp.tanh(c)

        hs.append(h)
        if (k + 1) % 8 == 0:
            # one sublane-aligned, lane-dense store per 8 steps
            out_ref[:, k - 7:k + 1, :] = jnp.stack(hs, axis=1).astype(out_ref.dtype)
            hs = []

    h_sc[...] = h
    c_sc[...] = c


@functools.partial(jax.jit,
                   static_argnames=("time_chunk", "batch_tile", "mxu_dtype"))
def rnn_forward(x, w_ih, w_hh, b_ih, b_hh, h0, c0, *,
                time_chunk=64, batch_tile=8, mxu_dtype=jnp.bfloat16):
    """
    x    : (B, T, D)   batch-first, like the PyTorch module
    w_ih : (4H, D), w_hh : (4H, H), b_ih/b_hh : (4H,)
    h0/c0: (1, 1, H)   learnable initial state (layers*directions = 1)
    returns (B, T, H)
    """
    B, T, D = x.shape
    H = w_hh.shape[1]
    out_dtype = x.dtype
    assert time_chunk % 8 == 0

    # ---- pad H and D to multiples of 128 (lane-dense gates, matmuls, stores).
    # Weights are padded PER GATE so the i|f|g|o layout is preserved; padded
    # rows/cols are zero, padded h/c lanes provably stay 0 (sigmoid(0)=.5 gates
    # times zero state), so real lanes are untouched.
    Hp = _round_up(H, 128)
    Dp = _round_up(D, 128)

    def pad_gate_matrix(w, r, rp, cdim, cp):
        w4 = w.reshape(4, r, cdim)
        w4 = jnp.pad(w4, ((0, 0), (0, rp - r), (0, cp - cdim)))
        return w4.reshape(4 * rp, cp)

    w_ih_p = pad_gate_matrix(w_ih, H, Hp, D, Dp)                 # (4Hp, Dp)
    w_hh_p = pad_gate_matrix(w_hh, H, Hp, H, Hp)                 # (4Hp, Hp)
    bias = (b_ih + b_hh).reshape(4, H)
    bias = jnp.pad(bias, ((0, 0), (0, Hp - H))).reshape(1, 4 * Hp).astype(jnp.float32)
    h0_p = jnp.pad(h0.reshape(1, H), ((0, 0), (0, Hp - H))).astype(jnp.float32)
    c0_p = jnp.pad(c0.reshape(1, H), ((0, 0), (0, Hp - H))).astype(jnp.float32)

    # ---- time chunking: always a multiple of 8 so every 8-step group store is
    # sublane-aligned (also covers short sequences like T=5).
    T8 = _round_up(T, 8)
    TC = T8 if T8 <= time_chunk else time_chunk
    T_pad = _round_up(T, TC)
    num_chunks = T_pad // TC

    # ---- batch tiling: leading "parallel" grid axis (both TensorCores on v7x).
    Bt = max(1, min(B, batch_tile))
    B_pad = _round_up(B, Bt)
    nb = B_pad // Bt

    pad_b, pad_t, pad_d = B_pad - B, T_pad - T, Dp - D
    if pad_b or pad_t or pad_d:
        x = jnp.pad(x, ((0, pad_b), (0, pad_t), (0, pad_d)))

    # MXU operands (optionally bf16); recurrent state / accumulation stay f32.
    x_in = x.astype(mxu_dtype)
    wih_t = w_ih_p.T.astype(mxu_dtype)                           # (Dp, 4Hp)
    whh_t = w_hh_p.T.astype(mxu_dtype)                           # (Hp, 4Hp)

    # ---- generation-aware scoped-VMEM budget (weights single-buffered in
    # scratch, x/out chunks double-buffered, gx slab, carries), 2x headroom,
    # clamped below this chip's physical VMEM per core.
    isz = jnp.dtype(mxu_dtype).itemsize
    osz = jnp.dtype(out_dtype).itemsize
    est = ((Dp * 4 * Hp + Hp * 4 * Hp) * isz      # resident weights (single copy)
           + 2 * Bt * TC * Dp * isz               # x chunk (double-buffered)
           + 2 * Bt * TC * Hp * osz               # out chunk (double-buffered)
           + Bt * TC * 4 * Hp * 4                 # in-kernel gx slab (f32)
           + 2 * Bt * Hp * 4                      # h/c carries
           + 2 * (4 * Hp + 2 * Hp) * 4)           # bias/h0/c0 (tiny)
    try:
        vmem_cap = int(pltpu.get_tpu_info().vmem_capacity_bytes)
    except Exception:
        vmem_cap = 64 << 20                        # conservative (v7x per-TC)
    vmem_limit = int(min(max(2 * est, 16 << 20),
                         max(vmem_cap - (4 << 20), 16 << 20)))

    out = pl.pallas_call(
        lstm_chunk_kernel,
        out_shape=jax.ShapeDtypeStruct((B_pad, T_pad, Hp), out_dtype),
        grid_spec=pltpu.PrefetchScalarGridSpec(
            num_scalar_prefetch=0,
            grid=(nb, num_chunks),
            in_specs=[
                pl.BlockSpec((Bt, TC, Dp), lambda b, c: (b, c, 0)),  # x chunk
                pl.BlockSpec(memory_space=pl.ANY),   # W_ih^T in HBM (manual 1x DMA)
                pl.BlockSpec(memory_space=pl.ANY),   # W_hh^T in HBM (manual 1x DMA)
                pl.BlockSpec((1, 4 * Hp), lambda b, c: (0, 0)),      # combined bias
                pl.BlockSpec((1, Hp), lambda b, c: (0, 0)),          # h0
                pl.BlockSpec((1, Hp), lambda b, c: (0, 0)),          # c0
            ],
            out_specs=pl.BlockSpec((Bt, TC, Hp), lambda b, c: (b, c, 0)),
            scratch_shapes=[
                pltpu.VMEM((Dp, 4 * Hp), mxu_dtype),   # resident W_ih^T (single buffer)
                pltpu.VMEM((Hp, 4 * Hp), mxu_dtype),   # resident W_hh^T (single buffer)
                pltpu.SemaphoreType.DMA((2,)),          # weight-load semaphores
                pltpu.VMEM((Bt, Hp), jnp.float32),      # h carry (per core)
                pltpu.VMEM((Bt, Hp), jnp.float32),      # c carry (per core)
            ],
        ),
        compiler_params=pltpu.CompilerParams(
            # batch tiles are independent recurrences -> "parallel" (megacore);
            # time is a true recurrence -> "arbitrary".
            dimension_semantics=("parallel", "arbitrary"),
            vmem_limit_bytes=vmem_limit,
        ),
    )(x_in, wih_t, whh_t, bias, h0_p, c0_p)

    return out[:B, :T, :H]


def _reference_lstm(x, w_ih, w_hh, b_ih, b_hh, h0, c0):
    """Pure-JAX reference (lax.scan) matching PyTorch nn.LSTM semantics."""
    B, T, D = x.shape
    H = w_hh.shape[1]
    h = jnp.broadcast_to(h0.reshape(1, H), (B, H))
    c = jnp.broadcast_to(c0.reshape(1, H), (B, H))

    def step(carry, x_t):
        h, c = carry
        gates = x_t @ w_ih.T + h @ w_hh.T + b_ih + b_hh
        i = jax.nn.sigmoid(gates[:, 0 * H:1 * H])
        f = jax.nn.sigmoid(gates[:, 1 * H:2 * H])
        g = jnp.tanh(gates[:, 2 * H:3 * H])
        o = jax.nn.sigmoid(gates[:, 3 * H:4 * H])
        c = f * c + i * g
        h = o * jnp.tanh(c)
        return (h, c), h

    _, hs = jax.lax.scan(step, (h, c), jnp.transpose(x, (1, 0, 2)))
    return jnp.transpose(hs, (1, 0, 2))


if __name__ == "__main__":
    # small shapes consistent with forward(inp): BATCH x LEN x H_DIM
    B, T, D, H = 2, 8, 32, 32
    key = jax.random.PRNGKey(0)
    kx, kwih, kwhh, kbih, kbhh, kh0, kc0 = jax.random.split(key, 7)

    x = jax.random.normal(kx, (B, T, D), dtype=jnp.float32)

    # PyTorch-style LSTM init: U(-1/sqrt(H), 1/sqrt(H))
    bound = 1.0 / math.sqrt(H)
    w_ih = jax.random.uniform(kwih, (4 * H, D), minval=-bound, maxval=bound, dtype=jnp.float32)
    w_hh = jax.random.uniform(kwhh, (4 * H, H), minval=-bound, maxval=bound, dtype=jnp.float32)
    b_ih = jax.random.uniform(kbih, (4 * H,), minval=-bound, maxval=bound, dtype=jnp.float32)
    b_hh = jax.random.uniform(kbhh, (4 * H,), minval=-bound, maxval=bound, dtype=jnp.float32)

    # init_hidden(..., initfun=torch.randn): learnable h0/c0 of shape (1, 1, H)
    h0 = jax.random.normal(kh0, (1, 1, H), dtype=jnp.float32)
    c0 = jax.random.normal(kc0, (1, 1, H), dtype=jnp.float32)

    ref = _reference_lstm(x, w_ih, w_hh, b_ih, b_hh, h0, c0)

    # 1) exact-precision path (f32 MXU inputs): tight semantic check
    out_f32 = jax.block_until_ready(
        rnn_forward(x, w_ih, w_hh, b_ih, b_hh, h0, c0, mxu_dtype=jnp.float32))
    assert out_f32.shape == (B, T, H)
    assert jnp.allclose(out_f32, ref, atol=1e-4, rtol=1e-4), \
        "Pallas LSTM (f32) mismatch vs reference"

    # 2) fast path (bf16 MXU inputs, f32 carries/accumulation): loose check
    out_bf16 = jax.block_until_ready(
        rnn_forward(x, w_ih, w_hh, b_ih, b_hh, h0, c0, mxu_dtype=jnp.bfloat16))
    assert out_bf16.shape == (B, T, H)
    assert jnp.allclose(out_bf16, ref, atol=5e-2, rtol=5e-2), \
        "Pallas LSTM (bf16 MXU) mismatch vs reference"

    print("KERNEL_OK")
</pallas_src>

<mosaic_0001>
module attributes {stable_mosaic.version = 11 : i64} {
  func.func @lstm_chunk_kernel(%arg0: i32, %arg1: i32, %arg2: memref<2x8x128xf32, #tpu.memory_space<vmem>>, %arg3: memref<128x512xf32, #tpu.memory_space<any>>, %arg4: memref<128x512xf32, #tpu.memory_space<any>>, %arg5: memref<1x512xf32, #tpu.memory_space<vmem>>, %arg6: memref<1x128xf32, #tpu.memory_space<vmem>>, %arg7: memref<1x128xf32, #tpu.memory_space<vmem>>, %arg8: memref<2x8x128xf32, #tpu.memory_space<vmem>>, %arg9: memref<128x512xf32, #tpu.memory_space<vmem>>, %arg10: memref<128x512xf32, #tpu.memory_space<vmem>>, %arg11: memref<2x!tpu.dma_semaphore, #tpu.memory_space<semaphore_mem>>, %arg12: memref<2x128xf32, #tpu.memory_space<vmem>>, %arg13: memref<2x128xf32, #tpu.memory_space<vmem>>) attributes {dimension_semantics = [#tpu.dimension_semantics<parallel>, #tpu.dimension_semantics<arbitrary>], iteration_bounds = array<i64: 1, 1>, scalar_prefetch = 0 : i64, scratch_operands = 5 : i64, tpu.core_type = #tpu.core_type<tc>, window_params = [{transform_indices = @transform_0, window_bounds = array<i64: 2, 8, 128>}, {}, {}, {pipeline_mode = #tpu.pipeline_mode<synchronous>, transform_indices = @transform_3, window_bounds = array<i64: 1, 512>}, {pipeline_mode = #tpu.pipeline_mode<synchronous>, transform_indices = @transform_4, window_bounds = array<i64: 1, 128>}, {pipeline_mode = #tpu.pipeline_mode<synchronous>, transform_indices = @transform_5, window_bounds = array<i64: 1, 128>}, {transform_indices = @transform_6, window_bounds = array<i64: 2, 8, 128>}]} {
    %c0_i32 = arith.constant 0 : i32
    %0 = arith.cmpi eq, %arg1, %c0_i32 : i32
    %1 = arith.extui %0 : i1 to i32
    %c0_i32_0 = arith.constant 0 : i32
    %2 = arith.cmpi ne, %1, %c0_i32_0 : i32
    scf.if %2 {
      %c0_i32_100 = arith.constant 0 : i32
      %306 = tpu.memref_slice %arg11[%c0_i32_100] : memref<2x!tpu.dma_semaphore, #tpu.memory_space<semaphore_mem>> -> memref<1x!tpu.dma_semaphore, #tpu.memory_space<semaphore_mem>>
      %307 = tpu.memref_squeeze %306 : memref<1x!tpu.dma_semaphore, #tpu.memory_space<semaphore_mem>> -> memref<!tpu.dma_semaphore, #tpu.memory_space<semaphore_mem>>
      tpu.enqueue_dma source(%arg3 : memref<128x512xf32, #tpu.memory_space<any>>) target(%arg9 : memref<128x512xf32, #tpu.memory_space<vmem>>) target_semaphore(%307 : memref<!tpu.dma_semaphore, #tpu.memory_space<semaphore_mem>>)
      %c1_i32 = arith.constant 1 : i32
      %308 = tpu.memref_slice %arg11[%c1_i32] : memref<2x!tpu.dma_semaphore, #tpu.memory_space<semaphore_mem>> -> memref<1x!tpu.dma_semaphore, #tpu.memory_space<semaphore_mem>>
      %309 = tpu.memref_squeeze %308 : memref<1x!tpu.dma_semaphore, #tpu.memory_space<semaphore_mem>> -> memref<!tpu.dma_semaphore, #tpu.memory_space<semaphore_mem>>
      tpu.enqueue_dma source(%arg4 : memref<128x512xf32, #tpu.memory_space<any>>) target(%arg10 : memref<128x512xf32, #tpu.memory_space<vmem>>) target_semaphore(%309 : memref<!tpu.dma_semaphore, #tpu.memory_space<semaphore_mem>>)
      %c0_i32_101 = arith.constant 0 : i32
      %310 = tpu.memref_slice %arg11[%c0_i32_101] : memref<2x!tpu.dma_semaphore, #tpu.memory_space<semaphore_mem>> -> memref<1x!tpu.dma_semaphore, #tpu.memory_space<semaphore_mem>>
      %311 = tpu.memref_squeeze %310 : memref<1x!tpu.dma_semaphore, #tpu.memory_space<semaphore_mem>> -> memref<!tpu.dma_semaphore, #tpu.memory_space<semaphore_mem>>
      tpu.wait_dma2 semaphore(%311 : memref<!tpu.dma_semaphore, #tpu.memory_space<semaphore_mem>>) src(%arg3 : memref<128x512xf32, #tpu.memory_space<any>>) dst(%arg9 : memref<128x512xf32, #tpu.memory_space<vmem>>)
      %c1_i32_102 = arith.constant 1 : i32
      %312 = tpu.memref_slice %arg11[%c1_i32_102] : memref<2x!tpu.dma_semaphore, #tpu.memory_space<semaphore_mem>> -> memref<1x!tpu.dma_semaphore, #tpu.memory_space<semaphore_mem>>
      %313 = tpu.memref_squeeze %312 : memref<1x!tpu.dma_semaphore, #tpu.memory_space<semaphore_mem>> -> memref<!tpu.dma_semaphore, #tpu.memory_space<semaphore_mem>>
      tpu.wait_dma2 semaphore(%313 : memref<!tpu.dma_semaphore, #tpu.memory_space<semaphore_mem>>) src(%arg4 : memref<128x512xf32, #tpu.memory_space<any>>) dst(%arg10 : memref<128x512xf32, #tpu.memory_space<vmem>>)
      %c0_103 = arith.constant 0 : index
      %c0_104 = arith.constant 0 : index
      %314 = vector.load %arg6[%c0_103, %c0_104] : memref<1x128xf32, #tpu.memory_space<vmem>>, vector<1x128xf32>
      %315 = vector.shape_cast %314 : vector<1x128xf32> to vector<1x128xf32>
      %316 = vector.broadcast %315 : vector<1x128xf32> to vector<2x128xf32>
      %c0_105 = arith.constant 0 : index
      %c0_106 = arith.constant 0 : index
      %317 = vector.load %arg12[%c0_105, %c0_106] : memref<2x128xf32, #tpu.memory_space<vmem>>, vector<2x128xf32>
      tpu.vector_store %arg12[%c0_105, %c0_106], %316 {strides = array<i32>} : memref<2x128xf32, #tpu.memory_space<vmem>>, vector<2x128xf32>,
      %c0_107 = arith.constant 0 : index
      %c0_108 = arith.constant 0 : index
      %318 = vector.load %arg7[%c0_107, %c0_108] : memref<1x128xf32, #tpu.memory_space<vmem>>, vector<1x128xf32>
      %319 = vector.shape_cast %318 : vector<1x128xf32> to vector<1x128xf32>
      %320 = vector.broadcast %319 : vector<1x128xf32> to vector<2x128xf32>
      %c0_109 = arith.constant 0 : index
      %c0_110 = arith.constant 0 : index
      %321 = vector.load %arg13[%c0_109, %c0_110] : memref<2x128xf32, #tpu.memory_space<vmem>>, vector<2x128xf32>
      tpu.vector_store %arg13[%c0_109, %c0_110], %320 {strides = array<i32>} : memref<2x128xf32, #tpu.memory_space<vmem>>, vector<2x128xf32>,
    } else {
    }
    %c0 = arith.constant 0 : index
    %c0_1 = arith.constant 0 : index
    %c0_2 = arith.constant 0 : index
    %3 = vector.load %arg2[%c0, %c0_1, %c0_2] : memref<2x8x128xf32, #tpu.memory_space<vmem>>, vector<2x8x128xf32>
    %4 = vector.shape_cast %3 : vector<2x8x128xf32> to vector<16x128xf32>
    %c0_3 = arith.constant 0 : index
    %c0_4 = arith.constant 0 : index
    %5 = vector.load %arg9[%c0_3, %c0_4] : memref<128x512xf32, #tpu.memory_space<vmem>>, vector<128x512xf32>
    %cst = arith.constant dense<0.000000e+00> : vector<16x512xf32>
    %6 = tpu.matmul %4, %5, %cst {dimension_numbers = #tpu.dot_dimension_numbers<[1], [0], [0], [1], [0, 0, 1, 1], [], []>} : vector<16x128xf32>, vector<128x512xf32>, vector<16x512xf32> -> vector<16x512xf32>
    %c0_5 = arith.constant 0 : index
    %c0_6 = arith.constant 0 : index
    %7 = vector.load %arg5[%c0_5, %c0_6] : memref<1x512xf32, #tpu.memory_space<vmem>>, vector<1x512xf32>
    %8 = vector.broadcast %7 : vector<1x512xf32> to vector<16x512xf32>
    %9 = arith.addf %6, %8 : vector<16x512xf32>
    %10 = vector.shape_cast %9 : vector<16x512xf32> to vector<2x8x512xf32>
    %c0_7 = arith.constant 0 : index
    %c0_8 = arith.constant 0 : index
    %11 = vector.load %arg12[%c0_7, %c0_8] : memref<2x128xf32, #tpu.memory_space<vmem>>, vector<2x128xf32>
    %c0_9 = arith.constant 0 : index
    %c0_10 = arith.constant 0 : index
    %12 = vector.load %arg13[%c0_9, %c0_10] : memref<2x128xf32, #tpu.memory_space<vmem>>, vector<2x128xf32>
    %c0_11 = arith.constant 0 : index
    %c0_12 = arith.constant 0 : index
    %13 = vector.load %arg10[%c0_11, %c0_12] : memref<128x512xf32, #tpu.memory_space<vmem>>, vector<128x512xf32>
    %14 = vector.extract_strided_slice %10 {offsets = [0, 0, 0], sizes = [2, 1, 512], strides = [1, 1, 1]} : vector<2x8x512xf32> to vector<2x1x512xf32>
    %15 = vector.shape_cast %14 : vector<2x1x512xf32> to vector<2x512xf32>
    %cst_13 = arith.constant dense<0.000000e+00> : vector<2x512xf32>
    %16 = tpu.matmul %11, %13, %cst_13 {dimension_numbers = #tpu.dot_dimension_numbers<[1], [0], [0], [1], [0, 0, 1, 1], [], []>} : vector<2x128xf32>, vector<128x512xf32>, vector<2x512xf32> -> vector<2x512xf32>
    %17 = arith.addf %15, %16 : vector<2x512xf32>
    %18 = vector.extract_strided_slice %17 {offsets = [0, 0], sizes = [2, 128], strides = [1, 1]} : vector<2x512xf32> to vector<2x128xf32>
    %cst_14 = arith.constant 5.000000e-01 : f32
    %19 = vector.broadcast %cst_14 : f32 to vector<2x128xf32>
    %20 = arith.mulf %19, %18 : vector<2x128xf32>
    %21 = math.tanh %20 : vector<2x128xf32>
    %cst_15 = arith.constant 5.000000e-01 : f32
    %22 = vector.broadcast %cst_15 : f32 to vector<2x128xf32>
    %23 = arith.mulf %22, %21 : vector<2x128xf32>
    %cst_16 = arith.constant 5.000000e-01 : f32
    %24 = vector.broadcast %cst_16 : f32 to vector<2x128xf32>
    %25 = arith.addf %23, %24 : vector<2x128xf32>
    %26 = vector.extract_strided_slice %17 {offsets = [0, 128], sizes = [2, 128], strides = [1, 1]} : vector<2x512xf32> to vector<2x128xf32>
    %cst_17 = arith.constant 5.000000e-01 : f32
    %27 = vector.broadcast %cst_17 : f32 to vector<2x128xf32>
    %28 = arith.mulf %27, %26 : vector<2x128xf32>
    %29 = math.tanh %28 : vector<2x128xf32>
    %cst_18 = arith.constant 5.000000e-01 : f32
    %30 = vector.broadcast %cst_18 : f32 to vector<2x128xf32>
    %31 = arith.mulf %30, %29 : vector<2x128xf32>
    %cst_19 = arith.constant 5.000000e-01 : f32
    %32 = vector.broadcast %cst_19 : f32 to vector<2x128xf32>
    %33 = arith.addf %31, %32 : vector<2x128xf32>
    %34 = vector.extract_strided_slice %17 {offsets = [0, 256], sizes = [2, 128], strides = [1, 1]} : vector<2x512xf32> to vector<2x128xf32>
    %35 = math.tanh %34 : vector<2x128xf32>
    %36 = vector.extract_strided_slice %17 {offsets = [0, 384], sizes = [2, 128], strides = [1, 1]} : vector<2x512xf32> to vector<2x128xf32>
    %cst_20 = arith.constant 5.000000e-01 : f32
    %37 = vector.broadcast %cst_20 : f32 to vector<2x128xf32>
    %38 = arith.mulf %37, %36 : vector<2x128xf32>
    %39 = math.tanh %38 : vector<2x128xf32>
    %cst_21 = arith.constant 5.000000e-01 : f32
    %40 = vector.broadcast %cst_21 : f32 to vector<2x128xf32>
    %41 = arith.mulf %40, %39 : vector<2x128xf32>
    %cst_22 = arith.constant 5.000000e-01 : f32
    %42 = vector.broadcast %cst_22 : f32 to vector<2x128xf32>
    %43 = arith.addf %41, %42 : vector<2x128xf32>
    %44 = arith.mulf %33, %12 : vector<2x128xf32>
    %45 = arith.mulf %25, %35 : vector<2x128xf32>
    %46 = arith.addf %44, %45 : vector<2x128xf32>
    %47 = math.tanh %46 : vector<2x128xf32>
    %48 = arith.mulf %43, %47 : vector<2x128xf32>
    %49 = vector.extract_strided_slice %10 {offsets = [0, 1, 0], sizes = [2, 1, 512], strides = [1, 1, 1]} : vector<2x8x512xf32> to vector<2x1x512xf32>
    %50 = vector.shape_cast %49 : vector<2x1x512xf32> to vector<2x512xf32>
    %cst_23 = arith.constant dense<0.000000e+00> : vector<2x512xf32>
    %51 = tpu.matmul %48, %13, %cst_23 {dimension_numbers = #tpu.dot_dimension_numbers<[1], [0], [0], [1], [0, 0, 1, 1], [], []>} : vector<2x128xf32>, vector<128x512xf32>, vector<2x512xf32> -> vector<2x512xf32>
    %52 = arith.addf %50, %51 : vector<2x512xf32>
    %53 = vector.extract_strided_slice %52 {offsets = [0, 0], sizes = [2, 128], strides = [1, 1]} : vector<2x512xf32> to vector<2x128xf32>
    %cst_24 = arith.constant 5.000000e-01 : f32
    %54 = vector.broadcast %cst_24 : f32 to vector<2x128xf32>
    %55 = arith.mulf %54, %53 : vector<2x128xf32>
    %56 = math.tanh %55 : vector<2x128xf32>
    %cst_25 = arith.constant 5.000000e-01 : f32
    %57 = vector.broadcast %cst_25 : f32 to vector<2x128xf32>
    %58 = arith.mulf %57, %56 : vector<2x128xf32>
    %cst_26 = arith.constant 5.000000e-01 : f32
    %59 = vector.broadcast %cst_26 : f32 to vector<2x128xf32>
    %60 = arith.addf %58, %59 : vector<2x128xf32>
    %61 = vector.extract_strided_slice %52 {offsets = [0, 128], sizes = [2, 128], strides = [1, 1]} : vector<2x512xf32> to vector<2x128xf32>
    %cst_27 = arith.constant 5.000000e-01 : f32
    %62 = vector.broadcast %cst_27 : f32 to vector<2x128xf32>
    %63 = arith.mulf %62, %61 : vector<2x128xf32>
    %64 = math.tanh %63 : vector<2x128xf32>
    %cst_28 = arith.constant 5.000000e-01 : f32
    %65 = vector.broadcast %cst_28 : f32 to vector<2x128xf32>
    %66 = arith.mulf %65, %64 : vector<2x128xf32>
    %cst_29 = arith.constant 5.000000e-01 : f32
    %67 = vector.broadcast %cst_29 : f32 to vector<2x128xf32>
    %68 = arith.addf %66, %67 : vector<2x128xf32>
    %69 = vector.extract_strided_slice %52 {offsets = [0, 256], sizes = [2, 128], strides = [1, 1]} : vector<2x512xf32> to vector<2x128xf32>
    %70 = math.tanh %69 : vector<2x128xf32>
    %71 = vector.extract_strided_slice %52 {offsets = [0, 384], sizes = [2, 128], strides = [1, 1]} : vector<2x512xf32> to vector<2x128xf32>
    %cst_30 = arith.constant 5.000000e-01 : f32
    %72 = vector.broadcast %cst_30 : f32 to vector<2x128xf32>
    %73 = arith.mulf %72, %71 : vector<2x128xf32>
    %74 = math.tanh %73 : vector<2x128xf32>
    %cst_31 = arith.constant 5.000000e-01 : f32
    %75 = vector.broadcast %cst_31 : f32 to vector<2x128xf32>
    %76 = arith.mulf %75, %74 : vector<2x128xf32>
    %cst_32 = arith.constant 5.000000e-01 : f32
    %77 = vector.broadcast %cst_32 : f32 to vector<2x128xf32>
    %78 = arith.addf %76, %77 : vector<2x128xf32>
    %79 = arith.mulf %68, %46 : vector<2x128xf32>
    %80 = arith.mulf %60, %70 : vector<2x128xf32>
    %81 = arith.addf %79, %80 : vector<2x128xf32>
    %82 = math.tanh %81 : vector<2x128xf32>
    %83 = arith.mulf %78, %82 : vector<2x128xf32>
    %84 = vector.extract_strided_slice %10 {offsets = [0, 2, 0], sizes = [2, 1, 512], strides = [1, 1, 1]} : vector<2x8x512xf32> to vector<2x1x512xf32>
    %85 = vector.shape_cast %84 : vector<2x1x512xf32> to vector<2x512xf32>
    %cst_33 = arith.constant dense<0.000000e+00> : vector<2x512xf32>
    %86 = tpu.matmul %83, %13, %cst_33 {dimension_numbers = #tpu.dot_dimension_numbers<[1], [0], [0], [1], [0, 0, 1, 1], [], []>} : vector<2x128xf32>, vector<128x512xf32>, vector<2x512xf32> -> vector<2x512xf32>
    %87 = arith.addf %85, %86 : vector<2x512xf32>
    %88 = vector.extract_strided_slice %87 {offsets = [0, 0], sizes = [2, 128], strides = [1, 1]} : vector<2x512xf32> to vector<2x128xf32>
    %cst_34 = arith.constant 5.000000e-01 : f32
    %89 = vector.broadcast %cst_34 : f32 to vector<2x128xf32>
    %90 = arith.mulf %89, %88 : vector<2x128xf32>
    %91 = math.tanh %90 : vector<2x128xf32>
    %cst_35 = arith.constant 5.000000e-01 : f32
    %92 = vector.broadcast %cst_35 : f32 to vector<2x128xf32>
    %93 = arith.mulf %92, %91 : vector<2x128xf32>
    %cst_36 = arith.constant 5.000000e-01 : f32
    %94 = vector.broadcast %cst_36 : f32 to vector<2x128xf32>
    %95 = arith.addf %93, %94 : vector<2x128xf32>
    %96 = vector.extract_strided_slice %87 {offsets = [0, 128], sizes = [2, 128], strides = [1, 1]} : vector<2x512xf32> to vector<2x128xf32>
    %cst_37 = arith.constant 5.000000e-01 : f32
    %97 = vector.broadcast %cst_37 : f32 to vector<2x128xf32>
    %98 = arith.mulf %97, %96 : vector<2x128xf32>
    %99 = math.tanh %98 : vector<2x128xf32>
    %cst_38 = arith.constant 5.000000e-01 : f32
    %100 = vector.broadcast %cst_38 : f32 to vector<2x128xf32>
    %101 = arith.mulf %100, %99 : vector<2x128xf32>
    %cst_39 = arith.constant 5.000000e-01 : f32
    %102 = vector.broadcast %cst_39 : f32 to vector<2x128xf32>
    %103 = arith.addf %101, %102 : vector<2x128xf32>
    %104 = vector.extract_strided_slice %87 {offsets = [0, 256], sizes = [2, 128], strides = [1, 1]} : vector<2x512xf32> to vector<2x128xf32>
    %105 = math.tanh %104 : vector<2x128xf32>
    %106 = vector.extract_strided_slice %87 {offsets = [0, 384], sizes = [2, 128], strides = [1, 1]} : vector<2x512xf32> to vector<2x128xf32>
    %cst_40 = arith.constant 5.000000e-01 : f32
    %107 = vector.broadcast %cst_40 : f32 to vector<2x128xf32>
    %108 = arith.mulf %107, %106 : vector<2x128xf32>
    %109 = math.tanh %108 : vector<2x128xf32>
    %cst_41 = arith.constant 5.000000e-01 : f32
    %110 = vector.broadcast %cst_41 : f32 to vector<2x128xf32>
    %111 = arith.mulf %110, %109 : vector<2x128xf32>
    %cst_42 = arith.constant 5.000000e-01 : f32
    %112 = vector.broadcast %cst_42 : f32 to vector<2x128xf32>
    %113 = arith.addf %111, %112 : vector<2x128xf32>
    %114 = arith.mulf %103, %81 : vector<2x128xf32>
    %115 = arith.mulf %95, %105 : vector<2x128xf32>
    %116 = arith.addf %114, %115 : vector<2x128xf32>
    %117 = math.tanh %116 : vector<2x128xf32>
    %118 = arith.mulf %113, %117 : vector<2x128xf32>
    %119 = vector.extract_strided_slice %10 {offsets = [0, 3, 0], sizes = [2, 1, 512], strides = [1, 1, 1]} : vector<2x8x512xf32> to vector<2x1x512xf32>
    %120 = vector.shape_cast %119 : vector<2x1x512xf32> to vector<2x512xf32>
    %cst_43 = arith.constant dense<0.000000e+00> : vector<2x512xf32>
    %121 = tpu.matmul %118, %13, %cst_43 {dimension_numbers = #tpu.dot_dimension_numbers<[1], [0], [0], [1], [0, 0, 1, 1], [], []>} : vector<2x128xf32>, vector<128x512xf32>, vector<2x512xf32> -> vector<2x512xf32>
    %122 = arith.addf %120, %121 : vector<2x512xf32>
    %123 = vector.extract_strided_slice %122 {offsets = [0, 0], sizes = [2, 128], strides = [1, 1]} : vector<2x512xf32> to vector<2x128xf32>
    %cst_44 = arith.constant 5.000000e-01 : f32
    %124 = vector.broadcast %cst_44 : f32 to vector<2x128xf32>
    %125 = arith.mulf %124, %123 : vector<2x128xf32>
    %126 = math.tanh %125 : vector<2x128xf32>
    %cst_45 = arith.constant 5.000000e-01 : f32
    %127 = vector.broadcast %cst_45 : f32 to vector<2x128xf32>
    %128 = arith.mulf %127, %126 : vector<2x128xf32>
    %cst_46 = arith.constant 5.000000e-01 : f32
    %129 = vector.broadcast %cst_46 : f32 to vector<2x128xf32>
    %130 = arith.addf %128, %129 : vector<2x128xf32>
    %131 = vector.extract_strided_slice %122 {offsets = [0, 128], sizes = [2, 128], strides = [1, 1]} : vector<2x512xf32> to vector<2x128xf32>
    %cst_47 = arith.constant 5.000000e-01 : f32
    %132 = vector.broadcast %cst_47 : f32 to vector<2x128xf32>
    %133 = arith.mulf %132, %131 : vector<2x128xf32>
    %134 = math.tanh %133 : vector<2x128xf32>
    %cst_48 = arith.constant 5.000000e-01 : f32
    %135 = vector.broadcast %cst_48 : f32 to vector<2x128xf32>
    %136 = arith.mulf %135, %134 : vector<2x128xf32>
    %cst_49 = arith.constant 5.000000e-01 : f32
    %137 = vector.broadcast %cst_49 : f32 to vector<2x128xf32>
    %138 = arith.addf %136, %137 : vector<2x128xf32>
    %139 = vector.extract_strided_slice %122 {offsets = [0, 256], sizes = [2, 128], strides = [1, 1]} : vector<2x512xf32> to vector<2x128xf32>
    %140 = math.tanh %139 : vector<2x128xf32>
    %141 = vector.extract_strided_slice %122 {offsets = [0, 384], sizes = [2, 128], strides = [1, 1]} : vector<2x512xf32> to vector<2x128xf32>
    %cst_50 = arith.constant 5.000000e-01 : f32
    %142 = vector.broadcast %cst_50 : f32 to vector<2x128xf32>
    %143 = arith.mulf %142, %141 : vector<2x128xf32>
    %144 = math.tanh %143 : vector<2x128xf32>
    %cst_51 = arith.constant 5.000000e-01 : f32
    %145 = vector.broadcast %cst_51 : f32 to vector<2x128xf32>
    %146 = arith.mulf %145, %144 : vector<2x128xf32>
    %cst_52 = arith.constant 5.000000e-01 : f32
    %147 = vector.broadcast %cst_52 : f32 to vector<2x128xf32>
    %148 = arith.addf %146, %147 : vector<2x128xf32>
    %149 = arith.mulf %138, %116 : vector<2x128xf32>
    %150 = arith.mulf %130, %140 : vector<2x128xf32>
    %151 = arith.addf %149, %150 : vector<2x128xf32>
    %152 = math.tanh %151 : vector<2x128xf32>
    %153 = arith.mulf %148, %152 : vector<2x128xf32>
    %154 = vector.extract_strided_slice %10 {offsets = [0, 4, 0], sizes = [2, 1, 512], strides = [1, 1, 1]} : vector<2x8x512xf32> to vector<2x1x512xf32>
    %155 = vector.shape_cast %154 : vector<2x1x512xf32> to vector<2x512xf32>
    %cst_53 = arith.constant dense<0.000000e+00> : vector<2x512xf32>
    %156 = tpu.matmul %153, %13, %cst_53 {dimension_numbers = #tpu.dot_dimension_numbers<[1], [0], [0], [1], [0, 0, 1, 1], [], []>} : vector<2x128xf32>, vector<128x512xf32>, vector<2x512xf32> -> vector<2x512xf32>
    %157 = arith.addf %155, %156 : vector<2x512xf32>
    %158 = vector.extract_strided_slice %157 {offsets = [0, 0], sizes = [2, 128], strides = [1, 1]} : vector<2x512xf32> to vector<2x128xf32>
    %cst_54 = arith.constant 5.000000e-01 : f32
    %159 = vector.broadcast %cst_54 : f32 to vector<2x128xf32>
    %160 = arith.mulf %159, %158 : vector<2x128xf32>
    %161 = math.tanh %160 : vector<2x128xf32>
    %cst_55 = arith.constant 5.000000e-01 : f32
    %162 = vector.broadcast %cst_55 : f32 to vector<2x128xf32>
    %163 = arith.mulf %162, %161 : vector<2x128xf32>
    %cst_56 = arith.constant 5.000000e-01 : f32
    %164 = vector.broadcast %cst_56 : f32 to vector<2x128xf32>
    %165 = arith.addf %163, %164 : vector<2x128xf32>
    %166 = vector.extract_strided_slice %157 {offsets = [0, 128], sizes = [2, 128], strides = [1, 1]} : vector<2x512xf32> to vector<2x128xf32>
    %cst_57 = arith.constant 5.000000e-01 : f32
    %167 = vector.broadcast %cst_57 : f32 to vector<2x128xf32>
    %168 = arith.mulf %167, %166 : vector<2x128xf32>
    %169 = math.tanh %168 : vector<2x128xf32>
    %cst_58 = arith.constant 5.000000e-01 : f32
    %170 = vector.broadcast %cst_58 : f32 to vector<2x128xf32>
    %171 = arith.mulf %170, %169 : vector<2x128xf32>
    %cst_59 = arith.constant 5.000000e-01 : f32
    %172 = vector.broadcast %cst_59 : f32 to vector<2x128xf32>
    %173 = arith.addf %171, %172 : vector<2x128xf32>
    %174 = vector.extract_strided_slice %157 {offsets = [0, 256], sizes = [2, 128], strides = [1, 1]} : vector<2x512xf32> to vector<2x128xf32>
    %175 = math.tanh %174 : vector<2x128xf32>
    %176 = vector.extract_strided_slice %157 {offsets = [0, 384], sizes = [2, 128], strides = [1, 1]} : vector<2x512xf32> to vector<2x128xf32>
    %cst_60 = arith.constant 5.000000e-01 : f32
    %177 = vector.broadcast %cst_60 : f32 to vector<2x128xf32>
    %178 = arith.mulf %177, %176 : vector<2x128xf32>
    %179 = math.tanh %178 : vector<2x128xf32>
    %cst_61 = arith.constant 5.000000e-01 : f32
    %180 = vector.broadcast %cst_61 : f32 to vector<2x128xf32>
    %181 = arith.mulf %180, %179 : vector<2x128xf32>
    %cst_62 = arith.constant 5.000000e-01 : f32
    %182 = vector.broadcast %cst_62 : f32 to vector<2x128xf32>
    %183 = arith.addf %181, %182 : vector<2x128xf32>
    %184 = arith.mulf %173, %151 : vector<2x128xf32>
    %185 = arith.mulf %165, %175 : vector<2x128xf32>
    %186 = arith.addf %184, %185 : vector<2x128xf32>
    %187 = math.tanh %186 : vector<2x128xf32>
    %188 = arith.mulf %183, %187 : vector<2x128xf32>
    %189 = vector.extract_strided_slice %10 {offsets = [0, 5, 0], sizes = [2, 1, 512], strides = [1, 1, 1]} : vector<2x8x512xf32> to vector<2x1x512xf32>
    %190 = vector.shape_cast %189 : vector<2x1x512xf32> to vector<2x512xf32>
    %cst_63 = arith.constant dense<0.000000e+00> : vector<2x512xf32>
    %191 = tpu.matmul %188, %13, %cst_63 {dimension_numbers = #tpu.dot_dimension_numbers<[1], [0], [0], [1], [0, 0, 1, 1], [], []>} : vector<2x128xf32>, vector<128x512xf32>, vector<2x512xf32> -> vector<2x512xf32>
    %192 = arith.addf %190, %191 : vector<2x512xf32>
    %193 = vector.extract_strided_slice %192 {offsets = [0, 0], sizes = [2, 128], strides = [1, 1]} : vector<2x512xf32> to vector<2x128xf32>
    %cst_64 = arith.constant 5.000000e-01 : f32
    %194 = vector.broadcast %cst_64 : f32 to vector<2x128xf32>
    %195 = arith.mulf %194, %193 : vector<2x128xf32>
    %196 = math.tanh %195 : vector<2x128xf32>
    %cst_65 = arith.constant 5.000000e-01 : f32
    %197 = vector.broadcast %cst_65 : f32 to vector<2x128xf32>
    %198 = arith.mulf %197, %196 : vector<2x128xf32>
    %cst_66 = arith.constant 5.000000e-01 : f32
    %199 = vector.broadcast %cst_66 : f32 to vector<2x128xf32>
    %200 = arith.addf %198, %199 : vector<2x128xf32>
    %201 = vector.extract_strided_slice %192 {offsets = [0, 128], sizes = [2, 128], strides = [1, 1]} : vector<2x512xf32> to vector<2x128xf32>
    %cst_67 = arith.constant 5.000000e-01 : f32
    %202 = vector.broadcast %cst_67 : f32 to vector<2x128xf32>
    %203 = arith.mulf %202, %201 : vector<2x128xf32>
    %204 = math.tanh %203 : vector<2x128xf32>
    %cst_68 = arith.constant 5.000000e-01 : f32
    %205 = vector.broadcast %cst_68 : f32 to vector<2x128xf32>
    %206 = arith.mulf %205, %204 : vector<2x128xf32>
    %cst_69 = arith.constant 5.000000e-01 : f32
    %207 = vector.broadcast %cst_69 : f32 to vector<2x128xf32>
    %208 = arith.addf %206, %207 : vector<2x128xf32>
    %209 = vector.extract_strided_slice %192 {offsets = [0, 256], sizes = [2, 128], strides = [1, 1]} : vector<2x512xf32> to vector<2x128xf32>
    %210 = math.tanh %209 : vector<2x128xf32>
    %211 = vector.extract_strided_slice %192 {offsets = [0, 384], sizes = [2, 128], strides = [1, 1]} : vector<2x512xf32> to vector<2x128xf32>
    %cst_70 = arith.constant 5.000000e-01 : f32
    %212 = vector.broadcast %cst_70 : f32 to vector<2x128xf32>
    %213 = arith.mulf %212, %211 : vector<2x128xf32>
    %214 = math.tanh %213 : vector<2x128xf32>
    %cst_71 = arith.constant 5.000000e-01 : f32
    %215 = vector.broadcast %cst_71 : f32 to vector<2x128xf32>
    %216 = arith.mulf %215, %214 : vector<2x128xf32>
    %cst_72 = arith.constant 5.000000e-01 : f32
    %217 = vector.broadcast %cst_72 : f32 to vector<2x128xf32>
    %218 = arith.addf %216, %217 : vector<2x128xf32>
    %219 = arith.mulf %208, %186 : vector<2x128xf32>
    %220 = arith.mulf %200, %210 : vector<2x128xf32>
    %221 = arith.addf %219, %220 : vector<2x128xf32>
    %222 = math.tanh %221 : vector<2x128xf32>
    %223 = arith.mulf %218, %222 : vector<2x128xf32>
    %224 = vector.extract_strided_slice %10 {offsets = [0, 6, 0], sizes = [2, 1, 512], strides = [1, 1, 1]} : vector<2x8x512xf32> to vector<2x1x512xf32>
    %225 = vector.shape_cast %224 : vector<2x1x512xf32> to vector<2x512xf32>
    %cst_73 = arith.constant dense<0.000000e+00> : vector<2x512xf32>
    %226 = tpu.matmul %223, %13, %cst_73 {dimension_numbers = #tpu.dot_dimension_numbers<[1], [0], [0], [1], [0, 0, 1, 1], [], []>} : vector<2x128xf32>, vector<128x512xf32>, vector<2x512xf32> -> vector<2x512xf32>
    %227 = arith.addf %225, %226 : vector<2x512xf32>
    %228 = vector.extract_strided_slice %227 {offsets = [0, 0], sizes = [2, 128], strides = [1, 1]} : vector<2x512xf32> to vector<2x128xf32>
    %cst_74 = arith.constant 5.000000e-01 : f32
    %229 = vector.broadcast %cst_74 : f32 to vector<2x128xf32>
    %230 = arith.mulf %229, %228 : vector<2x128xf32>
    %231 = math.tanh %230 : vector<2x128xf32>
    %cst_75 = arith.constant 5.000000e-01 : f32
    %232 = vector.broadcast %cst_75 : f32 to vector<2x128xf32>
    %233 = arith.mulf %232, %231 : vector<2x128xf32>
    %cst_76 = arith.constant 5.000000e-01 : f32
    %234 = vector.broadcast %cst_76 : f32 to vector<2x128xf32>
    %235 = arith.addf %233, %234 : vector<2x128xf32>
    %236 = vector.extract_strided_slice %227 {offsets = [0, 128], sizes = [2, 128], strides = [1, 1]} : vector<2x512xf32> to vector<2x128xf32>
    %cst_77 = arith.constant 5.000000e-01 : f32
    %237 = vector.broadcast %cst_77 : f32 to vector<2x128xf32>
    %238 = arith.mulf %237, %236 : vector<2x128xf32>
    %239 = math.tanh %238 : vector<2x128xf32>
    %cst_78 = arith.constant 5.000000e-01 : f32
    %240 = vector.broadcast %cst_78 : f32 to vector<2x128xf32>
    %241 = arith.mulf %240, %239 : vector<2x128xf32>
    %cst_79 = arith.constant 5.000000e-01 : f32
    %242 = vector.broadcast %cst_79 : f32 to vector<2x128xf32>
    %243 = arith.addf %241, %242 : vector<2x128xf32>
    %244 = vector.extract_strided_slice %227 {offsets = [0, 256], sizes = [2, 128], strides = [1, 1]} : vector<2x512xf32> to vector<2x128xf32>
    %245 = math.tanh %244 : vector<2x128xf32>
    %246 = vector.extract_strided_slice %227 {offsets = [0, 384], sizes = [2, 128], strides = [1, 1]} : vector<2x512xf32> to vector<2x128xf32>
    %cst_80 = arith.constant 5.000000e-01 : f32
    %247 = vector.broadcast %cst_80 : f32 to vector<2x128xf32>
    %248 = arith.mulf %247, %246 : vector<2x128xf32>
    %249 = math.tanh %248 : vector<2x128xf32>
    %cst_81 = arith.constant 5.000000e-01 : f32
    %250 = vector.broadcast %cst_81 : f32 to vector<2x128xf32>
    %251 = arith.mulf %250, %249 : vector<2x128xf32>
    %cst_82 = arith.constant 5.000000e-01 : f32
    %252 = vector.broadcast %cst_82 : f32 to vector<2x128xf32>
    %253 = arith.addf %251, %252 : vector<2x128xf32>
    %254 = arith.mulf %243, %221 : vector<2x128xf32>
    %255 = arith.mulf %235, %245 : vector<2x128xf32>
    %256 = arith.addf %254, %255 : vector<2x128xf32>
    %257 = math.tanh %256 : vector<2x128xf32>
    %258 = arith.mulf %253, %257 : vector<2x128xf32>
    %259 = vector.extract_strided_slice %10 {offsets = [0, 7, 0], sizes = [2, 1, 512], strides = [1, 1, 1]} : vector<2x8x512xf32> to vector<2x1x512xf32>
    %260 = vector.shape_cast %259 : vector<2x1x512xf32> to vector<2x512xf32>
    %cst_83 = arith.constant dense<0.000000e+00> : vector<2x512xf32>
    %261 = tpu.matmul %258, %13, %cst_83 {dimension_numbers = #tpu.dot_dimension_numbers<[1], [0], [0], [1], [0, 0, 1, 1], [], []>} : vector<2x128xf32>, vector<128x512xf32>, vector<2x512xf32> -> vector<2x512xf32>
    %262 = arith.addf %260, %261 : vector<2x512xf32>
    %263 = vector.extract_strided_slice %262 {offsets = [0, 0], sizes = [2, 128], strides = [1, 1]} : vector<2x512xf32> to vector<2x128xf32>
    %cst_84 = arith.constant 5.000000e-01 : f32
    %264 = vector.broadcast %cst_84 : f32 to vector<2x128xf32>
    %265 = arith.mulf %264, %263 : vector<2x128xf32>
    %266 = math.tanh %265 : vector<2x128xf32>
    %cst_85 = arith.constant 5.000000e-01 : f32
    %267 = vector.broadcast %cst_85 : f32 to vector<2x128xf32>
    %268 = arith.mulf %267, %266 : vector<2x128xf32>
    %cst_86 = arith.constant 5.000000e-01 : f32
    %269 = vector.broadcast %cst_86 : f32 to vector<2x128xf32>
    %270 = arith.addf %268, %269 : vector<2x128xf32>
    %271 = vector.extract_strided_slice %262 {offsets = [0, 128], sizes = [2, 128], strides = [1, 1]} : vector<2x512xf32> to vector<2x128xf32>
    %cst_87 = arith.constant 5.000000e-01 : f32
    %272 = vector.broadcast %cst_87 : f32 to vector<2x128xf32>
    %273 = arith.mulf %272, %271 : vector<2x128xf32>
    %274 = math.tanh %273 : vector<2x128xf32>
    %cst_88 = arith.constant 5.000000e-01 : f32
    %275 = vector.broadcast %cst_88 : f32 to vector<2x128xf32>
    %276 = arith.mulf %275, %274 : vector<2x128xf32>
    %cst_89 = arith.constant 5.000000e-01 : f32
    %277 = vector.broadcast %cst_89 : f32 to vector<2x128xf32>
    %278 = arith.addf %276, %277 : vector<2x128xf32>
    %279 = vector.extract_strided_slice %262 {offsets = [0, 256], sizes = [2, 128], strides = [1, 1]} : vector<2x512xf32> to vector<2x128xf32>
    %280 = math.tanh %279 : vector<2x128xf32>
    %281 = vector.extract_strided_slice %262 {offsets = [0, 384], sizes = [2, 128], strides = [1, 1]} : vector<2x512xf32> to vector<2x128xf32>
    %cst_90 = arith.constant 5.000000e-01 : f32
    %282 = vector.broadcast %cst_90 : f32 to vector<2x128xf32>
    %283 = arith.mulf %282, %281 : vector<2x128xf32>
    %284 = math.tanh %283 : vector<2x128xf32>
    %cst_91 = arith.constant 5.000000e-01 : f32
    %285 = vector.broadcast %cst_91 : f32 to vector<2x128xf32>
    %286 = arith.mulf %285, %284 : vector<2x128xf32>
    %cst_92 = arith.constant 5.000000e-01 : f32
    %287 = vector.broadcast %cst_92 : f32 to vector<2x128xf32>
    %288 = arith.addf %286, %287 : vector<2x128xf32>
    %289 = arith.mulf %278, %256 : vector<2x128xf32>
    %290 = arith.mulf %270, %280 : vector<2x128xf32>
    %291 = arith.addf %289, %290 : vector<2x128xf32>
    %292 = math.tanh %291 : vector<2x128xf32>
    %293 = arith.mulf %288, %292 : vector<2x128xf32>
    %294 = vector.shape_cast %48 : vector<2x128xf32> to vector<2x1x128xf32>
    %295 = vector.shape_cast %83 : vector<2x128xf32> to vector<2x1x128xf32>
    %296 = vector.shape_cast %118 : vector<2x128xf32> to vector<2x1x128xf32>
    %297 = vector.shape_cast %153 : vector<2x128xf32> to vector<2x1x128xf32>
    %298 = vector.shape_cast %188 : vector<2x128xf32> to vector<2x1x128xf32>
    %299 = vector.shape_cast %223 : vector<2x128xf32> to vector<2x1x128xf32>
    %300 = vector.shape_cast %258 : vector<2x128xf32> to vector<2x1x128xf32>
    %301 = vector.shape_cast %293 : vector<2x128xf32> to vector<2x1x128xf32>
    %302 = tpu.concatenate %294, %295, %296, %297, %298, %299, %300, %301 in 1 : vector<2x1x128xf32>, vector<2x1x128xf32>, vector<2x1x128xf32>, vector<2x1x128xf32>, vector<2x1x128xf32>, vector<2x1x128xf32>, vector<2x1x128xf32>, vector<2x1x128xf32> -> vector<2x8x128xf32>
    %c0_93 = arith.constant 0 : index
    %c0_94 = arith.constant 0 : index
    %c0_95 = arith.constant 0 : index
    %303 = vector.load %arg8[%c0_93, %c0_94, %c0_95] : memref<2x8x128xf32, #tpu.memory_space<vmem>>, vector<2x8x128xf32>
    tpu.vector_store %arg8[%c0_93, %c0_94, %c0_95], %302 {strides = array<i32>} : memref<2x8x128xf32, #tpu.memory_space<vmem>>, vector<2x8x128xf32>,
    %c0_96 = arith.constant 0 : index
    %c0_97 = arith.constant 0 : index
    %304 = vector.load %arg12[%c0_96, %c0_97] : memref<2x128xf32, #tpu.memory_space<vmem>>, vector<2x128xf32>
    tpu.vector_store %arg12[%c0_96, %c0_97], %293 {strides = array<i32>} : memref<2x128xf32, #tpu.memory_space<vmem>>, vector<2x128xf32>,
    %c0_98 = arith.constant 0 : index
    %c0_99 = arith.constant 0 : index
    %305 = vector.load %arg13[%c0_98, %c0_99] : memref<2x128xf32, #tpu.memory_space<vmem>>, vector<2x128xf32>
    tpu.vector_store %arg13[%c0_98, %c0_99], %291 {strides = array<i32>} : memref<2x128xf32, #tpu.memory_space<vmem>>, vector<2x128xf32>,
    return
  }
  func.func @transform_0(%arg0: i32, %arg1: i32) -> (i32, i32, i32) {
    %c0_i32 = arith.constant 0 : i32
    %c0_i32_0 = arith.constant 0 : i32
    return %arg0, %arg1, %c0_i32 : i32, i32, i32
  }
  func.func @transform_3(%arg0: i32, %arg1: i32) -> (i32, i32) {
    %c0_i32 = arith.constant 0 : i32
    %c0_i32_0 = arith.constant 0 : i32
    %c0_i32_1 = arith.constant 0 : i32
    return %c0_i32, %c0_i32_0 : i32, i32
  }
  func.func @transform_4(%arg0: i32, %arg1: i32) -> (i32, i32) {
    %c0_i32 = arith.constant 0 : i32
    %c0_i32_0 = arith.constant 0 : i32
    %c0_i32_1 = arith.constant 0 : i32
    return %c0_i32, %c0_i32_0 : i32, i32
  }
  func.func @transform_5(%arg0: i32, %arg1: i32) -> (i32, i32) {
    %c0_i32 = arith.constant 0 : i32
    %c0_i32_0 = arith.constant 0 : i32
    %c0_i32_1 = arith.constant 0 : i32
    return %c0_i32, %c0_i32_0 : i32, i32
  }
  func.func @transform_6(%arg0: i32, %arg1: i32) -> (i32, i32, i32) {
    %c0_i32 = arith.constant 0 : i32
    %c0_i32_0 = arith.constant 0 : i32
    return %arg0, %arg1, %c0_i32 : i32, i32, i32
  }
}

</mosaic_0001>

<bundles_post_ra>
// kernel: rnn_forward.1
= control target key start
LH: loop header
LB: loop body
LE: loop exit
PB: predicated region body
PF: predicated region fallthrough
CT: control target
= control target key end

     0   :  { %11 = vsyncpa [#allocation8], 0  ;;  %s3528_s0 = inlined_call_operand.vmem [shape: f32[2,8,128], index: 0, kind: input, shape index: {}]   ;;  %s3529_s1 = inlined_call_operand.vmem [shape: f32[128,512], index: 1, kind: input, shape index: {}]   ;;  %s3530_s2 = inlined_call_operand.vmem [shape: f32[128,512], index: 2, kind: input, shape index: {}]   ;;  %s3531_s3 = inlined_call_operand.vmem [shape: f32[1,512], index: 3, kind: input, shape index: {}]   ;;  %s3532_s4 = inlined_call_operand.vmem [shape: f32[1,128], index: 4, kind: input, shape index: {}]   ;;  %s3533_s5 = inlined_call_operand.vmem [shape: f32[1,128], index: 5, kind: input, shape index: {}]   ;;  %s3534_s6 = inlined_call_operand.hbm [shape: f32[2,8,128], index: 6, kind: output, shape index: {}]  }
   0x1   :  { %v2108_v0 = vld [vmem:[%s3529_s1] sm:$0xff]  ;;  %v2113_v1 = vld [vmem:[%s3529_s1 + $0x8] sm:$0xff]  ;;  %v2118_v2 = vld [vmem:[%s3529_s1 + $0x10] sm:$0xff] }
   0x2   :  { %3642 = vst [vmem:[#allocation14_spill] sm:$0xff] %v2108_v0  ;;  %v2123_v3 = vld [vmem:[%s3529_s1 + $0x18] sm:$0xff]  ;;  %v2128_v4 = vld [vmem:[%s3529_s1 + $0x20] sm:$0xff]  ;;  %v2133_v5 = vld [vmem:[%s3529_s1 + $0x28] sm:$0xff] }
   0x3   :  { %3643 = vst [vmem:[#allocation15_spill] sm:$0xff] %v2113_v1  ;;  %v2138_v6 = vld [vmem:[%s3529_s1 + $0x30] sm:$0xff]  ;;  %v2143_v7 = vld [vmem:[%s3529_s1 + $0x38] sm:$0xff]  ;;  %v2148_v8 = vld [vmem:[%s3529_s1 + $0x40] sm:$0xff] }
   0x4   :  { %3644 = vst [vmem:[#allocation16_spill] sm:$0xff] %v2118_v2  ;;  %v2153_v9 = vld [vmem:[%s3529_s1 + $0x48] sm:$0xff]  ;;  %v2158_v10 = vld [vmem:[%s3529_s1 + $0x50] sm:$0xff]  ;;  %v2163_v11 = vld [vmem:[%s3529_s1 + $0x58] sm:$0xff] }
   0x5   :  { %3645 = vst [vmem:[#allocation17_spill] sm:$0xff] %v2123_v3  ;;  %v2168_v12 = vld [vmem:[%s3529_s1 + $0x60] sm:$0xff]  ;;  %v2173_v13 = vld [vmem:[%s3529_s1 + $0x68] sm:$0xff]  ;;  %v2178_v14 = vld [vmem:[%s3529_s1 + $0x70] sm:$0xff] }
   0x6   :  { %3646 = vst [vmem:[#allocation18_spill] sm:$0xff] %v2143_v7  ;;  %v2183_v15 = vld [vmem:[%s3529_s1 + $0x78] sm:$0xff]  ;;  %v2188_v16 = vld [vmem:[%s3529_s1 + $0x80] sm:$0xff]  ;;  %v2193_v17 = vld [vmem:[%s3529_s1 + $0x88] sm:$0xff] }
   0x7   :  { %v2198_v18 = vld [vmem:[%s3529_s1 + $0x90] sm:$0xff]  ;;  %v2203_v19 = vld [vmem:[%s3529_s1 + $0x98] sm:$0xff]  ;;  %v2208_v20 = vld [vmem:[%s3529_s1 + $0xa0] sm:$0xff] }
   0x8   :  { %v2213_v21 = vld [vmem:[%s3529_s1 + $0xa8] sm:$0xff]  ;;  %v2218_v22 = vld [vmem:[%s3529_s1 + $0xb0] sm:$0xff]  ;;  %v2223_v23 = vld [vmem:[%s3529_s1 + $0xb8] sm:$0xff] }
   0x9   :  { %v2228_v24 = vld [vmem:[%s3529_s1 + $0xc0] sm:$0xff]  ;;  %v2233_v25 = vld [vmem:[%s3529_s1 + $0xc8] sm:$0xff]  ;;  %v2238_v26 = vld [vmem:[%s3529_s1 + $0xd0] sm:$0xff] }
   0xa   :  { %v2243_v27 = vld [vmem:[%s3529_s1 + $0xd8] sm:$0xff]  ;;  %v2248_v28 = vld [vmem:[%s3529_s1 + $0xe0] sm:$0xff]  ;;  %v2253_v29 = vld [vmem:[%s3529_s1 + $0xe8] sm:$0xff] }
   0xb   :  { %v2258_v30 = vld [vmem:[%s3529_s1 + $0xf0] sm:$0xff]  ;;  %v2263_v31 = vld [vmem:[%s3529_s1 + $0xf8] sm:$0xff]  ;;  %v2268_v32 = vld [vmem:[%s3529_s1 + $0x100] sm:$0xff] }
   0xc   :  { %v2273_v33 = vld [vmem:[%s3529_s1 + $0x108] sm:$0xff]  ;;  %v2278_v34 = vld [vmem:[%s3529_s1 + $0x110] sm:$0xff]  ;;  %v2283_v35 = vld [vmem:[%s3529_s1 + $0x118] sm:$0xff] }
   0xd   :  { %v2288_v36 = vld [vmem:[%s3529_s1 + $0x120] sm:$0xff]  ;;  %v2293_v37 = vld [vmem:[%s3529_s1 + $0x128] sm:$0xff]  ;;  %v2298_v38 = vld [vmem:[%s3529_s1 + $0x130] sm:$0xff] }
   0xe   :  { %v2303_v39 = vld [vmem:[%s3529_s1 + $0x138] sm:$0xff]  ;;  %v2308_v40 = vld [vmem:[%s3529_s1 + $0x140] sm:$0xff]  ;;  %v2313_v41 = vld [vmem:[%s3529_s1 + $0x148] sm:$0xff] }
   0xf   :  { %v2318_v42 = vld [vmem:[%s3529_s1 + $0x150] sm:$0xff]  ;;  %v2323_v43 = vld [vmem:[%s3529_s1 + $0x158] sm:$0xff]  ;;  %v2328_v44 = vld [vmem:[%s3529_s1 + $0x160] sm:$0xff] }
  0x10   :  { %v2333_v45 = vld [vmem:[%s3529_s1 + $0x168] sm:$0xff]  ;;  %v2338_v46 = vld [vmem:[%s3529_s1 + $0x170] sm:$0xff]  ;;  %v2343_v47 = vld [vmem:[%s3529_s1 + $0x178] sm:$0xff] }
  0x11   :  { %v2348_v48 = vld [vmem:[%s3529_s1 + $0x180] sm:$0xff]  ;;  %v2353_v49 = vld [vmem:[%s3529_s1 + $0x188] sm:$0xff]  ;;  %v2358_v50 = vld [vmem:[%s3529_s1 + $0x190] sm:$0xff] }
  0x12   :  { %v2363_v51 = vld [vmem:[%s3529_s1 + $0x198] sm:$0xff]  ;;  %v2368_v52 = vld [vmem:[%s3529_s1 + $0x1a0] sm:$0xff]  ;;  %v2373_v53 = vld [vmem:[%s3529_s1 + $0x1a8] sm:$0xff] }
  0x13   :  { %v2378_v54 = vld [vmem:[%s3529_s1 + $0x1b0] sm:$0xff]  ;;  %v2383_v55 = vld [vmem:[%s3529_s1 + $0x1b8] sm:$0xff]  ;;  %v2388_v56 = vld [vmem:[%s3529_s1 + $0x1c0] sm:$0xff] }
  0x14   :  { %v2393_v57 = vld [vmem:[%s3529_s1 + $0x1c8] sm:$0xff]  ;;  %v2398_v58 = vld [vmem:[%s3529_s1 + $0x1d0] sm:$0xff]  ;;  %v2403_v59 = vld [vmem:[%s3529_s1 + $0x1d8] sm:$0xff] }
  0x15   :  { %v2408_v60 = vld [vmem:[%s3529_s1 + $0x1e0] sm:$0xff]  ;;  %v2413_v61 = vld [vmem:[%s3529_s1 + $0x1e8] sm:$0xff]  ;;  %v2418_v62 = vld [vmem:[%s3529_s1 + $0x1f0] sm:$0xff] }
  0x16   :  { %v2423_v63 = vld [vmem:[%s3529_s1 + $0x1f8] sm:$0xff] }
  0x17   :  { %167 = vsyncadd [#allocation4], 8192  ;;  %v2428_v3 = vld [vmem:[%s3530_s2] sm:$0xff]  ;;  %v2433_v2 = vld [vmem:[%s3530_s2 + $0x8] sm:$0xff] }
  0x18   :  { %3647 = vst [vmem:[#allocation19_spill] sm:$0xff] %v2428_v3  ;;  %v2438_v1 = vld [vmem:[%s3530_s2 + $0x10] sm:$0xff]  ;;  %v2443_v0 = vld [vmem:[%s3530_s2 + $0x18] sm:$0xff]  ;;  %v2448_v7 = vld [vmem:[%s3530_s2 + $0x20] sm:$0xff] }
  0x19   :  { %3648 = vst [vmem:[#allocation20_spill] sm:$0xff] %v2433_v2  ;;  %v2453_v3 = vld [vmem:[%s3530_s2 + $0x28] sm:$0xff]  ;;  %v2458_v2 = vld [vmem:[%s3530_s2 + $0x30] sm:$0xff] }
  0x1a   :  { %3649 = vst [vmem:[#allocation21_spill] sm:$0xff] %v2438_v1  ;;  %v2463_v1 = vld [vmem:[%s3530_s2 + $0x38] sm:$0xff] }
  0x1b   :  { %3650 = vst [vmem:[#allocation22_spill] sm:$0xff] %v2443_v0  ;;  %v2468_v0 = vld [vmem:[%s3530_s2 + $0x40] sm:$0xff] }
  0x1c   :  { %3651 = vst [vmem:[#allocation23_spill] sm:$0xff] %v2448_v7  ;;  %v2473_v7 = vld [vmem:[%s3530_s2 + $0x48] sm:$0xff] }
  0x1d   :  { %3652 = vst [vmem:[#allocation24_spill] sm:$0xff] %v2453_v3  ;;  %v2478_v3 = vld [vmem:[%s3530_s2 + $0x50] sm:$0xff] }
  0x1e   :  { %3653 = vst [vmem:[#allocation25_spill] sm:$0xff] %v2458_v2  ;;  %v2483_v2 = vld [vmem:[%s3530_s2 + $0x58] sm:$0xff] }
  0x1f   :  { %3654 = vst [vmem:[#allocation26_spill] sm:$0xff] %v2463_v1  ;;  %v2488_v1 = vld [vmem:[%s3530_s2 + $0x60] sm:$0xff] }
  0x20   :  { %3655 = vst [vmem:[#allocation27_spill] sm:$0xff] %v2468_v0  ;;  %v2493_v0 = vld [vmem:[%s3530_s2 + $0x68] sm:$0xff] }
  0x21   :  { %3656 = vst [vmem:[#allocation28_spill] sm:$0xff] %v2473_v7  ;;  %v2498_v7 = vld [vmem:[%s3530_s2 + $0x70] sm:$0xff] }
  0x22   :  { %3657 = vst [vmem:[#allocation29_spill] sm:$0xff] %v2478_v3  ;;  %v2503_v3 = vld [vmem:[%s3530_s2 + $0x78] sm:$0xff] }
  0x23   :  { %3658 = vst [vmem:[#allocation30_spill] sm:$0xff] %v2483_v2  ;;  %v2508_v2 = vld [vmem:[%s3530_s2 + $0x80] sm:$0xff] }
  0x24   :  { %3659 = vst [vmem:[#allocation31_spill] sm:$0xff] %v2488_v1  ;;  %v2513_v1 = vld [vmem:[%s3530_s2 + $0x88] sm:$0xff] }
  0x25   :  { %3660 = vst [vmem:[#allocation32_spill] sm:$0xff] %v2493_v0  ;;  %v2518_v0 = vld [vmem:[%s3530_s2 + $0x90] sm:$0xff] }
  0x26   :  { %3661 = vst [vmem:[#allocation33_spill] sm:$0xff] %v2498_v7  ;;  %v2523_v7 = vld [vmem:[%s3530_s2 + $0x98] sm:$0xff] }
  0x27   :  { %3662 = vst [vmem:[#allocation34_spill] sm:$0xff] %v2503_v3  ;;  %v2528_v3 = vld [vmem:[%s3530_s2 + $0xa0] sm:$0xff] }
  0x28   :  { %3663 = vst [vmem:[#allocation35_spill] sm:$0xff] %v2508_v2  ;;  %v2533_v2 = vld [vmem:[%s3530_s2 + $0xa8] sm:$0xff] }
  0x29   :  { %3664 = vst [vmem:[#allocation36_spill] sm:$0xff] %v2513_v1  ;;  %v2538_v1 = vld [vmem:[%s3530_s2 + $0xb0] sm:$0xff] }
  0x2a   :  { %3665 = vst [vmem:[#allocation37_spill] sm:$0xff] %v2518_v0  ;;  %v2543_v0 = vld [vmem:[%s3530_s2 + $0xb8] sm:$0xff] }
  0x2b   :  { %3666 = vst [vmem:[#allocation38_spill] sm:$0xff] %v2523_v7  ;;  %v2548_v7 = vld [vmem:[%s3530_s2 + $0xc0] sm:$0xff] }
  0x2c   :  { %3667 = vst [vmem:[#allocation39_spill] sm:$0xff] %v2528_v3  ;;  %v2553_v3 = vld [vmem:[%s3530_s2 + $0xc8] sm:$0xff] }
  0x2d   :  { %3668 = vst [vmem:[#allocation40_spill] sm:$0xff] %v2533_v2  ;;  %v2558_v2 = vld [vmem:[%s3530_s2 + $0xd0] sm:$0xff] }
  0x2e   :  { %3669 = vst [vmem:[#allocation41_spill] sm:$0xff] %v2538_v1  ;;  %v2563_v1 = vld [vmem:[%s3530_s2 + $0xd8] sm:$0xff] }
  0x2f   :  { %3670 = vst [vmem:[#allocation42_spill] sm:$0xff] %v2543_v0  ;;  %v2568_v0 = vld [vmem:[%s3530_s2 + $0xe0] sm:$0xff] }
  0x30   :  { %3671 = vst [vmem:[#allocation43_spill] sm:$0xff] %v2548_v7  ;;  %v2573_v7 = vld [vmem:[%s3530_s2 + $0xe8] sm:$0xff] }
  0x31   :  { %3672 = vst [vmem:[#allocation44_spill] sm:$0xff] %v2553_v3  ;;  %v2578_v3 = vld [vmem:[%s3530_s2 + $0xf0] sm:$0xff] }
  0x32   :  { %3673 = vst [vmem:[#allocation45_spill] sm:$0xff] %v2558_v2  ;;  %v2583_v2 = vld [vmem:[%s3530_s2 + $0xf8] sm:$0xff] }
  0x33   :  { %3674 = vst [vmem:[#allocation46_spill] sm:$0xff] %v2563_v1  ;;  %v2588_v1 = vld [vmem:[%s3530_s2 + $0x100] sm:$0xff] }
  0x34   :  { %3675 = vst [vmem:[#allocation47_spill] sm:$0xff] %v2568_v0  ;;  %v2593_v0 = vld [vmem:[%s3530_s2 + $0x108] sm:$0xff] }
  0x35   :  { %3676 = vst [vmem:[#allocation48_spill] sm:$0xff] %v2573_v7  ;;  %v2598_v7 = vld [vmem:[%s3530_s2 + $0x110] sm:$0xff] }
  0x36   :  { %3677 = vst [vmem:[#allocation49_spill] sm:$0xff] %v2578_v3  ;;  %v2603_v3 = vld [vmem:[%s3530_s2 + $0x118] sm:$0xff] }
  0x37   :  { %3678 = vst [vmem:[#allocation50_spill] sm:$0xff] %v2583_v2  ;;  %v2608_v2 = vld [vmem:[%s3530_s2 + $0x120] sm:$0xff] }
  0x38   :  { %3679 = vst [vmem:[#allocation51_spill] sm:$0xff] %v2588_v1  ;;  %v2613_v1 = vld [vmem:[%s3530_s2 + $0x128] sm:$0xff] }
  0x39   :  { %3680 = vst [vmem:[#allocation52_spill] sm:$0xff] %v2593_v0  ;;  %v2618_v0 = vld [vmem:[%s3530_s2 + $0x130] sm:$0xff] }
  0x3a   :  { %3681 = vst [vmem:[#allocation53_spill] sm:$0xff] %v2598_v7  ;;  %v2623_v7 = vld [vmem:[%s3530_s2 + $0x138] sm:$0xff] }
  0x3b   :  { %3682 = vst [vmem:[#allocation54_spill] sm:$0xff] %v2603_v3  ;;  %v2628_v3 = vld [vmem:[%s3530_s2 + $0x140] sm:$0xff] }
  0x3c   :  { %3683 = vst [vmem:[#allocation55_spill] sm:$0xff] %v2608_v2  ;;  %v2633_v2 = vld [vmem:[%s3530_s2 + $0x148] sm:$0xff] }
  0x3d   :  { %3684 = vst [vmem:[#allocation56_spill] sm:$0xff] %v2613_v1  ;;  %v2638_v1 = vld [vmem:[%s3530_s2 + $0x150] sm:$0xff] }
  0x3e   :  { %3685 = vst [vmem:[#allocation57_spill] sm:$0xff] %v2618_v0  ;;  %v2643_v0 = vld [vmem:[%s3530_s2 + $0x158] sm:$0xff] }
  0x3f   :  { %3686 = vst [vmem:[#allocation58_spill] sm:$0xff] %v2623_v7  ;;  %v2648_v7 = vld [vmem:[%s3530_s2 + $0x160] sm:$0xff] }
  0x40   :  { %3687 = vst [vmem:[#allocation59_spill] sm:$0xff] %v2628_v3  ;;  %v2653_v3 = vld [vmem:[%s3530_s2 + $0x168] sm:$0xff] }
  0x41   :  { %3688 = vst [vmem:[#allocation60_spill] sm:$0xff] %v2633_v2  ;;  %v2658_v2 = vld [vmem:[%s3530_s2 + $0x170] sm:$0xff] }
  0x42   :  { %3689 = vst [vmem:[#allocation61_spill] sm:$0xff] %v2638_v1  ;;  %v2663_v1 = vld [vmem:[%s3530_s2 + $0x178] sm:$0xff] }
  0x43   :  { %3690 = vst [vmem:[#allocation62_spill] sm:$0xff] %v2643_v0  ;;  %v2668_v0 = vld [vmem:[%s3530_s2 + $0x180] sm:$0xff] }
  0x44   :  { %3691 = vst [vmem:[#allocation63_spill] sm:$0xff] %v2648_v7  ;;  %v2673_v7 = vld [vmem:[%s3530_s2 + $0x188] sm:$0xff] }
  0x45   :  { %3692 = vst [vmem:[#allocation64_spill] sm:$0xff] %v2653_v3  ;;  %v2678_v3 = vld [vmem:[%s3530_s2 + $0x190] sm:$0xff] }
  0x46   :  { %3693 = vst [vmem:[#allocation65_spill] sm:$0xff] %v2658_v2  ;;  %v2683_v2 = vld [vmem:[%s3530_s2 + $0x198] sm:$0xff] }
  0x47   :  { %3694 = vst [vmem:[#allocation66_spill] sm:$0xff] %v2663_v1  ;;  %v2688_v1 = vld [vmem:[%s3530_s2 + $0x1a0] sm:$0xff] }
  0x48   :  { %3695 = vst [vmem:[#allocation67_spill] sm:$0xff] %v2668_v0  ;;  %v2693_v0 = vld [vmem:[%s3530_s2 + $0x1a8] sm:$0xff] }
  0x49   :  { %3696 = vst [vmem:[#allocation68_spill] sm:$0xff] %v2673_v7  ;;  %v2698_v7 = vld [vmem:[%s3530_s2 + $0x1b0] sm:$0xff] }
  0x4a   :  { %3697 = vst [vmem:[#allocation69_spill] sm:$0xff] %v2678_v3  ;;  %v2703_v3 = vld [vmem:[%s3530_s2 + $0x1b8] sm:$0xff] }
  0x4b   :  { %3698 = vst [vmem:[#allocation70_spill] sm:$0xff] %v2683_v2  ;;  %v2708_v2 = vld [vmem:[%s3530_s2 + $0x1c0] sm:$0xff] }
  0x4c   :  { %3699 = vst [vmem:[#allocation71_spill] sm:$0xff] %v2688_v1  ;;  %v2713_v1 = vld [vmem:[%s3530_s2 + $0x1c8] sm:$0xff] }
  0x4d   :  { %3700 = vst [vmem:[#allocation72_spill] sm:$0xff] %v2693_v0  ;;  %v2718_v0 = vld [vmem:[%s3530_s2 + $0x1d0] sm:$0xff] }
  0x4e   :  { %3701 = vst [vmem:[#allocation73_spill] sm:$0xff] %v2698_v7  ;;  %v2723_v7 = vld [vmem:[%s3530_s2 + $0x1d8] sm:$0xff] }
  0x4f   :  { %3702 = vst [vmem:[#allocation74_spill] sm:$0xff] %v2703_v3  ;;  %v2728_v3 = vld [vmem:[%s3530_s2 + $0x1e0] sm:$0xff] }
  0x50   :  { %3703 = vst [vmem:[#allocation75_spill] sm:$0xff] %v2708_v2  ;;  %v2733_v2 = vld [vmem:[%s3530_s2 + $0x1e8] sm:$0xff] }
  0x51   :  { %3704 = vst [vmem:[#allocation76_spill] sm:$0xff] %v2713_v1  ;;  %v2738_v1 = vld [vmem:[%s3530_s2 + $0x1f0] sm:$0xff] }
  0x52   :  { %3705 = vst [vmem:[#allocation77_spill] sm:$0xff] %v2718_v0  ;;  %v2743_v0 = vld [vmem:[%s3530_s2 + $0x1f8] sm:$0xff] }
  0x53   :  { %312 = vsyncadd [#allocation4 + $0x1], 8192 }
  0x54   :  { %2061 = dma.done.wait [#allocation4], 8192 }
  0x55   :  { %2062 = vsyncadd [#allocation4], 4294959104  ;;  %405 = vmatpush.msra.mxu0 %v2408_v60  ;;  %428 = vmatpush.msra.mxu1 %v2413_v61 }
  0x56   :  { %2063 = dma.done.wait [#allocation4 + $0x1], 8192 }
  0x57   :  { %2064 = vsyncadd [#allocation4 + $0x1], 4294959104  ;;  %451 = vmatpush.msra.mxu2 %v2418_v62  ;;  %474 = vmatpush.msra.mxu3 %v2423_v63  ;;  %v3758_v60 = vld [vmem:[#allocation27_spill] sm:$0xff]  ;;  %v3759_v61 = vld [vmem:[#allocation28_spill] sm:$0xff]  ;;  %vm710_vm0 = vcmask 1041409   ;;  %vm1794_vm1 = vcmask 1040384  }
  0x58   :  { %406 = vmatpush.msra.mxu0 %v2388_v56  ;;  %429 = vmatpush.msra.mxu1 %v2393_v57  ;;  %v3754_v56 = vld [vmem:[#allocation31_spill] sm:$0xff]  ;;  %v3755_v57 = vld [vmem:[#allocation32_spill] sm:$0xff]  ;;  %v3760_v62 = vld [vmem:[#allocation29_spill] sm:$0xff]  ;;  %vm1797_vm2 = vcmask 1041408   ;;  %vm1800_vm3 = vcmask 1042432   ;;  %vm1803_vm4 = vcmask 1043456  }
  0x59   :  { %452 = vmatpush.msra.mxu2 %v2398_v58  ;;  %475 = vmatpush.msra.mxu3 %v2403_v59  ;;  %v3756_v58 = vld [vmem:[#allocation33_spill] sm:$0xff]  ;;  %v3757_v59 = vld [vmem:[#allocation34_spill] sm:$0xff]  ;;  %vm1806_vm5 = vcmask 1044480   ;;  %vm1809_vm6 = vcmask 1045504   ;;  %s1837_s16 = sshll.u32 %s3534_s6, 4  ;;  %vm1812_vm7 = vcmask 1046528   ;;  %s1838_s16 = int_to_ptr.hbm [resolvable:$true] %s1837_s16 }
  0x5a   :  { %407 = vmatpush.msra.mxu0 %v2368_v52  ;;  %430 = vmatpush.msra.mxu1 %v2373_v53  ;;  %v3750_v52 = vld [vmem:[#allocation35_spill] sm:$0xff]  ;;  %v3751_v53 = vld [vmem:[#allocation36_spill] sm:$0xff]  ;;  %v3761_v63 = vld [vmem:[#allocation30_spill] sm:$0xff]  ;;  %s2068_s17 = smov 128   ;;  %s2069_s18 = smov 8  }
  0x5b   :  { %453 = vmatpush.msra.mxu2 %v2378_v54  ;;  %476 = vmatpush.msra.mxu3 %v2383_v55  ;;  %v3752_v54 = vld [vmem:[#allocation37_spill] sm:$0xff]  ;;  %v3753_v55 = vld [vmem:[#allocation38_spill] sm:$0xff] }
  0x5c   :  { %408 = vmatpush.msra.mxu0 %v2348_v48  ;;  %431 = vmatpush.msra.mxu1 %v2353_v49  ;;  %v3747_v48 = vld [vmem:[#allocation40_spill] sm:$0xff]  ;;  %v3748_v49 = vld [vmem:[#allocation41_spill] sm:$0xff] }
  0x5d   :  { %454 = vmatpush.msra.mxu2 %v2358_v50  ;;  %477 = vmatpush.msra.mxu3 %v2363_v51  ;;  %v3749_v50 = vld [vmem:[#allocation42_spill] sm:$0xff]  ;;  %v330_v51 = vld [vmem:[%s3528_s0 + $0x8] sm:$0xff] }
  0x5e   :  { %409 = vmatpush.msra.mxu0 %v2328_v44  ;;  %432 = vmatpush.msra.mxu1 %v2333_v45  ;;  %v3743_v44 = vld [vmem:[#allocation44_spill] sm:$0xff]  ;;  %v3744_v45 = vld [vmem:[#allocation45_spill] sm:$0xff] }
  0x5f   :  { %455 = vmatpush.msra.mxu2 %v2338_v46  ;;  %478 = vmatpush.msra.mxu3 %v2343_v47  ;;  %v3745_v46 = vld [vmem:[#allocation46_spill] sm:$0xff]  ;;  %v3746_v47 = vld [vmem:[#allocation39_spill] sm:$0xff] }
  0x60   :  { %410 = vmatpush.msra.mxu0 %v2308_v40  ;;  %433 = vmatpush.msra.mxu1 %v2313_v41  ;;  %v3739_v40 = vld [vmem:[#allocation48_spill] sm:$0xff]  ;;  %v3740_v41 = vld [vmem:[#allocation49_spill] sm:$0xff] }
  0x61   :  { %456 = vmatpush.msra.mxu2 %v2318_v42  ;;  %479 = vmatpush.msra.mxu3 %v2323_v43  ;;  %v3741_v42 = vld [vmem:[#allocation50_spill] sm:$0xff]  ;;  %v3742_v43 = vld [vmem:[#allocation43_spill] sm:$0xff] }
  0x62   :  { %411 = vmatpush.msra.mxu0 %v2288_v36  ;;  %434 = vmatpush.msra.mxu1 %v2293_v37  ;;  %v3735_v36 = vld [vmem:[#allocation52_spill] sm:$0xff]  ;;  %v3736_v37 = vld [vmem:[#allocation53_spill] sm:$0xff] }
  0x63   :  { %457 = vmatpush.msra.mxu2 %v2298_v38  ;;  %480 = vmatpush.msra.mxu3 %v2303_v39  ;;  %v3737_v38 = vld [vmem:[#allocation54_spill] sm:$0xff]  ;;  %v3738_v39 = vld [vmem:[#allocation47_spill] sm:$0xff] }
  0x64   :  { %412 = vmatpush.msra.mxu0 %v2268_v32  ;;  %435 = vmatpush.msra.mxu1 %v2273_v33  ;;  %v3732_v32 = vld [vmem:[#allocation57_spill] sm:$0xff]  ;;  %v3733_v33 = vld [vmem:[#allocation58_spill] sm:$0xff] }
  0x65   :  { %458 = vmatpush.msra.mxu2 %v2278_v34  ;;  %481 = vmatpush.msra.mxu3 %v2283_v35  ;;  %v329_v34 = vld [vmem:[%s3528_s0] sm:$0xff] }
  0x66   :  { %413 = vmatpush.msra.mxu0 %v2248_v28  ;;  %436 = vmatpush.msra.mxu1 %v2253_v29  ;;  %v3728_v28 = vld [vmem:[#allocation61_spill] sm:$0xff]  ;;  %v3729_v29 = vld [vmem:[#allocation62_spill] sm:$0xff]  ;;  %v3734_v35 = vld [vmem:[#allocation51_spill] sm:$0xff] }
  0x67   :  { %459 = vmatpush.msra.mxu2 %v2258_v30  ;;  %482 = vmatpush.msra.mxu3 %v2263_v31  ;;  %v3730_v30 = vld [vmem:[#allocation55_spill] sm:$0xff]  ;;  %v3731_v31 = vld [vmem:[#allocation56_spill] sm:$0xff] }
  0x68   :  { %414 = vmatpush.msra.mxu0 %v2228_v24  ;;  %437 = vmatpush.msra.mxu1 %v2233_v25  ;;  %v3724_v24 = vld [vmem:[#allocation65_spill] sm:$0xff]  ;;  %v3725_v25 = vld [vmem:[#allocation66_spill] sm:$0xff] }
  0x69   :  { %460 = vmatpush.msra.mxu2 %v2238_v26  ;;  %483 = vmatpush.msra.mxu3 %v2243_v27  ;;  %v3726_v26 = vld [vmem:[#allocation59_spill] sm:$0xff]  ;;  %v3727_v27 = vld [vmem:[#allocation60_spill] sm:$0xff] }
  0x6a   :  { %415 = vmatpush.msra.mxu0 %v2208_v20  ;;  %438 = vmatpush.msra.mxu1 %v2213_v21  ;;  %v3720_v20 = vld [vmem:[#allocation69_spill] sm:$0xff]  ;;  %v3721_v21 = vld [vmem:[#allocation70_spill] sm:$0xff] }
  0x6b   :  { %461 = vmatpush.msra.mxu2 %v2218_v22  ;;  %484 = vmatpush.msra.mxu3 %v2223_v23  ;;  %v3722_v22 = vld [vmem:[#allocation63_spill] sm:$0xff]  ;;  %v3723_v23 = vld [vmem:[#allocation64_spill] sm:$0xff] }
  0x6c   :  { %416 = vmatpush.msra.mxu0 %v2188_v16  ;;  %439 = vmatpush.msra.mxu1 %v2193_v17  ;;  %v1875_v16 = vld [vmem:[%s3532_s4] ss:$0 sm:$0xff]  ;;  %v3717_v17 = vld [vmem:[#allocation74_spill] sm:$0xff] }
  0x6d   :  { %462 = vmatpush.msra.mxu2 %v2198_v18  ;;  %485 = vmatpush.msra.mxu3 %v2203_v19  ;;  %323 = vst [vmem:[#allocation5] sm:$0x3] %v1875_v16  ;;  %v3718_v18 = vld [vmem:[#allocation67_spill] sm:$0xff]  ;;  %v3719_v19 = vld [vmem:[#allocation68_spill] sm:$0xff] }
  0x6e   :  { %417 = vmatpush.msra.mxu0 %v2168_v12  ;;  %440 = vmatpush.msra.mxu1 %v2173_v13  ;;  %v3706_v12 = vld [vmem:[#allocation18_spill] sm:$0xff]  ;;  %v3709_v13 = vld [vmem:[#allocation16_spill] sm:$0xff]  ;;  %v3762_v16 = vld [vmem:[#allocation23_spill] sm:$0xff] }
  0x6f   :  { %463 = vmatpush.msra.mxu2 %v2178_v14  ;;  %486 = vmatpush.msra.mxu3 %v2183_v15  ;;  %v3710_v14 = vld [vmem:[#allocation17_spill] sm:$0xff] }
  0x70   :  { %418 = vmatpush.msra.mxu0 %v2148_v8  ;;  %441 = vmatpush.msra.mxu1 %v2153_v9  ;;  %v3707_v8 = vld [vmem:[#allocation14_spill] sm:$0xff]  ;;  %v3708_v9 = vld [vmem:[#allocation15_spill] sm:$0xff]  ;;  %v3716_v15 = vld [vmem:[#allocation73_spill] sm:$0xff] }
  0x71   :  { %464 = vmatpush.msra.mxu2 %v2158_v10  ;;  %487 = vmatpush.msra.mxu3 %v2163_v11  ;;  %v3714_v10 = vld [vmem:[#allocation71_spill] sm:$0xff]  ;;  %v3715_v11 = vld [vmem:[#allocation72_spill] sm:$0xff] }
  0x72   :  { %419 = vmatpush.msra.mxu0 %v2128_v4  ;;  %442 = vmatpush.msra.mxu1 %v2133_v5  ;;  %v3711_v4 = vld [vmem:[#allocation75_spill] sm:$0xff]  ;;  %v3712_v5 = vld [vmem:[#allocation76_spill] sm:$0xff] }
  0x73   :  { %465 = vmatpush.msra.mxu2 %v2138_v6  ;;  %488 = vmatpush.msra.mxu3 %v3706_v12  ;;  %v3713_v6 = vld [vmem:[#allocation77_spill] sm:$0xff]  ;;  %v3763_v12 = vld [vmem:[#allocation24_spill] sm:$0xff] }
  0x74   :  { %420 = vmatpush.msra.mxu0 %v3707_v8  ;;  %443 = vmatpush.msra.mxu1 %v3708_v9  ;;  %v3764_v8 = vld [vmem:[#allocation25_spill] sm:$0xff]  ;;  %v3765_v9 = vld [vmem:[#allocation26_spill] sm:$0xff] }
  0x75   :  { %466 = vmatpush.msra.mxu2 %v3709_v13  ;;  %489 = vmatpush.msra.mxu3 %v3710_v14  ;;  %v497_v13 = vld [vmem:[#allocation5] sm:$0x3] }
  0x76   :  { %563 = vmatpush.msrb.mxu0 %v2728_v3  ;;  %583 = vmatpush.msrb.mxu1 %v2733_v2  ;;  %v3766_v14 = vld [vmem:[#allocation19_spill] sm:$0xff] }
  0x77   :  { %603 = vmatpush.msrb.mxu2 %v2738_v1  ;;  %623 = vmatpush.msrb.mxu3 %v2743_v0 }
  0x78   :  { %564 = vmatpush.msrb.mxu0 %v3711_v4  ;;  %584 = vmatpush.msrb.mxu1 %v3712_v5 }
  0x79   :  { %604 = vmatpush.msrb.mxu2 %v3713_v6  ;;  %624 = vmatpush.msrb.mxu3 %v2723_v7 }
  0x7a   :  { %565 = vmatpush.msrb.mxu0 %v3714_v10  ;;  %585 = vmatpush.msrb.mxu1 %v3715_v11 }
  0x7b   :  { %605 = vmatpush.msrb.mxu2 %v3716_v15  ;;  %625 = vmatpush.msrb.mxu3 %v3717_v17 }
  0x7c   :  { %566 = vmatpush.msrb.mxu0 %v3718_v18  ;;  %586 = vmatpush.msrb.mxu1 %v3719_v19 }
  0x7d   :  { %606 = vmatpush.msrb.mxu2 %v3720_v20  ;;  %626 = vmatpush.msrb.mxu3 %v3721_v21 }
  0x7e   :  { %567 = vmatpush.msrb.mxu0 %v3722_v22  ;;  %587 = vmatpush.msrb.mxu1 %v3723_v23 }
  0x7f   :  { %607 = vmatpush.msrb.mxu2 %v3724_v24  ;;  %627 = vmatpush.msrb.mxu3 %v3725_v25 }
  0x80   :  { %568 = vmatpush.msrb.mxu0 %v3726_v26  ;;  %588 = vmatpush.msrb.mxu1 %v3727_v27 }
  0x81   :  { %608 = vmatpush.msrb.mxu2 %v3728_v28  ;;  %628 = vmatpush.msrb.mxu3 %v3729_v29 }
  0x82   :  { %569 = vmatpush.msrb.mxu0 %v3730_v30  ;;  %589 = vmatpush.msrb.mxu1 %v3731_v31 }
  0x83   :  { %609 = vmatpush.msrb.mxu2 %v3732_v32  ;;  %629 = vmatpush.msrb.mxu3 %v3733_v33 }
  0x84   :  { %570 = vmatpush.msrb.mxu0 %v3734_v35  ;;  %590 = vmatpush.msrb.mxu1 %v3735_v36 }
  0x85   :  { %610 = vmatpush.msrb.mxu2 %v3736_v37  ;;  %630 = vmatpush.msrb.mxu3 %v3737_v38 }
  0x86   :  { %421 = vmatmul.f32.vlgmr.msra.gmra.mxu0 %v329_v34  ;;  %444 = vmatmul.f32.vlgmr.msra.gmra.mxu1 %v329_v34 }
  0x87   :  { %467 = vmatmul.f32.vlgmr.msra.gmra.mxu2 %v329_v34  ;;  %490 = vmatmul.f32.vlgmr.msra.gmra.mxu3 %v329_v34  ;;  %v3767_v34 = vld [vmem:[#allocation20_spill] sm:$0xff] }
  0x88   :  { %571 = vmatpush.msrb.mxu0 %v3738_v39  ;;  %591 = vmatpush.msrb.mxu1 %v3739_v40 }
  0x89   :  { %611 = vmatpush.msrb.mxu2 %v3740_v41  ;;  %631 = vmatpush.msrb.mxu3 %v3741_v42 }
  0x8a   :  { %572 = vmatpush.msrb.mxu0 %v3742_v43  ;;  %592 = vmatpush.msrb.mxu1 %v3743_v44 }
  0x8b   :  { %612 = vmatpush.msrb.mxu2 %v3744_v45  ;;  %632 = vmatpush.msrb.mxu3 %v3745_v46 }
  0x8c   :  { %573 = vmatpush.msrb.mxu0 %v3746_v47  ;;  %593 = vmatpush.msrb.mxu1 %v3747_v48 }
  0x8d   :  { %613 = vmatpush.msrb.mxu2 %v3748_v49  ;;  %633 = vmatpush.msrb.mxu3 %v3749_v50 }
  0x8e   :  { %574 = vmatpush.msrb.mxu0 %v3750_v52  ;;  %594 = vmatpush.msrb.mxu1 %v3751_v53 }
  0x8f   :  { %614 = vmatpush.msrb.mxu2 %v3752_v54  ;;  %634 = vmatpush.msrb.mxu3 %v3753_v55 }
  0x90   :  { %424 = vmatmul.f32.gmra.mxu0 %v330_v51  ;;  %447 = vmatmul.f32.gmra.mxu1 %v330_v51 }
  0x91   :  { %470 = vmatmul.f32.gmra.mxu2 %v330_v51  ;;  %493 = vmatmul.f32.gmra.mxu3 %v330_v51  ;;  %v3768_v51 = vld [vmem:[#allocation21_spill] sm:$0xff] }
  0x92   :  { %575 = vmatpush.msrb.mxu0 %v3754_v56  ;;  %595 = vmatpush.msrb.mxu1 %v3755_v57 }
  0x93   :  { %615 = vmatpush.msrb.mxu2 %v3756_v58  ;;  %635 = vmatpush.msrb.mxu3 %v3757_v59 }
  0x94   :  { %576 = vmatpush.msrb.mxu0 %v3758_v60  ;;  %596 = vmatpush.msrb.mxu1 %v3759_v61  ;;  %v3769_v61 = vld [vmem:[#allocation22_spill] sm:$0xff] }
  0x95   :  { %616 = vmatpush.msrb.mxu2 %v3760_v62  ;;  %636 = vmatpush.msrb.mxu3 %v3761_v63 }
  0x96   :  { %577 = vmatpush.msrb.mxu0 %v3762_v16  ;;  %597 = vmatpush.msrb.mxu1 %v3763_v12 }
  0x97   :  { %617 = vmatpush.msrb.mxu2 %v3764_v8  ;;  %637 = vmatpush.msrb.mxu3 %v3765_v9 }
  0x98   :  { %578 = vmatpush.msrb.mxu0 %v3766_v14  ;;  %598 = vmatpush.msrb.mxu1 %v3767_v34 }
  0x99   :  { %618 = vmatpush.msrb.mxu2 %v3768_v51  ;;  %638 = vmatpush.msrb.mxu3 %v3769_v61 }
  0x9a   :  { %579 = vmatmul.f32.vlgmr.msrb.gmra.mxu0 %v497_v13  ;;  %599 = vmatmul.f32.vlgmr.msrb.gmra.mxu1 %v497_v13 }
  0x9b   :  { %619 = vmatmul.f32.vlgmr.msrb.gmra.mxu2 %v497_v13  ;;  %639 = vmatmul.f32.vlgmr.msrb.gmra.mxu3 %v497_v13  ;;  %v3770_v13 = vld [vmem:[#allocation28_spill] sm:$0xff] }
  0x9c   :  { %713 = vmatpush.msra.mxu0 %v2728_v3  ;;  %733 = vmatpush.msra.mxu1 %v2733_v2 }
  0x9d   :  { %753 = vmatpush.msra.mxu2 %v2738_v1  ;;  %773 = vmatpush.msra.mxu3 %v2743_v0 }
  0x9e   :  { %714 = vmatpush.msra.mxu0 %v3711_v4  ;;  %734 = vmatpush.msra.mxu1 %v3712_v5 }
  0x9f   :  { %754 = vmatpush.msra.mxu2 %v3713_v6  ;;  %774 = vmatpush.msra.mxu3 %v2723_v7 }
  0xa0   :  { %715 = vmatpush.msra.mxu0 %v3714_v10  ;;  %735 = vmatpush.msra.mxu1 %v3715_v11 }
  0xa1   :  { %755 = vmatpush.msra.mxu2 %v3716_v15  ;;  %775 = vmatpush.msra.mxu3 %v3717_v17 }
  0xa2   :  { %716 = vmatpush.msra.mxu0 %v3718_v18  ;;  %736 = vmatpush.msra.mxu1 %v3719_v19 }
  0xa3   :  { %756 = vmatpush.msra.mxu2 %v3720_v20  ;;  %776 = vmatpush.msra.mxu3 %v3721_v21 }
  0xa4   :  { %717 = vmatpush.msra.mxu0 %v3722_v22  ;;  %737 = vmatpush.msra.mxu1 %v3723_v23 }
  0xa5   :  { %757 = vmatpush.msra.mxu2 %v3724_v24  ;;  %777 = vmatpush.msra.mxu3 %v3725_v25 }
  0xa6   :  { %718 = vmatpush.msra.mxu0 %v3726_v26  ;;  %738 = vmatpush.msra.mxu1 %v3727_v27 }
  0xa7   :  { %758 = vmatpush.msra.mxu2 %v3728_v28  ;;  %778 = vmatpush.msra.mxu3 %v3729_v29 }
  0xa8   :  { %719 = vmatpush.msra.mxu0 %v3730_v30  ;;  %739 = vmatpush.msra.mxu1 %v3731_v31 }
  0xa9   :  { %759 = vmatpush.msra.mxu2 %v3732_v32  ;;  %779 = vmatpush.msra.mxu3 %v3733_v33 }
  0xaa   :  { %720 = vmatpush.msra.mxu0 %v3734_v35  ;;  %740 = vmatpush.msra.mxu1 %v3735_v36 }
  0xab   :  { %760 = vmatpush.msra.mxu2 %v3736_v37  ;;  %780 = vmatpush.msra.mxu3 %v3737_v38 }
  0xac   :  { %721 = vmatpush.msra.mxu0 %v3738_v39  ;;  %741 = vmatpush.msra.mxu1 %v3739_v40 }
  0xad   :  { %761 = vmatpush.msra.mxu2 %v3740_v41  ;;  %781 = vmatpush.msra.mxu3 %v3741_v42 }
  0xae   :  { %722 = vmatpush.msra.mxu0 %v3742_v43  ;;  %742 = vmatpush.msra.mxu1 %v3743_v44 }
  0xaf   :  { %762 = vmatpush.msra.mxu2 %v3744_v45  ;;  %782 = vmatpush.msra.mxu3 %v3745_v46 }
  0xb0   :  { %723 = vmatpush.msra.mxu0 %v3746_v47  ;;  %743 = vmatpush.msra.mxu1 %v3747_v48 }
  0xb1   :  { %763 = vmatpush.msra.mxu2 %v3748_v49  ;;  %783 = vmatpush.msra.mxu3 %v3749_v50 }
  0xb2   :  { %724 = vmatpush.msra.mxu0 %v3750_v52  ;;  %744 = vmatpush.msra.mxu1 %v3751_v53 }
  0xb3   :  { %764 = vmatpush.msra.mxu2 %v3752_v54  ;;  %784 = vmatpush.msra.mxu3 %v3753_v55 }
  0xb4   :  { %725 = vmatpush.msra.mxu0 %v3754_v56  ;;  %745 = vmatpush.msra.mxu1 %v3755_v57 }
  0xb5   :  { %765 = vmatpush.msra.mxu2 %v3756_v58  ;;  %785 = vmatpush.msra.mxu3 %v3757_v59 }
  0xb6   :  { %726 = vmatpush.msra.mxu0 %v3758_v60  ;;  %746 = vmatpush.msra.mxu1 %v3770_v13 }
  0xb7   :  { %766 = vmatpush.msra.mxu2 %v3760_v62  ;;  %786 = vmatpush.msra.mxu3 %v3761_v63 }
  0xb8   :  { %727 = vmatpush.msra.mxu0 %v3762_v16  ;;  %747 = vmatpush.msra.mxu1 %v3763_v12 }
  0xb9   :  { %767 = vmatpush.msra.mxu2 %v3764_v8  ;;  %787 = vmatpush.msra.mxu3 %v3765_v9 }
  0xba   :  { %728 = vmatpush.msra.mxu0 %v3766_v14  ;;  %748 = vmatpush.msra.mxu1 %v3767_v34 }
  0xbb   :  { %768 = vmatpush.msra.mxu2 %v3768_v51  ;;  %788 = vmatpush.msra.mxu3 %v3769_v61 }
  0xbc   :  { %864 = vmatpush.msrb.mxu0 %v2728_v3  ;;  %884 = vmatpush.msrb.mxu1 %v2733_v2 }
  0xbd   :  { %904 = vmatpush.msrb.mxu2 %v2738_v1  ;;  %924 = vmatpush.msrb.mxu3 %v2743_v0 }
  0xbe   :  { %865 = vmatpush.msrb.mxu0 %v3711_v4  ;;  %885 = vmatpush.msrb.mxu1 %v3712_v5 }
  0xbf   :  { %905 = vmatpush.msrb.mxu2 %v3713_v6  ;;  %925 = vmatpush.msrb.mxu3 %v2723_v7 }
  0xc0   :  { %866 = vmatpush.msrb.mxu0 %v3714_v10  ;;  %886 = vmatpush.msrb.mxu1 %v3715_v11 }
  0xc1   :  { %906 = vmatpush.msrb.mxu2 %v3716_v15  ;;  %926 = vmatpush.msrb.mxu3 %v3717_v17 }
  0xc2   :  { %867 = vmatpush.msrb.mxu0 %v3718_v18  ;;  %887 = vmatpush.msrb.mxu1 %v3719_v19 }
  0xc3   :  { %907 = vmatpush.msrb.mxu2 %v3720_v20  ;;  %927 = vmatpush.msrb.mxu3 %v3721_v21 }
  0xc4   :  { %868 = vmatpush.msrb.mxu0 %v3722_v22  ;;  %888 = vmatpush.msrb.mxu1 %v3723_v23 }
  0xc5   :  { %908 = vmatpush.msrb.mxu2 %v3724_v24  ;;  %928 = vmatpush.msrb.mxu3 %v3725_v25 }
  0xc6   :  { %869 = vmatpush.msrb.mxu0 %v3726_v26  ;;  %889 = vmatpush.msrb.mxu1 %v3727_v27 }
  0xc7   :  { %909 = vmatpush.msrb.mxu2 %v3728_v28  ;;  %929 = vmatpush.msrb.mxu3 %v3729_v29 }
  0xc8   :  { %870 = vmatpush.msrb.mxu0 %v3730_v30  ;;  %890 = vmatpush.msrb.mxu1 %v3731_v31 }
  0xc9   :  { %910 = vmatpush.msrb.mxu2 %v3732_v32  ;;  %930 = vmatpush.msrb.mxu3 %v3733_v33 }
  0xca   :  { %871 = vmatpush.msrb.mxu0 %v3734_v35  ;;  %891 = vmatpush.msrb.mxu1 %v3735_v36 }
  0xcb   :  { %911 = vmatpush.msrb.mxu2 %v3736_v37  ;;  %931 = vmatpush.msrb.mxu3 %v3737_v38 }
  0xcc   :  { %872 = vmatpush.msrb.mxu0 %v3738_v39  ;;  %892 = vmatpush.msrb.mxu1 %v3739_v40 }
  0xcd   :  { %912 = vmatpush.msrb.mxu2 %v3740_v41  ;;  %932 = vmatpush.msrb.mxu3 %v3741_v42 }
  0xce   :  { %873 = vmatpush.msrb.mxu0 %v3742_v43  ;;  %893 = vmatpush.msrb.mxu1 %v3743_v44 }
  0xcf   :  { %913 = vmatpush.msrb.mxu2 %v3744_v45  ;;  %933 = vmatpush.msrb.mxu3 %v3745_v46 }
  0xd0   :  { %874 = vmatpush.msrb.mxu0 %v3746_v47  ;;  %894 = vmatpush.msrb.mxu1 %v3747_v48 }
  0xd1   :  { %914 = vmatpush.msrb.mxu2 %v3748_v49  ;;  %934 = vmatpush.msrb.mxu3 %v3749_v50 }
  0xd2   :  { %875 = vmatpush.msrb.mxu0 %v3750_v52  ;;  %895 = vmatpush.msrb.mxu1 %v3751_v53 }
  0xd3   :  { %915 = vmatpush.msrb.mxu2 %v3752_v54  ;;  %935 = vmatpush.msrb.mxu3 %v3753_v55 }
  0xd4   :  { %876 = vmatpush.msrb.mxu0 %v3754_v56  ;;  %896 = vmatpush.msrb.mxu1 %v3755_v57 }
  0xd5   :  { %916 = vmatpush.msrb.mxu2 %v3756_v58  ;;  %936 = vmatpush.msrb.mxu3 %v3757_v59 }
  0xd6   :  { %877 = vmatpush.msrb.mxu0 %v3758_v60  ;;  %897 = vmatpush.msrb.mxu1 %v3770_v13 }
  0xd7   :  { %917 = vmatpush.msrb.mxu2 %v3760_v62  ;;  %937 = vmatpush.msrb.mxu3 %v3761_v63  ;;  %v1876_v63 = vld [vmem:[%s3533_s5] ss:$0 sm:$0xff] }
  0xd8   :  { %878 = vmatpush.msrb.mxu0 %v3762_v16  ;;  %898 = vmatpush.msrb.mxu1 %v3763_v12  ;;  %328 = vst [vmem:[#allocation6] sm:$0x3] %v1876_v63 }
  0xd9   :  { %918 = vmatpush.msrb.mxu2 %v3764_v8  ;;  %938 = vmatpush.msrb.mxu3 %v3765_v9 }
  0xda   :  { %879 = vmatpush.msrb.mxu0 %v3766_v14  ;;  %899 = vmatpush.msrb.mxu1 %v3767_v34  ;;  %v395_v14 = vld [vmem:[%s3531_s3] sm:$0xf]  ;;  %s2067_s3 = smov [#allocation7]  }
  0xdb   :  { %919 = vmatpush.msrb.mxu2 %v3768_v51  ;;  %939 = vmatpush.msrb.mxu3 %v3769_v61  ;;  %v397_v34 = vperm.slane %v395_v14, 0  ;;  %v398_v9 = vperm.slane %v395_v14, 1  ;;  %v399_v49 = vperm.slane %v395_v14, 2  ;;  %v400_v48 = vperm.slane %v395_v14, 3  ;;  %s1835_s5 = sshll.u32 %s2067_s3, 4  ;;  %s1836_s5 = int_to_ptr.vmem [resolvable:$true] %s1835_s5 }
 0x103   :  { %v422_v16 = vpop.f32.mrf.mxu0  ;;  %v445_v62 = vpop.f32.mrf.mxu1 }
 0x104   :  { %v3016_v61 = vadd.f32 %v422_v16, %v397_v34  ;;  %v3018_v58 = vadd.f32 %v445_v62, %v398_v9 }
 0x106   :  { %3771 = vst [vmem:[#allocation18_spill] sm:$0xff] %v3016_v61 }
 0x107   :  { %3772 = vst [vmem:[#allocation14_spill] sm:$0xff] %v3018_v58 }
 0x10a   :  { %v468_v12 = vpop.f32.mrf.mxu2  ;;  %v491_v13 = vpop.f32.mrf.mxu3 }
 0x10d   :  { %v425_v8 = vpop.f32.mrf.mxu0  ;;  %v448_v60 = vpop.f32.mrf.mxu1 }
 0x10e   :  { %v3020_v57 = vadd.f32 %v425_v8, %v397_v34  ;;  %v3022_v63 = vadd.f32 %v448_v60, %v398_v9  ;;  %v3028_v9 = vadd.f32 %v468_v12, %v399_v49  ;;  %v3030_v34 = vadd.f32 %v491_v13, %v400_v48 }
 0x110   :  { %3773 = vst [vmem:[#allocation15_spill] sm:$0xff] %v3020_v57 }
 0x111   :  { %3774 = vst [vmem:[#allocation16_spill] sm:$0xff] %v3022_v63 }
 0x112   :  { %3775 = vst [vmem:[#allocation17_spill] sm:$0xff] %v3028_v9 }
 0x113   :  { %3776 = vst [vmem:[#allocation75_spill] sm:$0xff] %v3030_v34 }
 0x114   :  { %v471_v51 = vpop.f32.mrf.mxu2  ;;  %v494_v59 = vpop.f32.mrf.mxu3 }
 0x117   :  { %v580_v56 = vpop.f32.mrf.mxu0  ;;  %v600_v55 = vpop.f32.mrf.mxu1 }
 0x118   :  { %v647_v54 = vrot.slane %v580_v56, 1  ;;  %v659_v53 = vadd.f32 %v580_v56, %v3016_v61  ;;  %v648_v52 = vrot.slane %v600_v55, 1  ;;  %v660_v50 = vadd.f32 %v600_v55, %v3018_v58 }
 0x119   :  { %v3032_v56 = vadd.f32 %v471_v51, %v399_v49  ;;  %v3034_v61 = vadd.f32 %v494_v59, %v400_v48  ;;  %v498_v48 = vld [vmem:[#allocation6] sm:$0x3] }
 0x11a   :  { %v663_v47 = vadd.f32 %v647_v54, %v3020_v57  ;;  %v667_v16 = vmul.f32 0.5, %v659_v53  ;;  %v664_v62 = vadd.f32 %v648_v52, %v3022_v63  ;;  %v675_v46 = vmul.f32 0.5, %v660_v50 }
 0x11b   :  { %3777 = vst [vmem:[#allocation76_spill] sm:$0xff] %v3032_v56 }
 0x11c   :  { %v668_v8 = vmul.f32 0.5, %v663_v47  ;;  %1877 = vtanh.f32 %v667_v16  ;;  %v676_v60 = vmul.f32 0.5, %v664_v62  ;;  %3778 = vst [vmem:[#allocation77_spill] sm:$0xff] %v3034_v61 }
 0x11d   :  { %1879 = vtanh.f32 %v675_v46 }
 0x11e   :  { %1881 = vtanh.f32 %v668_v8  ;;  %v620_v55 = vpop.f32.mrf.mxu2  ;;  %v640_v14 = vpop.f32.mrf.mxu3 }
 0x11f   :  { %1883 = vtanh.f32 %v676_v60  ;;  %v649_v53 = vrot.slane %v620_v55, 1  ;;  %v661_v52 = vadd.f32 %v620_v55, %v3028_v9  ;;  %v650_v50 = vrot.slane %v640_v14, 1 }
 0x120   :  { %v662_v47 = vadd.f32 %v640_v14, %v3030_v34  ;;  %v694_v14 = vrot.slane %v498_v48, 1 }
 0x121   :  { %v665_v54 = vadd.f32 %v649_v53, %v3032_v56  ;;  %1885 = vtanh.f32 %v661_v52  ;;  %v666_v46 = vadd.f32 %v650_v50, %v3034_v61 }
 0x122   :  { %v1878_v12 = vpop.eup %1877  ;;  %v685_v62 = vmul.f32 0.5, %v662_v47 }
 0x123   :  { %v1880_v49 = vpop.eup %1879  ;;  %v671_v51 = vmul.f32 0.5, %v1878_v12  ;;  %1887 = vtanh.f32 %v665_v54  ;;  %v686_v59 = vmul.f32 0.5, %v666_v46 }
 0x124   :  { %v1882_v13 = vpop.eup %1881  ;;  %v679_v16 = vmul.f32 0.5, %v1880_v49 }
 0x125   :  { %v1884_v8 = vpop.eup %1883  ;;  %v672_v60 = vmul.f32 0.5, %v1882_v13  ;;  %v673_v55 = vadd.f32 0.5, %v671_v51  ;;  %1889 = vtanh.f32 %v686_v59 }
 0x126   :  { %v680_v9 = vmul.f32 0.5, %v1884_v8  ;;  %v681_v58 = vadd.f32 0.5, %v679_v16  ;;  %1891 = vtanh.f32 %v685_v62  ;;  %v3781_v8 = vld [vmem:[#allocation46_spill] sm:$0xff] }
 0x127   :  { %v1886_v53 = vpop.eup %1885  ;;  %v674_v52 = vadd.f32 0.5, %v672_v60  ;;  %v3782_v60 = vld [vmem:[#allocation39_spill] sm:$0xff] }
 0x128   :  { %v682_v34 = vadd.f32 0.5, %v680_v9  ;;  %v697_v50 = vmul.f32 %v681_v58, %v498_v48  ;;  %v699_v61 = vmul.f32 %v1886_v53, %v673_v55  ;;  %v3783_v55 = vld [vmem:[#allocation40_spill] sm:$0xff]  ;;  %v3785_v53 = vld [vmem:[#allocation42_spill] sm:$0xff] }
 0x129   :  { %v1888_v12 = vpop.eup %1887 }
 0x12a   :  { %v698_v56 = vmul.f32 %v694_v14, %v682_v34  ;;  %v700_v54 = vmul.f32 %v1888_v12, %v674_v52  ;;  %v3040_v46 = vadd.f32 %v699_v61, %v697_v50  ;;  %v3784_v14 = vld [vmem:[#allocation41_spill] sm:$0xff]  ;;  %v3786_v52 = vld [vmem:[#allocation35_spill] sm:$0xff]  ;;  %v3787_v50 = vld [vmem:[#allocation36_spill] sm:$0xff] }
 0x12b   :  { %v1890_v49 = vpop.eup %1889  ;;  %v3788_v12 = vld [vmem:[#allocation37_spill] sm:$0xff] }
 0x12c   :  { %v3042_v47 = vadd.f32 %v700_v54, %v698_v56  ;;  %1893 = vtanh.f32 %v3040_v46  ;;  %v1892_v51 = vpop.eup %1891  ;;  %v690_v59 = vmul.f32 0.5, %v1890_v49  ;;  %v3789_v54 = vld [vmem:[#allocation38_spill] sm:$0xff]  ;;  %v3790_v49 = vld [vmem:[#allocation31_spill] sm:$0xff] }
 0x12d   :  { %v689_v13 = vmul.f32 0.5, %v1892_v51  ;;  %v3791_v51 = vld [vmem:[#allocation32_spill] sm:$0xff] }
 0x12e   :  { %1895 = vtanh.f32 %v3042_v47  ;;  %v692_v9 = vadd.f32 0.5, %v690_v59  ;;  %v3792_v59 = vld [vmem:[#allocation33_spill] sm:$0xff] }
 0x12f   :  { %v691_v48 = vadd.f32 0.5, %v689_v13  ;;  %v3793_v13 = vld [vmem:[#allocation34_spill] sm:$0xff] }
 0x132   :  { %v1894_v16 = vpop.eup %1893 }
 0x133   :  { %v3048_v34 = vmul.f32 %v1894_v16, %v691_v48  ;;  %v3794_v16 = vld [vmem:[#allocation27_spill] sm:$0xff]  ;;  %v3797_v48 = vld [vmem:[#allocation30_spill] sm:$0xff] }
 0x134   :  { %v1896_v58 = vpop.eup %1895 }
 0x135   :  { %v3046_v62 = vmul.f32 %v1896_v58, %v692_v9  ;;  %3780 = vst [vmem:[#allocation72_spill] sm:$0xff] %v3048_v34  ;;  %v3795_v9 = vld [vmem:[#allocation28_spill] sm:$0xff]  ;;  %v3796_v58 = vld [vmem:[#allocation29_spill] sm:$0xff] }
 0x137   :  { %3779 = vst [vmem:[#allocation71_spill] sm:$0xff] %v3046_v62  ;;  %v709_v61 = vrot.slane %v3046_v62, 7  ;;  %v3800_v62 = vld [vmem:[#allocation25_spill] sm:$0xff] }
 0x139   :  { %v711_v56 = vsel %vm710_vm0, %v709_v61, %v3048_v34  ;;  %v3798_v61 = vld [vmem:[#allocation23_spill] sm:$0xff]  ;;  %v3801_v34 = vld [vmem:[#allocation26_spill] sm:$0xff] }
 0x13a   :  { %729 = vmatmul.f32.vlgmr.msra.gmra.mxu0 %v711_v56  ;;  %749 = vmatmul.f32.vlgmr.msra.gmra.mxu1 %v711_v56 }
 0x13b   :  { %769 = vmatmul.f32.vlgmr.msra.gmra.mxu2 %v711_v56  ;;  %789 = vmatmul.f32.vlgmr.msra.gmra.mxu3 %v711_v56  ;;  %v3799_v56 = vld [vmem:[#allocation24_spill] sm:$0xff] }
 0x13c   :  { %1020 = vmatpush.msra.mxu0 %v2728_v3  ;;  %1040 = vmatpush.msra.mxu1 %v2733_v2 }
 0x13d   :  { %1060 = vmatpush.msra.mxu2 %v2738_v1  ;;  %1080 = vmatpush.msra.mxu3 %v2743_v0 }
 0x13e   :  { %1021 = vmatpush.msra.mxu0 %v3711_v4  ;;  %1041 = vmatpush.msra.mxu1 %v3712_v5 }
 0x13f   :  { %1061 = vmatpush.msra.mxu2 %v3713_v6  ;;  %1081 = vmatpush.msra.mxu3 %v2723_v7 }
 0x140   :  { %1022 = vmatpush.msra.mxu0 %v3714_v10  ;;  %1042 = vmatpush.msra.mxu1 %v3715_v11 }
 0x141   :  { %1062 = vmatpush.msra.mxu2 %v3716_v15  ;;  %1082 = vmatpush.msra.mxu3 %v3717_v17 }
 0x142   :  { %1023 = vmatpush.msra.mxu0 %v3718_v18  ;;  %1043 = vmatpush.msra.mxu1 %v3719_v19 }
 0x143   :  { %1063 = vmatpush.msra.mxu2 %v3720_v20  ;;  %1083 = vmatpush.msra.mxu3 %v3721_v21 }
 0x144   :  { %1024 = vmatpush.msra.mxu0 %v3722_v22  ;;  %1044 = vmatpush.msra.mxu1 %v3723_v23 }
 0x145   :  { %1064 = vmatpush.msra.mxu2 %v3724_v24  ;;  %1084 = vmatpush.msra.mxu3 %v3725_v25 }
 0x146   :  { %1025 = vmatpush.msra.mxu0 %v3726_v26  ;;  %1045 = vmatpush.msra.mxu1 %v3727_v27 }
 0x147   :  { %1065 = vmatpush.msra.mxu2 %v3728_v28  ;;  %1085 = vmatpush.msra.mxu3 %v3729_v29 }
 0x148   :  { %1026 = vmatpush.msra.mxu0 %v3730_v30  ;;  %1046 = vmatpush.msra.mxu1 %v3731_v31 }
 0x149   :  { %1066 = vmatpush.msra.mxu2 %v3732_v32  ;;  %1086 = vmatpush.msra.mxu3 %v3733_v33 }
 0x14a   :  { %1027 = vmatpush.msra.mxu0 %v3734_v35  ;;  %1047 = vmatpush.msra.mxu1 %v3735_v36 }
 0x14b   :  { %1067 = vmatpush.msra.mxu2 %v3736_v37  ;;  %1087 = vmatpush.msra.mxu3 %v3737_v38 }
 0x14c   :  { %1028 = vmatpush.msra.mxu0 %v3738_v39  ;;  %1048 = vmatpush.msra.mxu1 %v3739_v40 }
 0x14d   :  { %1068 = vmatpush.msra.mxu2 %v3740_v41  ;;  %1088 = vmatpush.msra.mxu3 %v3741_v42 }
 0x14e   :  { %1029 = vmatpush.msra.mxu0 %v3742_v43  ;;  %1049 = vmatpush.msra.mxu1 %v3743_v44 }
 0x14f   :  { %1069 = vmatpush.msra.mxu2 %v3744_v45  ;;  %1089 = vmatpush.msra.mxu3 %v3781_v8 }
 0x150   :  { %1030 = vmatpush.msra.mxu0 %v3782_v60  ;;  %1050 = vmatpush.msra.mxu1 %v3783_v55  ;;  %v3809_v55 = vld [vmem:[#allocation77_spill] sm:$0xff] }
 0x151   :  { %1070 = vmatpush.msra.mxu2 %v3784_v14  ;;  %1090 = vmatpush.msra.mxu3 %v3785_v53  ;;  %v3808_v14 = vld [vmem:[#allocation76_spill] sm:$0xff] }
 0x152   :  { %1031 = vmatpush.msra.mxu0 %v3786_v52  ;;  %1051 = vmatpush.msra.mxu1 %v3787_v50 }
 0x153   :  { %1071 = vmatpush.msra.mxu2 %v3788_v12  ;;  %1091 = vmatpush.msra.mxu3 %v3789_v54  ;;  %v3806_v54 = vld [vmem:[#allocation18_spill] sm:$0xff] }
 0x154   :  { %1032 = vmatpush.msra.mxu0 %v3790_v49  ;;  %1052 = vmatpush.msra.mxu1 %v3791_v51  ;;  %v3802_v51 = vld [vmem:[#allocation19_spill] sm:$0xff] }
 0x155   :  { %1072 = vmatpush.msra.mxu2 %v3792_v59  ;;  %1092 = vmatpush.msra.mxu3 %v3793_v13  ;;  %v3803_v59 = vld [vmem:[#allocation20_spill] sm:$0xff]  ;;  %v3804_v13 = vld [vmem:[#allocation21_spill] sm:$0xff] }
 0x156   :  { %1033 = vmatpush.msra.mxu0 %v3794_v16  ;;  %1053 = vmatpush.msra.mxu1 %v3795_v9  ;;  %v3805_v16 = vld [vmem:[#allocation22_spill] sm:$0xff] }
 0x157   :  { %1073 = vmatpush.msra.mxu2 %v3796_v58  ;;  %1093 = vmatpush.msra.mxu3 %v3797_v48 }
 0x158   :  { %1034 = vmatpush.msra.mxu0 %v3798_v61  ;;  %1054 = vmatpush.msra.mxu1 %v3799_v56 }
 0x159   :  { %1074 = vmatpush.msra.mxu2 %v3800_v62  ;;  %1094 = vmatpush.msra.mxu3 %v3801_v34  ;;  %v3807_v34 = vld [vmem:[#allocation14_spill] sm:$0xff] }
 0x15a   :  { %1035 = vmatpush.msra.mxu0 %v3802_v51  ;;  %1055 = vmatpush.msra.mxu1 %v3803_v59 }
 0x15b   :  { %1075 = vmatpush.msra.mxu2 %v3804_v13  ;;  %1095 = vmatpush.msra.mxu3 %v3805_v16 }
 0x1b7   :  { %v730_v9 = vpop.f32.mrf.mxu0  ;;  %v750_v58 = vpop.f32.mrf.mxu1 }
 0x1b8   :  { %v797_v49 = vrot.slane %v730_v9, 7  ;;  %v813_v48 = vadd.f32 %v730_v9, %v3020_v57  ;;  %v798_v61 = vrot.slane %v750_v58, 7  ;;  %v814_v56 = vadd.f32 %v750_v58, %v3022_v63  ;;  %v3810_v63 = vld [vmem:[#allocation17_spill] sm:$0xff] }
 0x1ba   :  { %v809_v62 = vadd.f32 %v797_v49, %v3806_v54  ;;  %v818_v12 = vmul.f32 0.5, %v813_v48  ;;  %v810_v50 = vadd.f32 %v798_v61, %v3807_v34  ;;  %v826_v51 = vmul.f32 0.5, %v814_v56  ;;  %v3811_v48 = vld [vmem:[#allocation75_spill] sm:$0xff] }
 0x1bc   :  { %v817_v52 = vmul.f32 0.5, %v809_v62  ;;  %1897 = vtanh.f32 %v818_v12  ;;  %v825_v59 = vmul.f32 0.5, %v810_v50 }
 0x1bd   :  { %1899 = vtanh.f32 %v826_v51 }
 0x1be   :  { %1901 = vtanh.f32 %v817_v52  ;;  %v770_v16 = vpop.f32.mrf.mxu2  ;;  %v790_v13 = vpop.f32.mrf.mxu3 }
 0x1bf   :  { %1903 = vtanh.f32 %v825_v59  ;;  %v799_v53 = vrot.slane %v770_v16, 7  ;;  %v815_v9 = vadd.f32 %v770_v16, %v3808_v14  ;;  %v800_v57 = vrot.slane %v790_v13, 7 }
 0x1c0   :  { %v816_v58 = vadd.f32 %v790_v13, %v3809_v55  ;;  %v846_v13 = vrot.slane %v3042_v47, 7 }
 0x1c1   :  { %v811_v49 = vadd.f32 %v799_v53, %v3810_v63  ;;  %1905 = vtanh.f32 %v815_v9  ;;  %v812_v61 = vadd.f32 %v800_v57, %v3811_v48  ;;  %v845_v57 = vrot.slane %v3040_v46, 7 }
 0x1c2   :  { %v1898_v56 = vpop.eup %1897  ;;  %v836_v34 = vmul.f32 0.5, %v816_v58 }
 0x1c3   :  { %v1900_v62 = vpop.eup %1899  ;;  %v822_v12 = vmul.f32 0.5, %v1898_v56  ;;  %1907 = vtanh.f32 %v811_v49  ;;  %v835_v50 = vmul.f32 0.5, %v812_v61 }
 0x1c4   :  { %v1902_v52 = vpop.eup %1901  ;;  %v830_v51 = vmul.f32 0.5, %v1900_v62 }
 0x1c5   :  { %v1904_v59 = vpop.eup %1903  ;;  %v821_v54 = vmul.f32 0.5, %v1902_v52  ;;  %v824_v60 = vadd.f32 0.5, %v822_v12  ;;  %1909 = vtanh.f32 %v835_v50 }
 0x1c6   :  { %v829_v16 = vmul.f32 0.5, %v1904_v59  ;;  %v832_v14 = vadd.f32 0.5, %v830_v51  ;;  %1911 = vtanh.f32 %v836_v34 }
 0x1c7   :  { %v1906_v53 = vpop.eup %1905  ;;  %v823_v9 = vadd.f32 0.5, %v821_v54 }
 0x1c8   :  { %v831_v55 = vadd.f32 0.5, %v829_v16  ;;  %v850_v48 = vmul.f32 %v846_v13, %v832_v14  ;;  %v852_v56 = vmul.f32 %v1906_v53, %v824_v60  ;;  %v3812_v16 = vld [vmem:[#allocation39_spill] sm:$0xff]  ;;  %v3813_v13 = vld [vmem:[#allocation40_spill] sm:$0xff]  ;;  %v3814_v53 = vld [vmem:[#allocation41_spill] sm:$0xff] }
 0x1c9   :  { %v1908_v49 = vpop.eup %1907 }
 0x1ca   :  { %v849_v61 = vmul.f32 %v845_v57, %v831_v55  ;;  %v851_v62 = vmul.f32 %v1908_v49, %v823_v9  ;;  %v3127_v58 = vadd.f32 %v852_v56, %v850_v48  ;;  %v3815_v9 = vld [vmem:[#allocation42_spill] sm:$0xff]  ;;  %v3816_v57 = vld [vmem:[#allocation35_spill] sm:$0xff]  ;;  %v3817_v56 = vld [vmem:[#allocation36_spill] sm:$0xff] }
 0x1cb   :  { %v1910_v52 = vpop.eup %1909  ;;  %v3818_v49 = vld [vmem:[#allocation37_spill] sm:$0xff] }
 0x1cc   :  { %v3129_v12 = vadd.f32 %v851_v62, %v849_v61  ;;  %1913 = vtanh.f32 %v3127_v58  ;;  %v1912_v47 = vpop.eup %1911  ;;  %v839_v54 = vmul.f32 0.5, %v1910_v52  ;;  %v3819_v61 = vld [vmem:[#allocation38_spill] sm:$0xff]  ;;  %v3820_v62 = vld [vmem:[#allocation31_spill] sm:$0xff]  ;;  %v3821_v52 = vld [vmem:[#allocation32_spill] sm:$0xff] }
 0x1cd   :  { %v840_v50 = vmul.f32 0.5, %v1912_v47  ;;  %v3822_v47 = vld [vmem:[#allocation33_spill] sm:$0xff] }
 0x1ce   :  { %1915 = vtanh.f32 %v3129_v12  ;;  %v841_v51 = vadd.f32 0.5, %v839_v54  ;;  %v3823_v54 = vld [vmem:[#allocation34_spill] sm:$0xff] }
 0x1cf   :  { %v842_v60 = vadd.f32 0.5, %v840_v50  ;;  %v3824_v50 = vld [vmem:[#allocation27_spill] sm:$0xff] }
 0x1d2   :  { %v1914_v46 = vpop.eup %1913 }
 0x1d3   :  { %v3135_v55 = vmul.f32 %v1914_v46, %v842_v60  ;;  %v3825_v46 = vld [vmem:[#allocation28_spill] sm:$0xff]  ;;  %v3828_v60 = vld [vmem:[#allocation23_spill] sm:$0xff] }
 0x1d4   :  { %v1916_v14 = vpop.eup %1915 }
 0x1d5   :  { %v3133_v34 = vmul.f32 %v1916_v14, %v841_v51  ;;  %v3826_v51 = vld [vmem:[#allocation29_spill] sm:$0xff]  ;;  %v3827_v14 = vld [vmem:[#allocation30_spill] sm:$0xff] }
 0x1d7   :  { %v861_v48 = vrot.slane %v3133_v34, 1 }
 0x1d9   :  { %v862_v59 = vsel %vm710_vm0, %v3135_v55, %v861_v48  ;;  %v3829_v48 = vld [vmem:[#allocation24_spill] sm:$0xff] }
 0x1da   :  { %880 = vmatmul.f32.vlgmr.msrb.gmra.mxu0 %v862_v59  ;;  %900 = vmatmul.f32.vlgmr.msrb.gmra.mxu1 %v862_v59 }
 0x1db   :  { %920 = vmatmul.f32.vlgmr.msrb.gmra.mxu2 %v862_v59  ;;  %940 = vmatmul.f32.vlgmr.msrb.gmra.mxu3 %v862_v59  ;;  %v3830_v59 = vld [vmem:[#allocation25_spill] sm:$0xff] }
 0x1dc   :  { %1176 = vmatpush.msrb.mxu0 %v2728_v3  ;;  %1196 = vmatpush.msrb.mxu1 %v2733_v2 }
 0x1dd   :  { %1216 = vmatpush.msrb.mxu2 %v2738_v1  ;;  %1236 = vmatpush.msrb.mxu3 %v2743_v0 }
 0x1de   :  { %1177 = vmatpush.msrb.mxu0 %v3711_v4  ;;  %1197 = vmatpush.msrb.mxu1 %v3712_v5 }
 0x1df   :  { %1217 = vmatpush.msrb.mxu2 %v3713_v6  ;;  %1237 = vmatpush.msrb.mxu3 %v2723_v7 }
 0x1e0   :  { %1178 = vmatpush.msrb.mxu0 %v3714_v10  ;;  %1198 = vmatpush.msrb.mxu1 %v3715_v11 }
 0x1e1   :  { %1218 = vmatpush.msrb.mxu2 %v3716_v15  ;;  %1238 = vmatpush.msrb.mxu3 %v3717_v17 }
 0x1e2   :  { %1179 = vmatpush.msrb.mxu0 %v3718_v18  ;;  %1199 = vmatpush.msrb.mxu1 %v3719_v19 }
 0x1e3   :  { %1219 = vmatpush.msrb.mxu2 %v3720_v20  ;;  %1239 = vmatpush.msrb.mxu3 %v3721_v21 }
 0x1e4   :  { %1180 = vmatpush.msrb.mxu0 %v3722_v22  ;;  %1200 = vmatpush.msrb.mxu1 %v3723_v23 }
 0x1e5   :  { %1220 = vmatpush.msrb.mxu2 %v3724_v24  ;;  %1240 = vmatpush.msrb.mxu3 %v3725_v25 }
 0x1e6   :  { %1181 = vmatpush.msrb.mxu0 %v3726_v26  ;;  %1201 = vmatpush.msrb.mxu1 %v3727_v27 }
 0x1e7   :  { %1221 = vmatpush.msrb.mxu2 %v3728_v28  ;;  %1241 = vmatpush.msrb.mxu3 %v3729_v29 }
 0x1e8   :  { %1182 = vmatpush.msrb.mxu0 %v3730_v30  ;;  %1202 = vmatpush.msrb.mxu1 %v3731_v31 }
 0x1e9   :  { %1222 = vmatpush.msrb.mxu2 %v3732_v32  ;;  %1242 = vmatpush.msrb.mxu3 %v3733_v33 }
 0x1ea   :  { %1183 = vmatpush.msrb.mxu0 %v3734_v35  ;;  %1203 = vmatpush.msrb.mxu1 %v3735_v36 }
 0x1eb   :  { %1223 = vmatpush.msrb.mxu2 %v3736_v37  ;;  %1243 = vmatpush.msrb.mxu3 %v3737_v38 }
 0x1ec   :  { %1184 = vmatpush.msrb.mxu0 %v3738_v39  ;;  %1204 = vmatpush.msrb.mxu1 %v3739_v40 }
 0x1ed   :  { %1224 = vmatpush.msrb.mxu2 %v3740_v41  ;;  %1244 = vmatpush.msrb.mxu3 %v3741_v42 }
 0x1ee   :  { %1185 = vmatpush.msrb.mxu0 %v3742_v43  ;;  %1205 = vmatpush.msrb.mxu1 %v3743_v44 }
 0x1ef   :  { %1225 = vmatpush.msrb.mxu2 %v3744_v45  ;;  %1245 = vmatpush.msrb.mxu3 %v3781_v8 }
 0x1f0   :  { %1186 = vmatpush.msrb.mxu0 %v3812_v16  ;;  %1206 = vmatpush.msrb.mxu1 %v3813_v13 }
 0x1f1   :  { %1226 = vmatpush.msrb.mxu2 %v3814_v53  ;;  %1246 = vmatpush.msrb.mxu3 %v3815_v9  ;;  %v3838_v9 = vld [vmem:[#allocation14_spill] sm:$0xff]  ;;  %v3839_v53 = vld [vmem:[#allocation16_spill] sm:$0xff] }
 0x1f2   :  { %1187 = vmatpush.msrb.mxu0 %v3816_v57  ;;  %1207 = vmatpush.msrb.mxu1 %v3817_v56  ;;  %v3836_v56 = vld [vmem:[#allocation18_spill] sm:$0xff]  ;;  %v3837_v57 = vld [vmem:[#allocation15_spill] sm:$0xff] }
 0x1f3   :  { %1227 = vmatpush.msrb.mxu2 %v3818_v49  ;;  %1247 = vmatpush.msrb.mxu3 %v3819_v61 }
 0x1f4   :  { %1188 = vmatpush.msrb.mxu0 %v3820_v62  ;;  %1208 = vmatpush.msrb.mxu1 %v3821_v52  ;;  %v3831_v62 = vld [vmem:[#allocation26_spill] sm:$0xff]  ;;  %v3832_v52 = vld [vmem:[#allocation19_spill] sm:$0xff] }
 0x1f5   :  { %1228 = vmatpush.msrb.mxu2 %v3822_v47  ;;  %1248 = vmatpush.msrb.mxu3 %v3823_v54  ;;  %v3833_v47 = vld [vmem:[#allocation20_spill] sm:$0xff]  ;;  %v3834_v54 = vld [vmem:[#allocation21_spill] sm:$0xff] }
 0x1f6   :  { %1189 = vmatpush.msrb.mxu0 %v3824_v50  ;;  %1209 = vmatpush.msrb.mxu1 %v3825_v46  ;;  %v3835_v50 = vld [vmem:[#allocation22_spill] sm:$0xff] }
 0x1f7   :  { %1229 = vmatpush.msrb.mxu2 %v3826_v51  ;;  %1249 = vmatpush.msrb.mxu3 %v3827_v14 }
 0x1f8   :  { %1190 = vmatpush.msrb.mxu0 %v3828_v60  ;;  %1210 = vmatpush.msrb.mxu1 %v3829_v48 }
 0x1f9   :  { %1230 = vmatpush.msrb.mxu2 %v3830_v59  ;;  %1250 = vmatpush.msrb.mxu3 %v3831_v62 }
 0x1fa   :  { %1191 = vmatpush.msrb.mxu0 %v3832_v52  ;;  %1211 = vmatpush.msrb.mxu1 %v3833_v47 }
 0x1fb   :  { %1231 = vmatpush.msrb.mxu2 %v3834_v54  ;;  %1251 = vmatpush.msrb.mxu3 %v3835_v50 }
 0x257   :  { %v881_v46 = vpop.f32.mrf.mxu0  ;;  %v901_v51 = vpop.f32.mrf.mxu1 }
 0x258   :  { %v948_v61 = vrot.slane %v881_v46, 6  ;;  %v952_v14 = vrot.slane %v881_v46, 7  ;;  %v949_v49 = vrot.slane %v901_v51, 6  ;;  %v953_v60 = vrot.slane %v901_v51, 7 }
 0x25a   :  { %v964_v48 = vadd.f32 %v948_v61, %v3836_v56  ;;  %v968_v59 = vadd.f32 %v952_v14, %v3837_v57  ;;  %v965_v62 = vadd.f32 %v949_v49, %v3838_v9  ;;  %v969_v52 = vadd.f32 %v953_v60, %v3839_v53  ;;  %v3840_v14 = vld [vmem:[#allocation76_spill] sm:$0xff]  ;;  %v3841_v9 = vld [vmem:[#allocation75_spill] sm:$0xff] }
 0x25c   :  { %v972_v13 = vmul.f32 0.5, %v964_v48  ;;  %v973_v47 = vmul.f32 0.5, %v968_v59  ;;  %v980_v16 = vmul.f32 0.5, %v965_v62  ;;  %v981_v54 = vmul.f32 0.5, %v969_v52  ;;  %v3842_v48 = vld [vmem:[#allocation77_spill] sm:$0xff] }
 0x25e   :  { %1917 = vtanh.f32 %v972_v13  ;;  %v921_v50 = vpop.f32.mrf.mxu2  ;;  %v941_v8 = vpop.f32.mrf.mxu3 }
 0x25f   :  { %1919 = vtanh.f32 %v973_v47  ;;  %v950_v45 = vrot.slane %v921_v50, 6  ;;  %v954_v46 = vrot.slane %v921_v50, 7  ;;  %v951_v44 = vrot.slane %v941_v8, 6 }
 0x260   :  { %1921 = vtanh.f32 %v980_v16  ;;  %v955_v51 = vrot.slane %v941_v8, 7 }
 0x261   :  { %1923 = vtanh.f32 %v981_v54  ;;  %v966_v61 = vadd.f32 %v950_v45, %v3810_v63  ;;  %v970_v49 = vadd.f32 %v954_v46, %v3840_v14  ;;  %v967_v60 = vadd.f32 %v951_v44, %v3841_v9 }
 0x262   :  { %v971_v59 = vadd.f32 %v955_v51, %v3842_v48  ;;  %v1000_v51 = vrot.slane %v3129_v12, 7 }
 0x263   :  { %1925 = vtanh.f32 %v966_v61  ;;  %v990_v62 = vmul.f32 0.5, %v967_v60 }
 0x264   :  { %v1918_v13 = vpop.eup %1917  ;;  %1927 = vtanh.f32 %v970_v49  ;;  %v991_v52 = vmul.f32 0.5, %v971_v59  ;;  %v1001_v49 = vrot.slane %v3127_v58, 7 }
 0x265   :  { %v1920_v47 = vpop.eup %1919  ;;  %v976_v53 = vmul.f32 0.5, %v1918_v13  ;;  %1929 = vtanh.f32 %v990_v62 }
 0x266   :  { %v1922_v50 = vpop.eup %1921  ;;  %v977_v57 = vmul.f32 0.5, %v1920_v47  ;;  %1931 = vtanh.f32 %v991_v52 }
 0x267   :  { %v1924_v16 = vpop.eup %1923  ;;  %v978_v8 = vadd.f32 0.5, %v976_v53  ;;  %v984_v54 = vmul.f32 0.5, %v1922_v50 }
 0x268   :  { %v979_v45 = vadd.f32 0.5, %v977_v57  ;;  %v985_v63 = vmul.f32 0.5, %v1924_v16 }
 0x269   :  { %v1926_v46 = vpop.eup %1925  ;;  %v986_v44 = vadd.f32 0.5, %v984_v54 }
 0x26a   :  { %v1928_v61 = vpop.eup %1927  ;;  %v987_v60 = vadd.f32 0.5, %v985_v63  ;;  %v1006_v59 = vmul.f32 %v1926_v46, %v978_v8  ;;  %v3843_v8 = vld [vmem:[#allocation72_spill] sm:$0xff] }
 0x26b   :  { %v1004_v48 = vmul.f32 %v1000_v51, %v986_v44  ;;  %v1007_v13 = vmul.f32 %v1928_v61, %v979_v45  ;;  %v1930_v47 = vpop.eup %1929 }
 0x26c   :  { %v1005_v9 = vmul.f32 %v1001_v49, %v987_v60  ;;  %v1932_v53 = vpop.eup %1931  ;;  %v994_v57 = vmul.f32 0.5, %v1930_v47  ;;  %v3847_v49 = vld [vmem:[#allocation46_spill] sm:$0xff]  ;;  %v3850_v47 = vld [vmem:[#allocation41_spill] sm:$0xff] }
 0x26d   :  { %v3214_v14 = vadd.f32 %v1006_v59, %v1004_v48  ;;  %v995_v12 = vmul.f32 0.5, %v1932_v53  ;;  %v1795_v48 = vsel %vm1794_vm1, %v3843_v8, %v3133_v34  ;;  %v3845_v34 = vld [vmem:[#allocation44_spill] sm:$0xff]  ;;  %v3848_v59 = vld [vmem:[#allocation39_spill] sm:$0xff]  ;;  %v3851_v53 = vld [vmem:[#allocation42_spill] sm:$0xff] }
 0x26e   :  { %v3216_v62 = vadd.f32 %v1007_v13, %v1005_v9  ;;  %v996_v52 = vadd.f32 0.5, %v994_v57  ;;  %v3844_v9 = vld [vmem:[#allocation71_spill] sm:$0xff]  ;;  %v3849_v13 = vld [vmem:[#allocation40_spill] sm:$0xff]  ;;  %v3859_v8 = vld [vmem:[#allocation34_spill] sm:$0xff] }
 0x26f   :  { %1933 = vtanh.f32 %v3214_v14  ;;  %v997_v58 = vadd.f32 0.5, %v995_v12  ;;  %v1796_v45 = vsel %vm1794_vm1, %v3844_v9, %v3135_v55  ;;  %v3846_v55 = vld [vmem:[#allocation45_spill] sm:$0xff]  ;;  %v3852_v57 = vld [vmem:[#allocation35_spill] sm:$0xff]  ;;  %v3853_v12 = vld [vmem:[#allocation36_spill] sm:$0xff] }
 0x270   :  { %1935 = vtanh.f32 %v3216_v62  ;;  %v3862_v9 = vld [vmem:[#allocation29_spill] sm:$0xff] }
 0x275   :  { %v1934_v63 = vpop.eup %1933 }
 0x276   :  { %v1936_v50 = vpop.eup %1935  ;;  %v1012_v16 = vmul.f32 %v1934_v63, %v996_v52  ;;  %v3854_v52 = vld [vmem:[#allocation37_spill] sm:$0xff]  ;;  %v3855_v63 = vld [vmem:[#allocation38_spill] sm:$0xff] }
 0x277   :  { %v1013_v54 = vmul.f32 %v1936_v50, %v997_v58  ;;  %v3856_v58 = vld [vmem:[#allocation31_spill] sm:$0xff]  ;;  %v3857_v50 = vld [vmem:[#allocation32_spill] sm:$0xff] }
 0x278   :  { %v3224_v46 = vsel %vm1797_vm2, %v1795_v48, %v1012_v16  ;;  %v1016_v44 = vrot.slane %v1012_v16, 2  ;;  %v3858_v16 = vld [vmem:[#allocation33_spill] sm:$0xff]  ;;  %v3860_v48 = vld [vmem:[#allocation27_spill] sm:$0xff] }
 0x279   :  { %v3226_v51 = vsel %vm1797_vm2, %v1796_v45, %v1013_v54  ;;  %v1017_v61 = vrot.slane %v1013_v54, 1  ;;  %v3861_v54 = vld [vmem:[#allocation28_spill] sm:$0xff]  ;;  %v3863_v45 = vld [vmem:[#allocation30_spill] sm:$0xff] }
 0x27b   :  { %v1018_v60 = vsel %vm710_vm0, %v1017_v61, %v1016_v44  ;;  %v3864_v44 = vld [vmem:[#allocation23_spill] sm:$0xff]  ;;  %v3865_v61 = vld [vmem:[#allocation24_spill] sm:$0xff] }
 0x27c   :  { %1036 = vmatmul.f32.vlgmr.msra.gmra.mxu0 %v1018_v60  ;;  %1056 = vmatmul.f32.vlgmr.msra.gmra.mxu1 %v1018_v60 }
 0x27d   :  { %1076 = vmatmul.f32.vlgmr.msra.gmra.mxu2 %v1018_v60  ;;  %1096 = vmatmul.f32.vlgmr.msra.gmra.mxu3 %v1018_v60  ;;  %v3866_v60 = vld [vmem:[#allocation25_spill] sm:$0xff] }
 0x27e   :  { %1332 = vmatpush.msra.mxu0 %v2728_v3  ;;  %1352 = vmatpush.msra.mxu1 %v2733_v2 }
 0x27f   :  { %1372 = vmatpush.msra.mxu2 %v2738_v1  ;;  %1392 = vmatpush.msra.mxu3 %v2743_v0 }
 0x280   :  { %1333 = vmatpush.msra.mxu0 %v3711_v4  ;;  %1353 = vmatpush.msra.mxu1 %v3712_v5 }
 0x281   :  { %1373 = vmatpush.msra.mxu2 %v3713_v6  ;;  %1393 = vmatpush.msra.mxu3 %v2723_v7 }
 0x282   :  { %1334 = vmatpush.msra.mxu0 %v3714_v10  ;;  %1354 = vmatpush.msra.mxu1 %v3715_v11 }
 0x283   :  { %1374 = vmatpush.msra.mxu2 %v3716_v15  ;;  %1394 = vmatpush.msra.mxu3 %v3717_v17 }
 0x284   :  { %1335 = vmatpush.msra.mxu0 %v3718_v18  ;;  %1355 = vmatpush.msra.mxu1 %v3719_v19 }
 0x285   :  { %1375 = vmatpush.msra.mxu2 %v3720_v20  ;;  %1395 = vmatpush.msra.mxu3 %v3721_v21 }
 0x286   :  { %1336 = vmatpush.msra.mxu0 %v3722_v22  ;;  %1356 = vmatpush.msra.mxu1 %v3723_v23 }
 0x287   :  { %1376 = vmatpush.msra.mxu2 %v3724_v24  ;;  %1396 = vmatpush.msra.mxu3 %v3725_v25 }
 0x288   :  { %1337 = vmatpush.msra.mxu0 %v3726_v26  ;;  %1357 = vmatpush.msra.mxu1 %v3727_v27 }
 0x289   :  { %1377 = vmatpush.msra.mxu2 %v3728_v28  ;;  %1397 = vmatpush.msra.mxu3 %v3729_v29 }
 0x28a   :  { %1338 = vmatpush.msra.mxu0 %v3730_v30  ;;  %1358 = vmatpush.msra.mxu1 %v3731_v31 }
 0x28b   :  { %1378 = vmatpush.msra.mxu2 %v3732_v32  ;;  %1398 = vmatpush.msra.mxu3 %v3733_v33 }
 0x28c   :  { %1339 = vmatpush.msra.mxu0 %v3734_v35  ;;  %1359 = vmatpush.msra.mxu1 %v3735_v36 }
 0x28d   :  { %1379 = vmatpush.msra.mxu2 %v3736_v37  ;;  %1399 = vmatpush.msra.mxu3 %v3737_v38 }
 0x28e   :  { %1340 = vmatpush.msra.mxu0 %v3738_v39  ;;  %1360 = vmatpush.msra.mxu1 %v3739_v40 }
 0x28f   :  { %1380 = vmatpush.msra.mxu2 %v3740_v41  ;;  %1400 = vmatpush.msra.mxu3 %v3741_v42 }
 0x290   :  { %1341 = vmatpush.msra.mxu0 %v3742_v43  ;;  %1361 = vmatpush.msra.mxu1 %v3845_v34 }
 0x291   :  { %1381 = vmatpush.msra.mxu2 %v3846_v55  ;;  %1401 = vmatpush.msra.mxu3 %v3847_v49 }
 0x292   :  { %1342 = vmatpush.msra.mxu0 %v3848_v59  ;;  %1362 = vmatpush.msra.mxu1 %v3849_v13 }
 0x293   :  { %1382 = vmatpush.msra.mxu2 %v3850_v47  ;;  %1402 = vmatpush.msra.mxu3 %v3851_v53  ;;  %v3874_v53 = vld [vmem:[#allocation16_spill] sm:$0xff] }
 0x294   :  { %1343 = vmatpush.msra.mxu0 %v3852_v57  ;;  %1363 = vmatpush.msra.mxu1 %v3853_v12  ;;  %v3872_v12 = vld [vmem:[#allocation15_spill] sm:$0xff]  ;;  %v3873_v57 = vld [vmem:[#allocation14_spill] sm:$0xff] }
 0x295   :  { %1383 = vmatpush.msra.mxu2 %v3854_v52  ;;  %1403 = vmatpush.msra.mxu3 %v3855_v63 }
 0x296   :  { %1344 = vmatpush.msra.mxu0 %v3856_v58  ;;  %1364 = vmatpush.msra.mxu1 %v3857_v50  ;;  %v3867_v58 = vld [vmem:[#allocation26_spill] sm:$0xff]  ;;  %v3868_v50 = vld [vmem:[#allocation19_spill] sm:$0xff] }
 0x297   :  { %1384 = vmatpush.msra.mxu2 %v3858_v16  ;;  %1404 = vmatpush.msra.mxu3 %v3859_v8  ;;  %v3869_v16 = vld [vmem:[#allocation20_spill] sm:$0xff]  ;;  %v3870_v8 = vld [vmem:[#allocation21_spill] sm:$0xff] }
 0x298   :  { %1345 = vmatpush.msra.mxu0 %v3860_v48  ;;  %1365 = vmatpush.msra.mxu1 %v3861_v54  ;;  %v3871_v48 = vld [vmem:[#allocation22_spill] sm:$0xff] }
 0x299   :  { %1385 = vmatpush.msra.mxu2 %v3862_v9  ;;  %1405 = vmatpush.msra.mxu3 %v3863_v45 }
 0x29a   :  { %1346 = vmatpush.msra.mxu0 %v3864_v44  ;;  %1366 = vmatpush.msra.mxu1 %v3865_v61 }
 0x29b   :  { %1386 = vmatpush.msra.mxu2 %v3866_v60  ;;  %1406 = vmatpush.msra.mxu3 %v3867_v58 }
 0x29c   :  { %1347 = vmatpush.msra.mxu0 %v3868_v50  ;;  %1367 = vmatpush.msra.mxu1 %v3869_v16 }
 0x29d   :  { %1387 = vmatpush.msra.mxu2 %v3870_v8  ;;  %1407 = vmatpush.msra.mxu3 %v3871_v48 }
 0x2f9   :  { %v1037_v54 = vpop.f32.mrf.mxu0  ;;  %v1057_v9 = vpop.f32.mrf.mxu1 }
 0x2fa   :  { %v1104_v63 = vrot.slane %v1037_v54, 5  ;;  %v1108_v45 = vrot.slane %v1037_v54, 6  ;;  %v1105_v52 = vrot.slane %v1057_v9, 5  ;;  %v1109_v44 = vrot.slane %v1057_v9, 6 }
 0x2fc   :  { %v1120_v61 = vadd.f32 %v1104_v63, %v3836_v56  ;;  %v1124_v60 = vadd.f32 %v1108_v45, %v3872_v12  ;;  %v1121_v58 = vadd.f32 %v1105_v52, %v3873_v57  ;;  %v1125_v50 = vadd.f32 %v1109_v44, %v3874_v53  ;;  %v3875_v63 = vld [vmem:[#allocation17_spill] sm:$0xff]  ;;  %v3876_v12 = vld [vmem:[#allocation76_spill] sm:$0xff]  ;;  %v3877_v57 = vld [vmem:[#allocation75_spill] sm:$0xff] }
 0x2fe   :  { %v1128_v47 = vmul.f32 0.5, %v1120_v61  ;;  %v1129_v16 = vmul.f32 0.5, %v1124_v60  ;;  %v1136_v13 = vmul.f32 0.5, %v1121_v58  ;;  %v1137_v8 = vmul.f32 0.5, %v1125_v50  ;;  %v3878_v61 = vld [vmem:[#allocation77_spill] sm:$0xff] }
 0x300   :  { %1937 = vtanh.f32 %v1128_v47  ;;  %v1077_v48 = vpop.f32.mrf.mxu2  ;;  %v1097_v59 = vpop.f32.mrf.mxu3 }
 0x301   :  { %1939 = vtanh.f32 %v1129_v16  ;;  %v1106_v49 = vrot.slane %v1077_v48, 5  ;;  %v1110_v54 = vrot.slane %v1077_v48, 6  ;;  %v1107_v55 = vrot.slane %v1097_v59, 5 }
 0x302   :  { %1941 = vtanh.f32 %v1136_v13  ;;  %v1111_v9 = vrot.slane %v1097_v59, 6 }
 0x303   :  { %1943 = vtanh.f32 %v1137_v8  ;;  %v1122_v45 = vadd.f32 %v1106_v49, %v3875_v63  ;;  %v1126_v52 = vadd.f32 %v1110_v54, %v3876_v12  ;;  %v1123_v44 = vadd.f32 %v1107_v55, %v3877_v57 }
 0x304   :  { %v1127_v60 = vadd.f32 %v1111_v9, %v3878_v61  ;;  %v1156_v9 = vrot.slane %v3214_v14, 7 }
 0x305   :  { %1945 = vtanh.f32 %v1122_v45  ;;  %v1146_v58 = vmul.f32 0.5, %v1123_v44 }
 0x306   :  { %v1938_v47 = vpop.eup %1937  ;;  %1947 = vtanh.f32 %v1126_v52  ;;  %v1147_v50 = vmul.f32 0.5, %v1127_v60  ;;  %v1157_v52 = vrot.slane %v3216_v62, 7 }
 0x307   :  { %v1940_v16 = vpop.eup %1939  ;;  %v1132_v53 = vmul.f32 0.5, %v1938_v47  ;;  %1949 = vtanh.f32 %v1146_v58 }
 0x308   :  { %v1942_v48 = vpop.eup %1941  ;;  %v1133_v56 = vmul.f32 0.5, %v1940_v16  ;;  %1951 = vtanh.f32 %v1147_v50 }
 0x309   :  { %v1944_v13 = vpop.eup %1943  ;;  %v1134_v59 = vadd.f32 0.5, %v1132_v53  ;;  %v1140_v8 = vmul.f32 0.5, %v1942_v48 }
 0x30a   :  { %v1135_v49 = vadd.f32 0.5, %v1133_v56  ;;  %v1141_v63 = vmul.f32 0.5, %v1944_v13 }
 0x30b   :  { %v1946_v54 = vpop.eup %1945  ;;  %v1142_v55 = vadd.f32 0.5, %v1140_v8 }
 0x30c   :  { %v1948_v45 = vpop.eup %1947  ;;  %v1143_v44 = vadd.f32 0.5, %v1141_v63  ;;  %v1162_v60 = vmul.f32 %v1946_v54, %v1134_v59 }
 0x30d   :  { %v1160_v61 = vmul.f32 %v1156_v9, %v1142_v55  ;;  %v1163_v47 = vmul.f32 %v1948_v45, %v1135_v49  ;;  %v1950_v16 = vpop.eup %1949  ;;  %v3881_v55 = vld [vmem:[#allocation39_spill] sm:$0xff]  ;;  %v3882_v9 = vld [vmem:[#allocation40_spill] sm:$0xff]  ;;  %v3883_v45 = vld [vmem:[#allocation41_spill] sm:$0xff] }
 0x30e   :  { %v1161_v57 = vmul.f32 %v1157_v52, %v1143_v44  ;;  %v1952_v53 = vpop.eup %1951  ;;  %v1150_v56 = vmul.f32 0.5, %v1950_v16  ;;  %v3884_v44 = vld [vmem:[#allocation42_spill] sm:$0xff]  ;;  %v3885_v52 = vld [vmem:[#allocation35_spill] sm:$0xff] }
 0x30f   :  { %v3303_v12 = vadd.f32 %v1162_v60, %v1160_v61  ;;  %v1151_v14 = vmul.f32 0.5, %v1952_v53  ;;  %v3886_v60 = vld [vmem:[#allocation36_spill] sm:$0xff]  ;;  %v3888_v16 = vld [vmem:[#allocation38_spill] sm:$0xff]  ;;  %v3889_v53 = vld [vmem:[#allocation31_spill] sm:$0xff] }
 0x310   :  { %v3305_v58 = vadd.f32 %v1163_v47, %v1161_v57  ;;  %v1152_v50 = vadd.f32 0.5, %v1150_v56  ;;  %v3887_v47 = vld [vmem:[#allocation37_spill] sm:$0xff]  ;;  %v3890_v56 = vld [vmem:[#allocation32_spill] sm:$0xff] }
 0x311   :  { %1953 = vtanh.f32 %v3303_v12  ;;  %v1153_v48 = vadd.f32 0.5, %v1151_v14  ;;  %v3891_v14 = vld [vmem:[#allocation33_spill] sm:$0xff] }
 0x312   :  { %1955 = vtanh.f32 %v3305_v58 }
 0x317   :  { %v1954_v63 = vpop.eup %1953 }
 0x318   :  { %v1956_v62 = vpop.eup %1955  ;;  %v1168_v13 = vmul.f32 %v1954_v63, %v1152_v50  ;;  %v3892_v50 = vld [vmem:[#allocation34_spill] sm:$0xff]  ;;  %v3893_v63 = vld [vmem:[#allocation27_spill] sm:$0xff] }
 0x319   :  { %v1169_v59 = vmul.f32 %v1956_v62, %v1153_v48  ;;  %v3894_v48 = vld [vmem:[#allocation28_spill] sm:$0xff]  ;;  %v3895_v62 = vld [vmem:[#allocation29_spill] sm:$0xff] }
 0x31a   :  { %v3310_v8 = vsel %vm1800_vm3, %v3224_v46, %v1168_v13  ;;  %v1172_v61 = vrot.slane %v1168_v13, 3  ;;  %v3879_v46 = vld [vmem:[#allocation45_spill] sm:$0xff]  ;;  %v3896_v13 = vld [vmem:[#allocation30_spill] sm:$0xff] }
 0x31b   :  { %v3313_v57 = vsel %vm1800_vm3, %v3226_v51, %v1169_v59  ;;  %v1173_v49 = vrot.slane %v1169_v59, 2  ;;  %v3880_v51 = vld [vmem:[#allocation46_spill] sm:$0xff]  ;;  %v3897_v59 = vld [vmem:[#allocation23_spill] sm:$0xff] }
 0x31d   :  { %v1174_v54 = vsel %vm710_vm0, %v1173_v49, %v1172_v61  ;;  %v3898_v61 = vld [vmem:[#allocation24_spill] sm:$0xff]  ;;  %v3899_v49 = vld [vmem:[#allocation25_spill] sm:$0xff] }
 0x31e   :  { %1192 = vmatmul.f32.vlgmr.msrb.gmra.mxu0 %v1174_v54  ;;  %1212 = vmatmul.f32.vlgmr.msrb.gmra.mxu1 %v1174_v54 }
 0x31f   :  { %1232 = vmatmul.f32.vlgmr.msrb.gmra.mxu2 %v1174_v54  ;;  %1252 = vmatmul.f32.vlgmr.msrb.gmra.mxu3 %v1174_v54  ;;  %v3900_v54 = vld [vmem:[#allocation26_spill] sm:$0xff] }
 0x320   :  { %1488 = vmatpush.msrb.mxu0 %v2728_v3  ;;  %1508 = vmatpush.msrb.mxu1 %v2733_v2 }
 0x321   :  { %1528 = vmatpush.msrb.mxu2 %v2738_v1  ;;  %1548 = vmatpush.msrb.mxu3 %v2743_v0 }
 0x322   :  { %1489 = vmatpush.msrb.mxu0 %v3711_v4  ;;  %1509 = vmatpush.msrb.mxu1 %v3712_v5 }
 0x323   :  { %1529 = vmatpush.msrb.mxu2 %v3713_v6  ;;  %1549 = vmatpush.msrb.mxu3 %v2723_v7 }
 0x324   :  { %1490 = vmatpush.msrb.mxu0 %v3714_v10  ;;  %1510 = vmatpush.msrb.mxu1 %v3715_v11 }
 0x325   :  { %1530 = vmatpush.msrb.mxu2 %v3716_v15  ;;  %1550 = vmatpush.msrb.mxu3 %v3717_v17 }
 0x326   :  { %1491 = vmatpush.msrb.mxu0 %v3718_v18  ;;  %1511 = vmatpush.msrb.mxu1 %v3719_v19 }
 0x327   :  { %1531 = vmatpush.msrb.mxu2 %v3720_v20  ;;  %1551 = vmatpush.msrb.mxu3 %v3721_v21 }
 0x328   :  { %1492 = vmatpush.msrb.mxu0 %v3722_v22  ;;  %1512 = vmatpush.msrb.mxu1 %v3723_v23 }
 0x329   :  { %1532 = vmatpush.msrb.mxu2 %v3724_v24  ;;  %1552 = vmatpush.msrb.mxu3 %v3725_v25 }
 0x32a   :  { %1493 = vmatpush.msrb.mxu0 %v3726_v26  ;;  %1513 = vmatpush.msrb.mxu1 %v3727_v27 }
 0x32b   :  { %1533 = vmatpush.msrb.mxu2 %v3728_v28  ;;  %1553 = vmatpush.msrb.mxu3 %v3729_v29 }
 0x32c   :  { %1494 = vmatpush.msrb.mxu0 %v3730_v30  ;;  %1514 = vmatpush.msrb.mxu1 %v3731_v31 }
 0x32d   :  { %1534 = vmatpush.msrb.mxu2 %v3732_v32  ;;  %1554 = vmatpush.msrb.mxu3 %v3733_v33 }
 0x32e   :  { %1495 = vmatpush.msrb.mxu0 %v3734_v35  ;;  %1515 = vmatpush.msrb.mxu1 %v3735_v36 }
 0x32f   :  { %1535 = vmatpush.msrb.mxu2 %v3736_v37  ;;  %1555 = vmatpush.msrb.mxu3 %v3737_v38 }
 0x330   :  { %1496 = vmatpush.msrb.mxu0 %v3738_v39  ;;  %1516 = vmatpush.msrb.mxu1 %v3739_v40 }
 0x331   :  { %1536 = vmatpush.msrb.mxu2 %v3740_v41  ;;  %1556 = vmatpush.msrb.mxu3 %v3741_v42 }
 0x332   :  { %1497 = vmatpush.msrb.mxu0 %v3742_v43  ;;  %1517 = vmatpush.msrb.mxu1 %v3845_v34 }
 0x333   :  { %1537 = vmatpush.msrb.mxu2 %v3879_v46  ;;  %1557 = vmatpush.msrb.mxu3 %v3880_v51 }
 0x334   :  { %1498 = vmatpush.msrb.mxu0 %v3881_v55  ;;  %1518 = vmatpush.msrb.mxu1 %v3882_v9 }
 0x335   :  { %1538 = vmatpush.msrb.mxu2 %v3883_v45  ;;  %1558 = vmatpush.msrb.mxu3 %v3884_v44  ;;  %v3908_v44 = vld [vmem:[#allocation16_spill] sm:$0xff] }
 0x336   :  { %1499 = vmatpush.msrb.mxu0 %v3885_v52  ;;  %1519 = vmatpush.msrb.mxu1 %v3886_v60  ;;  %v3906_v60 = vld [vmem:[#allocation15_spill] sm:$0xff]  ;;  %v3907_v52 = vld [vmem:[#allocation14_spill] sm:$0xff] }
 0x337   :  { %1539 = vmatpush.msrb.mxu2 %v3887_v47  ;;  %1559 = vmatpush.msrb.mxu3 %v3888_v16  ;;  %v3905_v47 = vld [vmem:[#allocation18_spill] sm:$0xff] }
 0x338   :  { %1500 = vmatpush.msrb.mxu0 %v3889_v53  ;;  %1520 = vmatpush.msrb.mxu1 %v3890_v56  ;;  %v3901_v56 = vld [vmem:[#allocation19_spill] sm:$0xff] }
 0x339   :  { %1540 = vmatpush.msrb.mxu2 %v3891_v14  ;;  %1560 = vmatpush.msrb.mxu3 %v3892_v50  ;;  %v3902_v14 = vld [vmem:[#allocation20_spill] sm:$0xff]  ;;  %v3903_v50 = vld [vmem:[#allocation21_spill] sm:$0xff] }
 0x33a   :  { %1501 = vmatpush.msrb.mxu0 %v3893_v63  ;;  %1521 = vmatpush.msrb.mxu1 %v3894_v48  ;;  %v3904_v63 = vld [vmem:[#allocation22_spill] sm:$0xff] }
 0x33b   :  { %1541 = vmatpush.msrb.mxu2 %v3895_v62  ;;  %1561 = vmatpush.msrb.mxu3 %v3896_v13 }
 0x33c   :  { %1502 = vmatpush.msrb.mxu0 %v3897_v59  ;;  %1522 = vmatpush.msrb.mxu1 %v3898_v61 }
 0x33d   :  { %1542 = vmatpush.msrb.mxu2 %v3899_v49  ;;  %1562 = vmatpush.msrb.mxu3 %v3900_v54 }
 0x33e   :  { %1503 = vmatpush.msrb.mxu0 %v3901_v56  ;;  %1523 = vmatpush.msrb.mxu1 %v3902_v14 }
 0x33f   :  { %1543 = vmatpush.msrb.mxu2 %v3903_v50  ;;  %1563 = vmatpush.msrb.mxu3 %v3904_v63 }
 0x39b   :  { %v1193_v48 = vpop.f32.mrf.mxu0  ;;  %v1213_v62 = vpop.f32.mrf.mxu1 }
 0x39c   :  { %v1260_v53 = vrot.slane %v1193_v48, 4  ;;  %v1264_v13 = vrot.slane %v1193_v48, 5  ;;  %v1261_v16 = vrot.slane %v1213_v62, 4  ;;  %v1265_v59 = vrot.slane %v1213_v62, 5 }
 0x39e   :  { %v1276_v61 = vadd.f32 %v1260_v53, %v3905_v47  ;;  %v1280_v49 = vadd.f32 %v1264_v13, %v3906_v60  ;;  %v1277_v54 = vadd.f32 %v1261_v16, %v3907_v52  ;;  %v1281_v56 = vadd.f32 %v1265_v59, %v3908_v44  ;;  %v3909_v53 = vld [vmem:[#allocation17_spill] sm:$0xff]  ;;  %v3910_v60 = vld [vmem:[#allocation76_spill] sm:$0xff]  ;;  %v3911_v52 = vld [vmem:[#allocation75_spill] sm:$0xff] }
 0x3a0   :  { %v1284_v45 = vmul.f32 0.5, %v1276_v61  ;;  %v1285_v14 = vmul.f32 0.5, %v1280_v49  ;;  %v1292_v9 = vmul.f32 0.5, %v1277_v54  ;;  %v1293_v50 = vmul.f32 0.5, %v1281_v56  ;;  %v3912_v61 = vld [vmem:[#allocation77_spill] sm:$0xff] }
 0x3a2   :  { %1957 = vtanh.f32 %v1284_v45  ;;  %v1233_v63 = vpop.f32.mrf.mxu2  ;;  %v1253_v55 = vpop.f32.mrf.mxu3 }
 0x3a3   :  { %1959 = vtanh.f32 %v1285_v14  ;;  %v1262_v51 = vrot.slane %v1233_v63, 4  ;;  %v1266_v48 = vrot.slane %v1233_v63, 5  ;;  %v1263_v46 = vrot.slane %v1253_v55, 4 }
 0x3a4   :  { %1961 = vtanh.f32 %v1292_v9  ;;  %v1267_v62 = vrot.slane %v1253_v55, 5 }
 0x3a5   :  { %1963 = vtanh.f32 %v1293_v50  ;;  %v1278_v13 = vadd.f32 %v1262_v51, %v3909_v53  ;;  %v1282_v16 = vadd.f32 %v1266_v48, %v3910_v60  ;;  %v1279_v59 = vadd.f32 %v1263_v46, %v3911_v52 }
 0x3a6   :  { %v1283_v49 = vadd.f32 %v1267_v62, %v3912_v61  ;;  %v1312_v62 = vrot.slane %v3303_v12, 7 }
 0x3a7   :  { %1965 = vtanh.f32 %v1278_v13  ;;  %v1302_v56 = vmul.f32 0.5, %v1279_v59 }
 0x3a8   :  { %v1958_v45 = vpop.eup %1957  ;;  %1967 = vtanh.f32 %v1282_v16  ;;  %v1303_v54 = vmul.f32 0.5, %v1283_v49  ;;  %v1313_v16 = vrot.slane %v3305_v58, 7 }
 0x3a9   :  { %v1960_v14 = vpop.eup %1959  ;;  %v1288_v44 = vmul.f32 0.5, %v1958_v45  ;;  %1969 = vtanh.f32 %v1302_v56 }
 0x3aa   :  { %v1962_v63 = vpop.eup %1961  ;;  %v1289_v47 = vmul.f32 0.5, %v1960_v14  ;;  %1971 = vtanh.f32 %v1303_v54 }
 0x3ab   :  { %v1964_v9 = vpop.eup %1963  ;;  %v1290_v55 = vadd.f32 0.5, %v1288_v44  ;;  %v1296_v50 = vmul.f32 0.5, %v1962_v63 }
 0x3ac   :  { %v1291_v51 = vadd.f32 0.5, %v1289_v47  ;;  %v1297_v53 = vmul.f32 0.5, %v1964_v9 }
 0x3ad   :  { %v1966_v48 = vpop.eup %1965  ;;  %v1298_v46 = vadd.f32 0.5, %v1296_v50 }
 0x3ae   :  { %v1968_v13 = vpop.eup %1967  ;;  %v1299_v59 = vadd.f32 0.5, %v1297_v53  ;;  %v1318_v49 = vmul.f32 %v1966_v48, %v1290_v55 }
 0x3af   :  { %v1316_v61 = vmul.f32 %v1312_v62, %v1298_v46  ;;  %v1319_v45 = vmul.f32 %v1968_v13, %v1291_v51  ;;  %v1970_v14 = vpop.eup %1969 }
 0x3b0   :  { %v1317_v52 = vmul.f32 %v1313_v16, %v1299_v59  ;;  %v1972_v44 = vpop.eup %1971  ;;  %v1306_v47 = vmul.f32 0.5, %v1970_v14 }
 0x3b1   :  { %v3390_v60 = vadd.f32 %v1318_v49, %v1316_v61  ;;  %v1307_v12 = vmul.f32 0.5, %v1972_v44 }
 0x3b2   :  { %v3392_v56 = vadd.f32 %v1319_v45, %v1317_v52  ;;  %v1308_v54 = vadd.f32 0.5, %v1306_v47 }
 0x3b3   :  { %1973 = vtanh.f32 %v3390_v60  ;;  %v1309_v63 = vadd.f32 0.5, %v1307_v12  ;;  %v3943_v12 = vld [vmem:[#allocation17_spill] sm:$0xff] }
 0x3b4   :  { %1975 = vtanh.f32 %v3392_v56 }
 0x3b9   :  { %v1974_v53 = vpop.eup %1973 }
 0x3ba   :  { %v1976_v58 = vpop.eup %1975  ;;  %v1324_v9 = vmul.f32 %v1974_v53, %v1308_v54  ;;  %v3944_v53 = vld [vmem:[#allocation76_spill] sm:$0xff] }
 0x3bb   :  { %v1325_v55 = vmul.f32 %v1976_v58, %v1309_v63  ;;  %v3945_v58 = vld [vmem:[#allocation75_spill] sm:$0xff] }
 0x3bc   :  { %v3397_v50 = vsel %vm1803_vm4, %v3310_v8, %v1324_v9  ;;  %v1328_v61 = vrot.slane %v1324_v9, 4  ;;  %v3942_v8 = vld [vmem:[#allocation16_spill] sm:$0xff] }
 0x3bd   :  { %v3400_v52 = vsel %vm1803_vm4, %v3313_v57, %v1325_v55  ;;  %v1329_v51 = vrot.slane %v1325_v55, 3  ;;  %v3946_v55 = vld [vmem:[#allocation77_spill] sm:$0xff] }
 0x3bf   :  { %v1330_v48 = vsel %vm710_vm0, %v1329_v51, %v1328_v61 }
 0x3c0   :  { %1348 = vmatmul.f32.vlgmr.msra.gmra.mxu0 %v1330_v48  ;;  %1368 = vmatmul.f32.vlgmr.msra.gmra.mxu1 %v1330_v48 }
 0x3c1   :  { %1388 = vmatmul.f32.vlgmr.msra.gmra.mxu2 %v1330_v48  ;;  %1408 = vmatmul.f32.vlgmr.msra.gmra.mxu3 %v1330_v48 }
 0x3c2   :  { %1644 = vmatpush.msra.mxu0 %v2728_v3  ;;  %1664 = vmatpush.msra.mxu1 %v2733_v2  ;;  %v3915_v2 = vld [vmem:[#allocation39_spill] sm:$0xff]  ;;  %v3916_v3 = vld [vmem:[#allocation40_spill] sm:$0xff] }
 0x3c3   :  { %1684 = vmatpush.msra.mxu2 %v2738_v1  ;;  %1704 = vmatpush.msra.mxu3 %v2743_v0  ;;  %v3913_v0 = vld [vmem:[#allocation45_spill] sm:$0xff]  ;;  %v3914_v1 = vld [vmem:[#allocation46_spill] sm:$0xff] }
 0x3c4   :  { %1645 = vmatpush.msra.mxu0 %v3711_v4  ;;  %1665 = vmatpush.msra.mxu1 %v3712_v5  ;;  %v3918_v4 = vld [vmem:[#allocation42_spill] sm:$0xff]  ;;  %v3919_v5 = vld [vmem:[#allocation35_spill] sm:$0xff] }
 0x3c5   :  { %1685 = vmatpush.msra.mxu2 %v3713_v6  ;;  %1705 = vmatpush.msra.mxu3 %v2723_v7  ;;  %v3917_v7 = vld [vmem:[#allocation41_spill] sm:$0xff]  ;;  %v3920_v6 = vld [vmem:[#allocation36_spill] sm:$0xff] }
 0x3c6   :  { %1646 = vmatpush.msra.mxu0 %v3714_v10  ;;  %1666 = vmatpush.msra.mxu1 %v3715_v11  ;;  %v3921_v10 = vld [vmem:[#allocation37_spill] sm:$0xff]  ;;  %v3922_v11 = vld [vmem:[#allocation38_spill] sm:$0xff] }
 0x3c7   :  { %1686 = vmatpush.msra.mxu2 %v3716_v15  ;;  %1706 = vmatpush.msra.mxu3 %v3717_v17  ;;  %v3923_v15 = vld [vmem:[#allocation31_spill] sm:$0xff]  ;;  %v3924_v17 = vld [vmem:[#allocation32_spill] sm:$0xff] }
 0x3c8   :  { %1647 = vmatpush.msra.mxu0 %v3718_v18  ;;  %1667 = vmatpush.msra.mxu1 %v3719_v19  ;;  %v3925_v18 = vld [vmem:[#allocation33_spill] sm:$0xff]  ;;  %v3926_v19 = vld [vmem:[#allocation34_spill] sm:$0xff] }
 0x3c9   :  { %1687 = vmatpush.msra.mxu2 %v3720_v20  ;;  %1707 = vmatpush.msra.mxu3 %v3721_v21  ;;  %v3927_v20 = vld [vmem:[#allocation27_spill] sm:$0xff]  ;;  %v3928_v21 = vld [vmem:[#allocation28_spill] sm:$0xff] }
 0x3ca   :  { %1648 = vmatpush.msra.mxu0 %v3722_v22  ;;  %1668 = vmatpush.msra.mxu1 %v3723_v23  ;;  %v3929_v22 = vld [vmem:[#allocation29_spill] sm:$0xff]  ;;  %v3930_v23 = vld [vmem:[#allocation30_spill] sm:$0xff] }
 0x3cb   :  { %1688 = vmatpush.msra.mxu2 %v3724_v24  ;;  %1708 = vmatpush.msra.mxu3 %v3725_v25  ;;  %v3931_v24 = vld [vmem:[#allocation23_spill] sm:$0xff]  ;;  %v3932_v25 = vld [vmem:[#allocation24_spill] sm:$0xff] }
 0x3cc   :  { %1649 = vmatpush.msra.mxu0 %v3726_v26  ;;  %1669 = vmatpush.msra.mxu1 %v3727_v27  ;;  %v3933_v26 = vld [vmem:[#allocation25_spill] sm:$0xff]  ;;  %v3934_v27 = vld [vmem:[#allocation26_spill] sm:$0xff] }
 0x3cd   :  { %1689 = vmatpush.msra.mxu2 %v3728_v28  ;;  %1709 = vmatpush.msra.mxu3 %v3729_v29  ;;  %v3935_v28 = vld [vmem:[#allocation19_spill] sm:$0xff]  ;;  %v3936_v29 = vld [vmem:[#allocation20_spill] sm:$0xff] }
 0x3ce   :  { %1650 = vmatpush.msra.mxu0 %v3730_v30  ;;  %1670 = vmatpush.msra.mxu1 %v3731_v31  ;;  %v3937_v30 = vld [vmem:[#allocation21_spill] sm:$0xff]  ;;  %v3938_v31 = vld [vmem:[#allocation22_spill] sm:$0xff] }
 0x3cf   :  { %1690 = vmatpush.msra.mxu2 %v3732_v32  ;;  %1710 = vmatpush.msra.mxu3 %v3733_v33 }
 0x3d0   :  { %1651 = vmatpush.msra.mxu0 %v3734_v35  ;;  %1671 = vmatpush.msra.mxu1 %v3735_v36 }
 0x3d1   :  { %1691 = vmatpush.msra.mxu2 %v3736_v37  ;;  %1711 = vmatpush.msra.mxu3 %v3737_v38 }
 0x3d2   :  { %1652 = vmatpush.msra.mxu0 %v3738_v39  ;;  %1672 = vmatpush.msra.mxu1 %v3739_v40  ;;  %v3939_v39 = vld [vmem:[#allocation18_spill] sm:$0xff] }
 0x3d3   :  { %1692 = vmatpush.msra.mxu2 %v3740_v41  ;;  %1712 = vmatpush.msra.mxu3 %v3741_v42  ;;  %v3940_v41 = vld [vmem:[#allocation15_spill] sm:$0xff] }
 0x3d4   :  { %1653 = vmatpush.msra.mxu0 %v3742_v43  ;;  %1673 = vmatpush.msra.mxu1 %v3845_v34  ;;  %v3941_v43 = vld [vmem:[#allocation14_spill] sm:$0xff] }
 0x3d5   :  { %1693 = vmatpush.msra.mxu2 %v3913_v0  ;;  %1713 = vmatpush.msra.mxu3 %v3914_v1 }
 0x3d6   :  { %1654 = vmatpush.msra.mxu0 %v3915_v2  ;;  %1674 = vmatpush.msra.mxu1 %v3916_v3 }
 0x3d7   :  { %1694 = vmatpush.msra.mxu2 %v3917_v7  ;;  %1714 = vmatpush.msra.mxu3 %v3918_v4 }
 0x3d8   :  { %1655 = vmatpush.msra.mxu0 %v3919_v5  ;;  %1675 = vmatpush.msra.mxu1 %v3920_v6 }
 0x3d9   :  { %1695 = vmatpush.msra.mxu2 %v3921_v10  ;;  %1715 = vmatpush.msra.mxu3 %v3922_v11 }
 0x3da   :  { %1656 = vmatpush.msra.mxu0 %v3923_v15  ;;  %1676 = vmatpush.msra.mxu1 %v3924_v17 }
 0x3db   :  { %1696 = vmatpush.msra.mxu2 %v3925_v18  ;;  %1716 = vmatpush.msra.mxu3 %v3926_v19  ;;  %v1468_v18 = vrot.slane %v3390_v60, 7 }
 0x3dc   :  { %1657 = vmatpush.msra.mxu0 %v3927_v20  ;;  %1677 = vmatpush.msra.mxu1 %v3928_v21  ;;  %v1469_v21 = vrot.slane %v3392_v56, 7 }
 0x3dd   :  { %1697 = vmatpush.msra.mxu2 %v3929_v22  ;;  %1717 = vmatpush.msra.mxu3 %v3930_v23 }
 0x3de   :  { %1658 = vmatpush.msra.mxu0 %v3931_v24  ;;  %1678 = vmatpush.msra.mxu1 %v3932_v25 }
 0x3df   :  { %1698 = vmatpush.msra.mxu2 %v3933_v26  ;;  %1718 = vmatpush.msra.mxu3 %v3934_v27 }
 0x3e0   :  { %1659 = vmatpush.msra.mxu0 %v3935_v28  ;;  %1679 = vmatpush.msra.mxu1 %v3936_v29 }
 0x3e1   :  { %1699 = vmatpush.msra.mxu2 %v3937_v30  ;;  %1719 = vmatpush.msra.mxu3 %v3938_v31 }
 0x43d   :  { %v1349_v32 = vpop.f32.mrf.mxu0  ;;  %v1369_v33 = vpop.f32.mrf.mxu1 }
 0x43e   :  { %v1416_v35 = vrot.slane %v1349_v32, 3  ;;  %v1420_v36 = vrot.slane %v1349_v32, 4  ;;  %v1417_v37 = vrot.slane %v1369_v33, 3  ;;  %v1421_v38 = vrot.slane %v1369_v33, 4 }
 0x440   :  { %v1432_v40 = vadd.f32 %v1416_v35, %v3939_v39  ;;  %v1436_v42 = vadd.f32 %v1420_v36, %v3940_v41  ;;  %v1433_v34 = vadd.f32 %v1417_v37, %v3941_v43  ;;  %v1437_v57 = vadd.f32 %v1421_v38, %v3942_v8 }
 0x442   :  { %v1440_v46 = vmul.f32 0.5, %v1432_v40  ;;  %v1441_v62 = vmul.f32 0.5, %v1436_v42  ;;  %v1448_v13 = vmul.f32 0.5, %v1433_v34  ;;  %v1449_v59 = vmul.f32 0.5, %v1437_v57 }
 0x444   :  { %1977 = vtanh.f32 %v1440_v46  ;;  %v1389_v16 = vpop.f32.mrf.mxu2  ;;  %v1409_v49 = vpop.f32.mrf.mxu3 }
 0x445   :  { %1979 = vtanh.f32 %v1441_v62  ;;  %v1418_v45 = vrot.slane %v1389_v16, 3  ;;  %v1422_v14 = vrot.slane %v1389_v16, 4  ;;  %v1419_v44 = vrot.slane %v1409_v49, 3 }
 0x446   :  { %1981 = vtanh.f32 %v1448_v13  ;;  %v1423_v47 = vrot.slane %v1409_v49, 4 }
 0x447   :  { %1983 = vtanh.f32 %v1449_v59  ;;  %v1434_v54 = vadd.f32 %v1418_v45, %v3943_v12  ;;  %v1438_v63 = vadd.f32 %v1422_v14, %v3944_v53  ;;  %v1435_v9 = vadd.f32 %v1419_v44, %v3945_v58 }
 0x448   :  { %v1439_v61 = vadd.f32 %v1423_v47, %v3946_v55 }
 0x449   :  { %1985 = vtanh.f32 %v1434_v54  ;;  %v1458_v51 = vmul.f32 0.5, %v1435_v9 }
 0x44a   :  { %v1978_v48 = vpop.eup %1977  ;;  %1987 = vtanh.f32 %v1438_v63  ;;  %v1459_v0 = vmul.f32 0.5, %v1439_v61 }
 0x44b   :  { %v1980_v1 = vpop.eup %1979  ;;  %v1444_v2 = vmul.f32 0.5, %v1978_v48  ;;  %1989 = vtanh.f32 %v1458_v51 }
 0x44c   :  { %v1982_v3 = vpop.eup %1981  ;;  %v1445_v7 = vmul.f32 0.5, %v1980_v1  ;;  %1991 = vtanh.f32 %v1459_v0 }
 0x44d   :  { %v1984_v4 = vpop.eup %1983  ;;  %v1446_v5 = vadd.f32 0.5, %v1444_v2  ;;  %v1452_v6 = vmul.f32 0.5, %v1982_v3 }
 0x44e   :  { %v1447_v10 = vadd.f32 0.5, %v1445_v7  ;;  %v1453_v11 = vmul.f32 0.5, %v1984_v4 }
 0x44f   :  { %v1986_v15 = vpop.eup %1985  ;;  %v1454_v17 = vadd.f32 0.5, %v1452_v6 }
 0x450   :  { %v1988_v19 = vpop.eup %1987  ;;  %v1455_v20 = vadd.f32 0.5, %v1453_v11  ;;  %v1474_v22 = vmul.f32 %v1986_v15, %v1446_v5 }
 0x451   :  { %v1472_v23 = vmul.f32 %v1468_v18, %v1454_v17  ;;  %v1475_v24 = vmul.f32 %v1988_v19, %v1447_v10  ;;  %v1990_v26 = vpop.eup %1989 }
 0x452   :  { %v1473_v25 = vmul.f32 %v1469_v21, %v1455_v20  ;;  %v1992_v28 = vpop.eup %1991  ;;  %v1462_v30 = vmul.f32 0.5, %v1990_v26 }
 0x453   :  { %v3477_v27 = vadd.f32 %v1474_v22, %v1472_v23  ;;  %v1463_v60 = vmul.f32 0.5, %v1992_v28 }
 0x454   :  { %v3479_v29 = vadd.f32 %v1475_v24, %v1473_v25  ;;  %v1464_v31 = vadd.f32 0.5, %v1462_v30 }
 0x455   :  { %1993 = vtanh.f32 %v3477_v27  ;;  %v1465_v33 = vadd.f32 0.5, %v1463_v60  ;;  %v1624_v25 = vrot.slane %v3477_v27, 7 }
 0x456   :  { %1995 = vtanh.f32 %v3479_v29  ;;  %v1625_v30 = vrot.slane %v3479_v29, 7 }
 0x45b   :  { %v1994_v32 = vpop.eup %1993 }
 0x45c   :  { %v1996_v56 = vpop.eup %1995  ;;  %v1480_v35 = vmul.f32 %v1994_v32, %v1464_v31 }
 0x45d   :  { %v1481_v36 = vmul.f32 %v1996_v56, %v1465_v33 }
 0x45e   :  { %v3484_v37 = vsel %vm1806_vm5, %v3397_v50, %v1480_v35  ;;  %v1484_v38 = vrot.slane %v1480_v35, 5 }
 0x45f   :  { %v3487_v40 = vsel %vm1806_vm5, %v3400_v52, %v1481_v36  ;;  %v1485_v42 = vrot.slane %v1481_v36, 4 }
 0x461   :  { %v1486_v34 = vsel %vm710_vm0, %v1485_v42, %v1484_v38 }
 0x462   :  { %1504 = vmatmul.f32.vlgmr.msrb.gmra.mxu0 %v1486_v34  ;;  %1524 = vmatmul.f32.vlgmr.msrb.gmra.mxu1 %v1486_v34 }
 0x463   :  { %1544 = vmatmul.f32.vlgmr.msrb.gmra.mxu2 %v1486_v34  ;;  %1564 = vmatmul.f32.vlgmr.msrb.gmra.mxu3 %v1486_v34 }
 0x4df   :  { %v1505_v57 = vpop.f32.mrf.mxu0  ;;  %v1525_v46 = vpop.f32.mrf.mxu1 }
 0x4e0   :  { %v1572_v62 = vrot.slane %v1505_v57, 2  ;;  %v1576_v13 = vrot.slane %v1505_v57, 3  ;;  %v1573_v59 = vrot.slane %v1525_v46, 2  ;;  %v1577_v16 = vrot.slane %v1525_v46, 3 }
 0x4e2   :  { %v1588_v50 = vadd.f32 %v1572_v62, %v3939_v39  ;;  %v1592_v49 = vadd.f32 %v1576_v13, %v3940_v41  ;;  %v1589_v52 = vadd.f32 %v1573_v59, %v3941_v43  ;;  %v1593_v45 = vadd.f32 %v1577_v16, %v3942_v8 }
 0x4e4   :  { %v1596_v14 = vmul.f32 0.5, %v1588_v50  ;;  %v1597_v44 = vmul.f32 0.5, %v1592_v49  ;;  %v1604_v47 = vmul.f32 0.5, %v1589_v52  ;;  %v1605_v54 = vmul.f32 0.5, %v1593_v45 }
 0x4e6   :  { %1997 = vtanh.f32 %v1596_v14  ;;  %v1545_v63 = vpop.f32.mrf.mxu2  ;;  %v1565_v9 = vpop.f32.mrf.mxu3 }
 0x4e7   :  { %1999 = vtanh.f32 %v1597_v44  ;;  %v1574_v61 = vrot.slane %v1545_v63, 2  ;;  %v1578_v51 = vrot.slane %v1545_v63, 3  ;;  %v1575_v48 = vrot.slane %v1565_v9, 2 }
 0x4e8   :  { %2001 = vtanh.f32 %v1604_v47  ;;  %v1579_v0 = vrot.slane %v1565_v9, 3 }
 0x4e9   :  { %2003 = vtanh.f32 %v1605_v54  ;;  %v1590_v1 = vadd.f32 %v1574_v61, %v3943_v12  ;;  %v1594_v2 = vadd.f32 %v1578_v51, %v3944_v53  ;;  %v1591_v3 = vadd.f32 %v1575_v48, %v3945_v58 }
 0x4ea   :  { %v1595_v7 = vadd.f32 %v1579_v0, %v3946_v55 }
 0x4eb   :  { %2005 = vtanh.f32 %v1590_v1  ;;  %v1614_v4 = vmul.f32 0.5, %v1591_v3 }
 0x4ec   :  { %v1998_v5 = vpop.eup %1997  ;;  %2007 = vtanh.f32 %v1594_v2  ;;  %v1615_v6 = vmul.f32 0.5, %v1595_v7 }
 0x4ed   :  { %v2000_v10 = vpop.eup %1999  ;;  %v1600_v11 = vmul.f32 0.5, %v1998_v5  ;;  %2009 = vtanh.f32 %v1614_v4 }
 0x4ee   :  { %v2002_v15 = vpop.eup %2001  ;;  %v1601_v17 = vmul.f32 0.5, %v2000_v10  ;;  %2011 = vtanh.f32 %v1615_v6 }
 0x4ef   :  { %v2004_v18 = vpop.eup %2003  ;;  %v1602_v19 = vadd.f32 0.5, %v1600_v11  ;;  %v1608_v20 = vmul.f32 0.5, %v2002_v15 }
 0x4f0   :  { %v1603_v21 = vadd.f32 0.5, %v1601_v17  ;;  %v1609_v22 = vmul.f32 0.5, %v2004_v18 }
 0x4f1   :  { %v2006_v23 = vpop.eup %2005  ;;  %v1610_v24 = vadd.f32 0.5, %v1608_v20 }
 0x4f2   :  { %v2008_v26 = vpop.eup %2007  ;;  %v1611_v28 = vadd.f32 0.5, %v1609_v22  ;;  %v1630_v60 = vmul.f32 %v2006_v23, %v1602_v19 }
 0x4f3   :  { %v1628_v31 = vmul.f32 %v1624_v25, %v1610_v24  ;;  %v1631_v32 = vmul.f32 %v2008_v26, %v1603_v21  ;;  %v2010_v56 = vpop.eup %2009 }
 0x4f4   :  { %v1629_v33 = vmul.f32 %v1625_v30, %v1611_v28  ;;  %v2012_v36 = vpop.eup %2011  ;;  %v1618_v42 = vmul.f32 0.5, %v2010_v56 }
 0x4f5   :  { %v3500_v35 = vadd.f32 %v1630_v60, %v1628_v31  ;;  %v1619_v27 = vmul.f32 0.5, %v2012_v36 }
 0x4f6   :  { %v3502_v38 = vadd.f32 %v1631_v32, %v1629_v33  ;;  %v1620_v34 = vadd.f32 0.5, %v1618_v42 }
 0x4f7   :  { %2013 = vtanh.f32 %v3500_v35  ;;  %v1621_v46 = vadd.f32 0.5, %v1619_v27 }
 0x4f8   :  { %2015 = vtanh.f32 %v3502_v38  ;;  %v1781_v28 = vrot.slane %v3502_v38, 7 }
 0x4fd   :  { %v2014_v57 = vpop.eup %2013 }
 0x4fe   :  { %v2016_v29 = vpop.eup %2015  ;;  %v1636_v62 = vmul.f32 %v2014_v57, %v1620_v34 }
 0x4ff   :  { %v1637_v13 = vmul.f32 %v2016_v29, %v1621_v46 }
 0x500   :  { %v3507_v59 = vsel %vm1809_vm6, %v3484_v37, %v1636_v62  ;;  %v1640_v16 = vrot.slane %v1636_v62, 6 }
 0x501   :  { %v3510_v50 = vsel %vm1809_vm6, %v3487_v40, %v1637_v13  ;;  %v1641_v49 = vrot.slane %v1637_v13, 5 }
 0x503   :  { %v1642_v52 = vsel %vm710_vm0, %v1641_v49, %v1640_v16 }
 0x504   :  { %1660 = vmatmul.f32.vlgmr.msra.gmra.mxu0 %v1642_v52  ;;  %1680 = vmatmul.f32.vlgmr.msra.gmra.mxu1 %v1642_v52 }
 0x505   :  { %1700 = vmatmul.f32.vlgmr.msra.gmra.mxu2 %v1642_v52  ;;  %1720 = vmatmul.f32.vlgmr.msra.gmra.mxu3 %v1642_v52 }
 0x581   :  { %v1661_v45 = vpop.f32.mrf.mxu0  ;;  %v1681_v14 = vpop.f32.mrf.mxu1 }
 0x582   :  { %v1728_v44 = vrot.slane %v1661_v45, 1  ;;  %v1732_v47 = vrot.slane %v1661_v45, 2  ;;  %v1729_v54 = vrot.slane %v1681_v14, 1  ;;  %v1733_v63 = vrot.slane %v1681_v14, 2 }
 0x584   :  { %v1744_v37 = vadd.f32 %v1728_v44, %v3939_v39  ;;  %v1748_v9 = vadd.f32 %v1732_v47, %v3940_v41  ;;  %v1745_v40 = vadd.f32 %v1729_v54, %v3941_v43  ;;  %v1749_v61 = vadd.f32 %v1733_v63, %v3942_v8 }
 0x586   :  { %v1752_v51 = vmul.f32 0.5, %v1744_v37  ;;  %v1753_v48 = vmul.f32 0.5, %v1748_v9  ;;  %v1760_v0 = vmul.f32 0.5, %v1745_v40  ;;  %v1761_v1 = vmul.f32 0.5, %v1749_v61 }
 0x588   :  { %2017 = vtanh.f32 %v1752_v51  ;;  %v1701_v2 = vpop.f32.mrf.mxu2  ;;  %v1721_v3 = vpop.f32.mrf.mxu3 }
 0x589   :  { %2019 = vtanh.f32 %v1753_v48  ;;  %v1730_v7 = vrot.slane %v1701_v2, 1  ;;  %v1734_v4 = vrot.slane %v1701_v2, 2  ;;  %v1731_v5 = vrot.slane %v1721_v3, 1 }
 0x58a   :  { %2021 = vtanh.f32 %v1760_v0  ;;  %v1735_v6 = vrot.slane %v1721_v3, 2 }
 0x58b   :  { %2023 = vtanh.f32 %v1761_v1  ;;  %v1746_v39 = vadd.f32 %v1730_v7, %v3943_v12  ;;  %v1750_v41 = vadd.f32 %v1734_v4, %v3944_v53  ;;  %v1747_v43 = vadd.f32 %v1731_v5, %v3945_v58 }
 0x58c   :  { %v1751_v8 = vadd.f32 %v1735_v6, %v3946_v55  ;;  %v1780_v55 = vrot.slane %v3500_v35, 7 }
 0x58d   :  { %2025 = vtanh.f32 %v1746_v39  ;;  %v1770_v10 = vmul.f32 0.5, %v1747_v43 }
 0x58e   :  { %v2018_v11 = vpop.eup %2017  ;;  %2027 = vtanh.f32 %v1750_v41  ;;  %v1771_v15 = vmul.f32 0.5, %v1751_v8 }
 0x58f   :  { %v2020_v17 = vpop.eup %2019  ;;  %v1756_v18 = vmul.f32 0.5, %v2018_v11  ;;  %2029 = vtanh.f32 %v1770_v10 }
 0x590   :  { %v2022_v19 = vpop.eup %2021  ;;  %v1757_v20 = vmul.f32 0.5, %v2020_v17  ;;  %2031 = vtanh.f32 %v1771_v15 }
 0x591   :  { %v2024_v21 = vpop.eup %2023  ;;  %v1758_v22 = vadd.f32 0.5, %v1756_v18  ;;  %v1764_v23 = vmul.f32 0.5, %v2022_v19 }
 0x592   :  { %v1759_v12 = vadd.f32 0.5, %v1757_v20  ;;  %v1765_v24 = vmul.f32 0.5, %v2024_v21 }
 0x593   :  { %v2026_v53 = vpop.eup %2025  ;;  %v1766_v58 = vadd.f32 0.5, %v1764_v23 }
 0x594   :  { %v2028_v25 = vpop.eup %2027  ;;  %v1767_v26 = vadd.f32 0.5, %v1765_v24  ;;  %v1786_v30 = vmul.f32 %v2026_v53, %v1758_v22 }
 0x595   :  { %v1784_v60 = vmul.f32 %v1780_v55, %v1766_v58  ;;  %v1787_v31 = vmul.f32 %v2028_v25, %v1759_v12  ;;  %v2030_v33 = vpop.eup %2029 }
 0x596   :  { %v1785_v32 = vmul.f32 %v1781_v28, %v1767_v26  ;;  %v2032_v36 = vpop.eup %2031  ;;  %v1774_v34 = vmul.f32 0.5, %v2030_v33 }
 0x597   :  { %v1788_v56 = vadd.f32 %v1786_v30, %v1784_v60  ;;  %v1775_v57 = vmul.f32 0.5, %v2032_v36 }
 0x598   :  { %v1789_v42 = vadd.f32 %v1787_v31, %v1785_v32  ;;  %v1776_v35 = vadd.f32 0.5, %v1774_v34 }
 0x599   :  { %2033 = vtanh.f32 %v1788_v56  ;;  %1829 = vst [vmem:[#allocation6 - $0x7] sm:$0x80] %v1788_v56  ;;  %v1777_v46 = vadd.f32 0.5, %v1775_v57 }
 0x59a   :  { %2035 = vtanh.f32 %v1789_v42  ;;  %v1826_v27 = vrot.slane %v1789_v42, 7 }
 0x59c   :  { %1830 = vst [vmem:[#allocation6 + $0x1] sm:$0x1] %v1826_v27 }
 0x59f   :  { %v2034_v38 = vpop.eup %2033 }
 0x5a0   :  { %v2036_v29 = vpop.eup %2035  ;;  %v1792_v62 = vmul.f32 %v2034_v38, %v1776_v35 }
 0x5a1   :  { %v1793_v13 = vmul.f32 %v2036_v29, %v1777_v46 }
 0x5a2   :  { %v1813_v16 = vsel %vm1812_vm7, %v3507_v59, %v1792_v62  ;;  %1822 = vst [vmem:[#allocation5 - $0x7] sm:$0x80] %v1792_v62 }
 0x5a3   :  { %v1814_v49 = vsel %vm1812_vm7, %v3510_v50, %v1793_v13  ;;  %v1819_v52 = vrot.slane %v1793_v13, 7  ;;  %1815 = vst [vmem:[#allocation7] sm:$0xff] %v1813_v16 }
 0x5a4   :  { %1816 = vst [vmem:[#allocation7 + $0x8] sm:$0xff] %v1814_v49 }
 0x5a5   :  { %1823 = vst [vmem:[#allocation5 + $0x1] sm:$0x1] %v1819_v52  ;;  %1843 = dma.vmem_to_hbm [thread:$0]  %s1836_s5, 256, %s1838_s16, [#allocation8], %s2068_s17, %s2068_s17, %s2069_s18  }
 0x5a6   :  { %2065 = dma.done.wait [#allocation8], 256  }
 0x5a7   :  { %2066 = vsyncadd [#allocation8], 4294967040 }
 0x5a8   :  { %1848 = vsyncpa [#allocation8], 1 }
 0x5a9   :  { %1849 = vsyncmov [#allocation4] }
 0x5ac   :  { %s1850_s6 = vpop.sfrf %1849 }
 0x5ad   :  { %p1870_p0 = scmp.ne.s32.totalorder %s1850_s6, 0 }
 0x5af   :  { %1854 = shalt.err (%p1870_p0)  }
 0x5b0   :  { %1856 = vsyncmov [#allocation4 + $0x1] }
 0x5b3   :  { %s1857_s19 = vpop.sfrf %1856 }
 0x5b4   :  { %p1871_p1 = scmp.ne.s32.totalorder %s1857_s19, 0 }
 0x5b6   :  { %1861 = shalt.err (%p1871_p1)  }

</bundles_post_ra>
